<compile_context>
chip_gen: v6e
topology: v6e:2x2x1
jax: 0.10.0
libtpu: 0.0.40
codegen_flags: <defaults>
</compile_context>

<pallas_src>
import math
import numpy as np
import jax
import jax.numpy as jnp
from jax import lax
from jax.experimental import pallas as pl
from jax.experimental.pallas import tpu as pltpu


# ------------------------------- kernel --------------------------------------

def _make_kernel(Bt, C_in, C_out, H, W, KH, KW, pad,
                 weight_gain, activation, act_gain, clamp):
    """Builds a kernel that processes Bt images per grid step."""
    Hp, Wp = H + 2 * pad, W + 2 * pad
    H_out, W_out = Hp - KH + 1, Wp - KW + 1
    HWo = H_out * W_out

    def kernel(x_ref, w_ref, b_ref, o_ref):
        # x_ref: (Bt, C_in, H, W)         unpadded NCHW input tile (caller dtype)
        # w_ref: (C_out, KH*KW*C_in)      tap-major weight matrix (caller dtype)
        # b_ref: (C_out, 1)               f32 bias column
        # o_ref: (Bt, C_out, H_out*W_out) lane-dense output
        x = x_ref[...]

        # In-kernel zero padding (halo) -- no jnp.pad HBM pass in the wrapper.
        if pad > 0:
            zh = jnp.zeros((Bt, C_in, pad, W), x.dtype)
            x = jnp.concatenate([zh, x, zh], axis=2)       # (Bt, C_in, Hp, W)
            zw = jnp.zeros((Bt, C_in, Hp, pad), x.dtype)
            x = jnp.concatenate([zw, x, zw], axis=3)       # (Bt, C_in, Hp, Wp)

        # im2col patch matrix: rows = (tap-major, C_in-minor); columns =
        # (image-major, output-pixel-minor) => lane dim is Bt*H_out*W_out.
        slabs = []
        for dy in range(KH):
            for dx in range(KW):
                per_img = [
                    x[b, :, dy:dy + H_out, dx:dx + W_out].reshape(C_in, HWo)
                    for b in range(Bt)
                ]
                slabs.append(per_img[0] if Bt == 1
                             else jnp.concatenate(per_img, axis=1))
        patches = slabs[0] if len(slabs) == 1 else jnp.concatenate(slabs, axis=0)

        # Single MXU matmul: (C_out, K) x (K, Bt*HWo) -> f32 accumulator.
        acc = jnp.dot(w_ref[...], patches, preferred_element_type=jnp.float32)

        # Scalar weight_gain on the (small, lane-dense) accumulator, then the
        # bias_act epilogue: bias -> activation -> gain -> clamp.
        y = acc * jnp.float32(weight_gain) + b_ref[...].astype(jnp.float32)
        if activation == "lrelu":
            y = jnp.where(y >= 0, y, jnp.float32(0.2) * y)
        # activation == "linear": identity.
        if act_gain != 1.0:
            y = y * jnp.float32(act_gain)
        if clamp is not None:
            y = jnp.clip(y, -jnp.float32(clamp), jnp.float32(clamp))

        # Lane-aligned per-image stores (column offsets are multiples of HWo).
        for b in range(Bt):
            o_ref[b] = y[:, b * HWo:(b + 1) * HWo].astype(o_ref.dtype)

    return kernel


# ------------------------------- wrapper --------------------------------------

def conv2d_layer_forward(x, weight, bias, *, activation="linear", gain=1.0,
                         conv_clamp=None, up=1, down=1, batch_tile=None):
    """Pallas implementation of Conv2dLayer.forward (up=1, down=1 path)."""
    if up != 1 or down != 1:
        # TODO(synk): upfirdn2d resampling path not implemented.
        raise NotImplementedError("only up=1, down=1 is supported")
    if activation not in ("linear", "lrelu"):
        # TODO(synk): other bias_act activations not implemented.
        raise NotImplementedError(f"activation {activation!r} not supported")

    B, C_in, H, W = x.shape
    C_out, C_in_w, KH, KW = weight.shape
    assert C_in_w == C_in
    assert KH == KW, "Conv2dLayer uses square kernels (scalar kernel_size)"

    pad = KH // 2
    Hp, Wp = H + 2 * pad, W + 2 * pad
    H_out, W_out = Hp - KH + 1, Wp - KW + 1
    K = KH * KW * C_in

    weight_gain = 1.0 / math.sqrt(C_in * KH * KW)
    def_gain = math.sqrt(2.0) if activation == "lrelu" else 1.0
    act_gain = def_gain * float(gain)
    clamp = float(conv_clamp) * float(gain) if conv_clamp is not None else None

    Bt = B if batch_tile is None else batch_tile
    assert B % Bt == 0, "batch_tile must divide the batch"

    # ---- wrapper-side plumbing: weights/bias only; activations go in as-is ----
    # (C_out, C_in, KH, KW) -> (C_out, KH*KW*C_in), tap-major, C_in-minor rows.
    w_mat = jnp.transpose(weight, (0, 2, 3, 1)).reshape(C_out, K).astype(x.dtype)
    if bias is None:
        b_col = jnp.zeros((C_out, 1), jnp.float32)
    else:
        b_col = bias.astype(jnp.float32).reshape(C_out, 1)

    kernel = _make_kernel(Bt, C_in, C_out, H, W, KH, KW, pad,
                          weight_gain, activation, act_gain, clamp)

    out = pl.pallas_call(
        kernel,
        out_shape=jax.ShapeDtypeStruct((B, C_out, H_out * W_out), x.dtype),
        grid_spec=pltpu.PrefetchScalarGridSpec(
            num_scalar_prefetch=0,
            grid=(B // Bt,),
            in_specs=[
                pl.BlockSpec((Bt, C_in, H, W), lambda i: (i, 0, 0, 0)),
                pl.BlockSpec((C_out, K), lambda i: (0, 0)),
                pl.BlockSpec((C_out, 1), lambda i: (0, 0)),
            ],
            out_specs=pl.BlockSpec((Bt, C_out, H_out * W_out),
                                   lambda i: (i, 0, 0)),
        ),
        compiler_params=pltpu.CompilerParams(
            dimension_semantics=("parallel",)),
    )(x, w_mat, b_col)

    # (B, C_out, H*W) is already channel-major -> NCHW via a free reshape.
    return out.reshape(B, C_out, H_out, W_out)


# ------------------------- pure-JAX reference ---------------------------------

def conv2d_layer_reference(x, weight, bias, *, activation="linear", gain=1.0,
                           conv_clamp=None):
    C_out, C_in, KH, KW = weight.shape
    pad = KH // 2
    weight_gain = 1.0 / math.sqrt(C_in * KH * KW)

    w = weight.astype(jnp.float32) * weight_gain
    y = lax.conv_general_dilated(
        x.astype(jnp.float32), w, window_strides=(1, 1),
        padding=[(pad, pad), (pad, pad)],
        dimension_numbers=("NCHW", "OIHW", "NCHW"))
    if bias is not None:
        y = y + bias.astype(jnp.float32).reshape(1, -1, 1, 1)
    if activation == "lrelu":
        y = jnp.where(y >= 0, y, 0.2 * y)
        def_gain = math.sqrt(2.0)
    else:
        def_gain = 1.0
    act_gain = def_gain * gain
    if act_gain != 1.0:
        y = y * act_gain
    if conv_clamp is not None:
        c = conv_clamp * gain
        y = jnp.clip(y, -c, c)
    return y.astype(x.dtype)


# --------------------------------- main ----------------------------------------

if __name__ == "__main__":
    key = jax.random.PRNGKey(0)
    k1, k2, k3, k4 = jax.random.split(key, 4)

    # Config A: typical discriminator conv — 3x3, lrelu, conv_clamp.
    B, C_in, C_out, H, W, ks = 2, 4, 8, 16, 16, 3
    x = jax.random.normal(k1, (B, C_in, H, W), jnp.float32)
    w = jax.random.normal(k2, (C_out, C_in, ks, ks), jnp.float32)
    b = 0.1 * jax.random.normal(k3, (C_out,), jnp.float32)

    out = conv2d_layer_forward(x, w, b, activation="lrelu", gain=1.0,
                               conv_clamp=256.0)
    out = jax.block_until_ready(out)
    ref = conv2d_layer_reference(x, w, b, activation="lrelu", gain=1.0,
                                 conv_clamp=256.0)
    assert out.shape == (B, C_out, H, W)
    np.testing.assert_allclose(np.asarray(out), np.asarray(ref),
                               rtol=1e-4, atol=1e-4)

    # Config B: 1x1 conv, linear activation, no bias, explicit gain argument.
    w1 = jax.random.normal(k4, (4, C_in, 1, 1), jnp.float32)
    out1 = conv2d_layer_forward(x, w1, None, activation="linear", gain=2.0,
                                conv_clamp=None)
    out1 = jax.block_until_ready(out1)
    ref1 = conv2d_layer_reference(x, w1, None, activation="linear", gain=2.0,
                                  conv_clamp=None)
    np.testing.assert_allclose(np.asarray(out1), np.asarray(ref1),
                               rtol=1e-4, atol=1e-4)

    print("KERNEL_OK")
</pallas_src>

<mosaic_0001>
module attributes {stable_mosaic.version = 11 : i64} {
  func.func @kernel(%arg0: i32, %arg1: memref<2x4x16x16xf32, #tpu.memory_space<vmem>>, %arg2: memref<8x36xf32, #tpu.memory_space<vmem>>, %arg3: memref<8x1xf32, #tpu.memory_space<vmem>>, %arg4: memref<2x8x256xf32, #tpu.memory_space<vmem>>) attributes {dimension_semantics = [#tpu.dimension_semantics<parallel>], iteration_bounds = array<i64: 1>, scalar_prefetch = 0 : i64, scratch_operands = 0 : i64, tpu.core_type = #tpu.core_type<tc>, window_params = [{transform_indices = @transform_0, window_bounds = array<i64: 2, 4, 16, 16>}, {pipeline_mode = #tpu.pipeline_mode<synchronous>, transform_indices = @transform_1, window_bounds = array<i64: 8, 36>}, {pipeline_mode = #tpu.pipeline_mode<synchronous>, transform_indices = @transform_2, window_bounds = array<i64: 8, 1>}, {transform_indices = @transform_3, window_bounds = array<i64: 2, 8, 256>}]} {
    %c0 = arith.constant 0 : index
    %c0_0 = arith.constant 0 : index
    %c0_1 = arith.constant 0 : index
    %c0_2 = arith.constant 0 : index
    %0 = vector.load %arg1[%c0, %c0_0, %c0_1, %c0_2] : memref<2x4x16x16xf32, #tpu.memory_space<vmem>>, vector<2x4x16x16xf32>
    %cst = arith.constant 0.000000e+00 : f32
    %1 = vector.broadcast %cst : f32 to vector<2x4x1x16xf32>
    %2 = tpu.concatenate %1, %0, %1 in 2 : vector<2x4x1x16xf32>, vector<2x4x16x16xf32>, vector<2x4x1x16xf32> -> vector<2x4x18x16xf32>
    %cst_3 = arith.constant 0.000000e+00 : f32
    %3 = vector.broadcast %cst_3 : f32 to vector<2x4x18x1xf32>
    %4 = tpu.concatenate %3, %2, %3 in 3 : vector<2x4x18x1xf32>, vector<2x4x18x16xf32>, vector<2x4x18x1xf32> -> vector<2x4x18x18xf32>
    %5 = vector.extract_strided_slice %4 {offsets = [0, 0, 0, 0], sizes = [1, 4, 16, 16], strides = [1, 1, 1, 1]} : vector<2x4x18x18xf32> to vector<1x4x16x16xf32>
    %6 = vector.shape_cast %5 : vector<1x4x16x16xf32> to vector<4x16x16xf32>
    %7 = vector.shape_cast %6 : vector<4x16x16xf32> to vector<4x256xf32>
    %8 = vector.extract_strided_slice %4 {offsets = [1, 0, 0, 0], sizes = [1, 4, 16, 16], strides = [1, 1, 1, 1]} : vector<2x4x18x18xf32> to vector<1x4x16x16xf32>
    %9 = vector.shape_cast %8 : vector<1x4x16x16xf32> to vector<4x16x16xf32>
    %10 = vector.shape_cast %9 : vector<4x16x16xf32> to vector<4x256xf32>
    %11 = tpu.concatenate %7, %10 in 1 : vector<4x256xf32>, vector<4x256xf32> -> vector<4x512xf32>
    %12 = vector.extract_strided_slice %4 {offsets = [0, 0, 0, 1], sizes = [1, 4, 16, 16], strides = [1, 1, 1, 1]} : vector<2x4x18x18xf32> to vector<1x4x16x16xf32>
    %13 = vector.shape_cast %12 : vector<1x4x16x16xf32> to vector<4x16x16xf32>
    %14 = vector.shape_cast %13 : vector<4x16x16xf32> to vector<4x256xf32>
    %15 = vector.extract_strided_slice %4 {offsets = [1, 0, 0, 1], sizes = [1, 4, 16, 16], strides = [1, 1, 1, 1]} : vector<2x4x18x18xf32> to vector<1x4x16x16xf32>
    %16 = vector.shape_cast %15 : vector<1x4x16x16xf32> to vector<4x16x16xf32>
    %17 = vector.shape_cast %16 : vector<4x16x16xf32> to vector<4x256xf32>
    %18 = tpu.concatenate %14, %17 in 1 : vector<4x256xf32>, vector<4x256xf32> -> vector<4x512xf32>
    %19 = vector.extract_strided_slice %4 {offsets = [0, 0, 0, 2], sizes = [1, 4, 16, 16], strides = [1, 1, 1, 1]} : vector<2x4x18x18xf32> to vector<1x4x16x16xf32>
    %20 = vector.shape_cast %19 : vector<1x4x16x16xf32> to vector<4x16x16xf32>
    %21 = vector.shape_cast %20 : vector<4x16x16xf32> to vector<4x256xf32>
    %22 = vector.extract_strided_slice %4 {offsets = [1, 0, 0, 2], sizes = [1, 4, 16, 16], strides = [1, 1, 1, 1]} : vector<2x4x18x18xf32> to vector<1x4x16x16xf32>
    %23 = vector.shape_cast %22 : vector<1x4x16x16xf32> to vector<4x16x16xf32>
    %24 = vector.shape_cast %23 : vector<4x16x16xf32> to vector<4x256xf32>
    %25 = tpu.concatenate %21, %24 in 1 : vector<4x256xf32>, vector<4x256xf32> -> vector<4x512xf32>
    %26 = vector.extract_strided_slice %4 {offsets = [0, 0, 1, 0], sizes = [1, 4, 16, 16], strides = [1, 1, 1, 1]} : vector<2x4x18x18xf32> to vector<1x4x16x16xf32>
    %27 = vector.shape_cast %26 : vector<1x4x16x16xf32> to vector<4x16x16xf32>
    %28 = vector.shape_cast %27 : vector<4x16x16xf32> to vector<4x256xf32>
    %29 = vector.extract_strided_slice %4 {offsets = [1, 0, 1, 0], sizes = [1, 4, 16, 16], strides = [1, 1, 1, 1]} : vector<2x4x18x18xf32> to vector<1x4x16x16xf32>
    %30 = vector.shape_cast %29 : vector<1x4x16x16xf32> to vector<4x16x16xf32>
    %31 = vector.shape_cast %30 : vector<4x16x16xf32> to vector<4x256xf32>
    %32 = tpu.concatenate %28, %31 in 1 : vector<4x256xf32>, vector<4x256xf32> -> vector<4x512xf32>
    %33 = vector.extract_strided_slice %4 {offsets = [0, 0, 1, 1], sizes = [1, 4, 16, 16], strides = [1, 1, 1, 1]} : vector<2x4x18x18xf32> to vector<1x4x16x16xf32>
    %34 = vector.shape_cast %33 : vector<1x4x16x16xf32> to vector<4x16x16xf32>
    %35 = vector.shape_cast %34 : vector<4x16x16xf32> to vector<4x256xf32>
    %36 = vector.extract_strided_slice %4 {offsets = [1, 0, 1, 1], sizes = [1, 4, 16, 16], strides = [1, 1, 1, 1]} : vector<2x4x18x18xf32> to vector<1x4x16x16xf32>
    %37 = vector.shape_cast %36 : vector<1x4x16x16xf32> to vector<4x16x16xf32>
    %38 = vector.shape_cast %37 : vector<4x16x16xf32> to vector<4x256xf32>
    %39 = tpu.concatenate %35, %38 in 1 : vector<4x256xf32>, vector<4x256xf32> -> vector<4x512xf32>
    %40 = vector.extract_strided_slice %4 {offsets = [0, 0, 1, 2], sizes = [1, 4, 16, 16], strides = [1, 1, 1, 1]} : vector<2x4x18x18xf32> to vector<1x4x16x16xf32>
    %41 = vector.shape_cast %40 : vector<1x4x16x16xf32> to vector<4x16x16xf32>
    %42 = vector.shape_cast %41 : vector<4x16x16xf32> to vector<4x256xf32>
    %43 = vector.extract_strided_slice %4 {offsets = [1, 0, 1, 2], sizes = [1, 4, 16, 16], strides = [1, 1, 1, 1]} : vector<2x4x18x18xf32> to vector<1x4x16x16xf32>
    %44 = vector.shape_cast %43 : vector<1x4x16x16xf32> to vector<4x16x16xf32>
    %45 = vector.shape_cast %44 : vector<4x16x16xf32> to vector<4x256xf32>
    %46 = tpu.concatenate %42, %45 in 1 : vector<4x256xf32>, vector<4x256xf32> -> vector<4x512xf32>
    %47 = vector.extract_strided_slice %4 {offsets = [0, 0, 2, 0], sizes = [1, 4, 16, 16], strides = [1, 1, 1, 1]} : vector<2x4x18x18xf32> to vector<1x4x16x16xf32>
    %48 = vector.shape_cast %47 : vector<1x4x16x16xf32> to vector<4x16x16xf32>
    %49 = vector.shape_cast %48 : vector<4x16x16xf32> to vector<4x256xf32>
    %50 = vector.extract_strided_slice %4 {offsets = [1, 0, 2, 0], sizes = [1, 4, 16, 16], strides = [1, 1, 1, 1]} : vector<2x4x18x18xf32> to vector<1x4x16x16xf32>
    %51 = vector.shape_cast %50 : vector<1x4x16x16xf32> to vector<4x16x16xf32>
    %52 = vector.shape_cast %51 : vector<4x16x16xf32> to vector<4x256xf32>
    %53 = tpu.concatenate %49, %52 in 1 : vector<4x256xf32>, vector<4x256xf32> -> vector<4x512xf32>
    %54 = vector.extract_strided_slice %4 {offsets = [0, 0, 2, 1], sizes = [1, 4, 16, 16], strides = [1, 1, 1, 1]} : vector<2x4x18x18xf32> to vector<1x4x16x16xf32>
    %55 = vector.shape_cast %54 : vector<1x4x16x16xf32> to vector<4x16x16xf32>
    %56 = vector.shape_cast %55 : vector<4x16x16xf32> to vector<4x256xf32>
    %57 = vector.extract_strided_slice %4 {offsets = [1, 0, 2, 1], sizes = [1, 4, 16, 16], strides = [1, 1, 1, 1]} : vector<2x4x18x18xf32> to vector<1x4x16x16xf32>
    %58 = vector.shape_cast %57 : vector<1x4x16x16xf32> to vector<4x16x16xf32>
    %59 = vector.shape_cast %58 : vector<4x16x16xf32> to vector<4x256xf32>
    %60 = tpu.concatenate %56, %59 in 1 : vector<4x256xf32>, vector<4x256xf32> -> vector<4x512xf32>
    %61 = vector.extract_strided_slice %4 {offsets = [0, 0, 2, 2], sizes = [1, 4, 16, 16], strides = [1, 1, 1, 1]} : vector<2x4x18x18xf32> to vector<1x4x16x16xf32>
    %62 = vector.shape_cast %61 : vector<1x4x16x16xf32> to vector<4x16x16xf32>
    %63 = vector.shape_cast %62 : vector<4x16x16xf32> to vector<4x256xf32>
    %64 = vector.extract_strided_slice %4 {offsets = [1, 0, 2, 2], sizes = [1, 4, 16, 16], strides = [1, 1, 1, 1]} : vector<2x4x18x18xf32> to vector<1x4x16x16xf32>
    %65 = vector.shape_cast %64 : vector<1x4x16x16xf32> to vector<4x16x16xf32>
    %66 = vector.shape_cast %65 : vector<4x16x16xf32> to vector<4x256xf32>
    %67 = tpu.concatenate %63, %66 in 1 : vector<4x256xf32>, vector<4x256xf32> -> vector<4x512xf32>
    %68 = tpu.concatenate %11, %18, %25, %32, %39, %46, %53, %60, %67 in 0 : vector<4x512xf32>, vector<4x512xf32>, vector<4x512xf32>, vector<4x512xf32>, vector<4x512xf32>, vector<4x512xf32>, vector<4x512xf32>, vector<4x512xf32>, vector<4x512xf32> -> vector<36x512xf32>
    %c0_4 = arith.constant 0 : index
    %c0_5 = arith.constant 0 : index
    %69 = vector.load %arg2[%c0_4, %c0_5] : memref<8x36xf32, #tpu.memory_space<vmem>>, vector<8x36xf32>
    %cst_6 = arith.constant dense<0.000000e+00> : vector<8x512xf32>
    %70 = tpu.matmul %69, %68, %cst_6 {dimension_numbers = #tpu.dot_dimension_numbers<[1], [0], [0], [1], [0, 0, 1, 1], [], []>} : vector<8x36xf32>, vector<36x512xf32>, vector<8x512xf32> -> vector<8x512xf32>
    %cst_7 = arith.constant 0.166666672 : f32
    %71 = vector.broadcast %cst_7 : f32 to vector<8x512xf32>
    %72 = arith.mulf %70, %71 : vector<8x512xf32>
    %c0_8 = arith.constant 0 : index
    %c0_9 = arith.constant 0 : index
    %73 = vector.load %arg3[%c0_8, %c0_9] : memref<8x1xf32, #tpu.memory_space<vmem>>, vector<8x1xf32>
    %74 = vector.broadcast %73 : vector<8x1xf32> to vector<8x512xf32>
    %75 = arith.addf %72, %74 : vector<8x512xf32>
    %cst_10 = arith.constant 0.000000e+00 : f32
    %76 = vector.broadcast %cst_10 : f32 to vector<8x512xf32>
    %77 = arith.cmpf oge, %75, %76 : vector<8x512xf32>
    %cst_11 = arith.constant 2.000000e-01 : f32
    %78 = vector.broadcast %cst_11 : f32 to vector<8x512xf32>
    %79 = arith.mulf %78, %75 : vector<8x512xf32>
    %80 = arith.select %77, %75, %79 : vector<8x512xi1>, vector<8x512xf32>
    %cst_12 = arith.constant 1.41421354 : f32
    %81 = vector.broadcast %cst_12 : f32 to vector<8x512xf32>
    %82 = arith.mulf %80, %81 : vector<8x512xf32>
    %cst_13 = arith.constant 0.000000e+00 : f32
    %cst_14 = arith.constant 2.560000e+02 : f32
    %83 = arith.subf %cst_13, %cst_14 : f32
    %cst_15 = arith.constant 2.560000e+02 : f32
    %84 = vector.broadcast %83 : f32 to vector<8x512xf32>
    %85 = arith.maximumf %84, %82 : vector<8x512xf32>
    %86 = vector.broadcast %cst_15 : f32 to vector<8x512xf32>
    %87 = arith.minimumf %86, %85 : vector<8x512xf32>
    %88 = vector.extract_strided_slice %87 {offsets = [0, 0], sizes = [8, 256], strides = [1, 1]} : vector<8x512xf32> to vector<8x256xf32>
    %c0_16 = arith.constant 0 : index
    %c0_17 = arith.constant 0 : index
    %c0_18 = arith.constant 0 : index
    %89 = vector.load %arg4[%c0_16, %c0_17, %c0_18] : memref<2x8x256xf32, #tpu.memory_space<vmem>>, vector<1x8x256xf32>
    %90 = vector.shape_cast %89 : vector<1x8x256xf32> to vector<8x256xf32>
    %91 = vector.shape_cast %88 : vector<8x256xf32> to vector<1x8x256xf32>
    tpu.vector_store %arg4[%c0_16, %c0_17, %c0_18], %91 {strides = array<i32>} : memref<2x8x256xf32, #tpu.memory_space<vmem>>, vector<1x8x256xf32>,
    %92 = vector.extract_strided_slice %87 {offsets = [0, 256], sizes = [8, 256], strides = [1, 1]} : vector<8x512xf32> to vector<8x256xf32>
    %c1 = arith.constant 1 : index
    %c0_19 = arith.constant 0 : index
    %c0_20 = arith.constant 0 : index
    %93 = vector.load %arg4[%c1, %c0_19, %c0_20] : memref<2x8x256xf32, #tpu.memory_space<vmem>>, vector<1x8x256xf32>
    %94 = vector.shape_cast %93 : vector<1x8x256xf32> to vector<8x256xf32>
    %95 = vector.shape_cast %92 : vector<8x256xf32> to vector<1x8x256xf32>
    tpu.vector_store %arg4[%c1, %c0_19, %c0_20], %95 {strides = array<i32>} : memref<2x8x256xf32, #tpu.memory_space<vmem>>, vector<1x8x256xf32>,
    return
  }
  func.func @transform_0(%arg0: i32) -> (i32, i32, i32, i32) {
    %c0_i32 = arith.constant 0 : i32
    %c0_i32_0 = arith.constant 0 : i32
    %c0_i32_1 = arith.constant 0 : i32
    %c0_i32_2 = arith.constant 0 : i32
    return %arg0, %c0_i32, %c0_i32_0, %c0_i32_1 : i32, i32, i32, i32
  }
  func.func @transform_1(%arg0: i32) -> (i32, i32) {
    %c0_i32 = arith.constant 0 : i32
    %c0_i32_0 = arith.constant 0 : i32
    %c0_i32_1 = arith.constant 0 : i32
    return %c0_i32, %c0_i32_0 : i32, i32
  }
  func.func @transform_2(%arg0: i32) -> (i32, i32) {
    %c0_i32 = arith.constant 0 : i32
    %c0_i32_0 = arith.constant 0 : i32
    %c0_i32_1 = arith.constant 0 : i32
    return %c0_i32, %c0_i32_0 : i32, i32
  }
  func.func @transform_3(%arg0: i32) -> (i32, i32, i32) {
    %c0_i32 = arith.constant 0 : i32
    %c0_i32_0 = arith.constant 0 : i32
    %c0_i32_1 = arith.constant 0 : i32
    return %arg0, %c0_i32, %c0_i32_0 : i32, i32, i32
  }
}

</mosaic_0001>

<bundles_post_ra>
// kernel: tpu_custom_call.1
= control target key start
LH: loop header
LB: loop body
LE: loop exit
PB: predicated region body
PF: predicated region fallthrough
CT: control target
= control target key end

     0   :  { %8 = vsyncpa [#allocation3], 0  ;;  %s7871_s0 = inlined_call_operand.hbm [shape: f32[2,4,16,16], index: 0, kind: input, shape index: {}]   ;;  %s7872_s1 = inlined_call_operand.vmem [shape: f32[8,36], index: 1, kind: input, shape index: {}]   ;;  %s7873_s2 = inlined_call_operand.vmem [shape: f32[8,1], index: 2, kind: input, shape index: {}]   ;;  %s7874_s3 = inlined_call_operand.hbm [shape: f32[2,8,256], index: 3, kind: output, shape index: {}]  }
   0x1   :  { %9 = vsyncpa [#allocation4], 0  ;;  %s4755_s12 = smov [#allocation2]  }
   0x2   :  { %s15_s13 = sshll.u32 %s4755_s12, 4  ;;  %s16_s13 = int_to_ptr.vmem [resolvable:$true] %s15_s13 }
   0x3   :  { %s4719_s14 = scalar_lea.vmem %s16_s13, 2048  ;;  %p4724_p1 = scmp.lt.s32.totalorder %s16_s13, %s16_s13 }
   0x4   :  { %p4720_p0 = scmp.ne.s32.totalorder %s16_s13, %s4719_s14  ;;  %p4725_p2 = scmp.lt.s32.totalorder %s4719_s14, %s4719_s14 }
   0x6   :  { %p4726_p3 = por %p4725_p2, %p4724_p1 }
   0x8   :  { %p4727_p4 = pnand %p4726_p3, %p4720_p0 }
   0xa   :  { %4730 = shalt.err (!%p4727_p4)
}
   0xb   :  { %s4756_s15 = smov 128   ;;  %s4757_s16 = smov 8  }
   0xc   :  { %21 = dma.hbm_to_vmem [thread:$0]  %s7871_s0, 2048, %s16_s13, [#allocation3], %s4756_s15, %s4756_s15, %s4757_s16  }
   0xd   :  { %4751 = dma.done.wait [#allocation3], 2048  }
   0xe   :  { %4752 = vsyncadd [#allocation3], 4294965248  ;;  %v30_v0 = vld [vmem:[#allocation2 + $0x8] sm:$0xff]  ;;  %vm61_vm0 = vcmask 1040384   ;;  %v29_v1 = vld [vmem:[#allocation2] sm:$0xff]  ;;  %s4758_s19 = smov 1  }
   0xf   :  { %v31_v2 = vld [vmem:[#allocation2 + $0x10] sm:$0xff]  ;;  %v63_v3 = vrot.slane %v30_v0, 7  ;;  %v62_v4 = vrot.slane %v29_v1, 7  ;;  %v32_v6 = vld [vmem:[#allocation2 + $0x18] sm:$0xff]  ;;  %v33_v12 = vld [vmem:[#allocation2 + $0x20] sm:$0xff]  ;;  %v7878_v36 = vmov 0.0  }
  0x10   :  { %v65_v5 = vrot.slane %v31_v2, 7  ;;  %v66_v11 = vrot.slane %v32_v6, 7  ;;  %v34_v13 = vld [vmem:[#allocation2 + $0x28] sm:$0xff]  ;;  %v68_v16 = vrot.slane %v33_v12, 7  ;;  %v35_v18 = vld [vmem:[#allocation2 + $0x30] sm:$0xff]  ;;  %v36_v22 = vld [vmem:[#allocation2 + $0x38] sm:$0xff]  ;;  %4543 = vmatprep.mubr.f32.mxu0 %v7878_v36  ;;  %4614 = vmatprep.mubr.f32.mxu1 %v7878_v36 }
  0x11   :  { %v110_v7 = vsel %vm61_vm0, %v63_v3, 0.0  ;;  %v102_v8 = vsel %vm61_vm0, 0.0, %v62_v4  ;;  %v64_v10 = vsel %vm61_vm0, %v62_v4, %v63_v3  ;;  %v69_v17 = vrot.slane %v34_v13, 7  ;;  %v37_v26 = vld [vmem:[#allocation2 + $0x40] sm:$0xff]  ;;  %v38_v27 = vld [vmem:[#allocation2 + $0x48] sm:$0xff]  ;;  %v39_v32 = vld [vmem:[#allocation2 + $0x50] sm:$0xff] }
  0x12   :  { %138 = vrot.lane.b32.xlu1 %v110_v7, %s4758_s19  ;;  %134 = vrot.lane.b32.xlu0 %v102_v8, %s4758_s19  ;;  %v103_v9 = vsel %vm61_vm0, 0.0, %v65_v5  ;;  %v111_v14 = vsel %vm61_vm0, %v66_v11, 0.0  ;;  %v67_v15 = vsel %vm61_vm0, %v65_v5, %v66_v11  ;;  %v104_v20 = vsel %vm61_vm0, 0.0, %v68_v16  ;;  %v40_v37 = vld [vmem:[#allocation2 + $0x58] sm:$0xff]  ;;  %v41_v41 = vld [vmem:[#allocation2 + $0x60] sm:$0xff]  ;;  %v42_v42 = vld [vmem:[#allocation2 + $0x68] sm:$0xff] }
  0x13   :  { %v70_v19 = vsel %vm61_vm0, %v68_v16, %v69_v17  ;;  %v71_v21 = vrot.slane %v35_v18, 7  ;;  %v112_v24 = vsel %vm61_vm0, %v69_v17, 0.0  ;;  %v72_v25 = vrot.slane %v36_v22, 7  ;;  %v43_v47 = vld [vmem:[#allocation2 + $0x70] sm:$0xff]  ;;  %v44_v51 = vld [vmem:[#allocation2 + $0x78] sm:$0xff]  ;;  %s4760_s0 = smov 127  }
  0x14   :  { %v74_v30 = vrot.slane %v37_v26, 7  ;;  %v75_v31 = vrot.slane %v38_v27, 7  ;;  %v77_v35 = vrot.slane %v39_v32, 7  ;;  %v78_v40 = vrot.slane %v40_v37, 7  ;;  %s4763_s20 = smov 126   ;;  %s4764_s21 = smov 32  }
  0x15   :  { %v105_v23 = vsel %vm61_vm0, 0.0, %v71_v21  ;;  %v113_v28 = vsel %vm61_vm0, %v72_v25, 0.0  ;;  %v73_v29 = vsel %vm61_vm0, %v71_v21, %v72_v25  ;;  %v80_v45 = vrot.slane %v41_v41, 7  ;;  %s4765_s22 = smov 64   ;;  %s4766_s23 = smov 96  }
  0x16   :  { %140 = vrot.lane.b32.xlu1 %v103_v9, %s4758_s19  ;;  %136 = vrot.lane.b32.xlu0 %v64_v10, %s4758_s19  ;;  %v76_v33 = vsel %vm61_vm0, %v74_v30, %v75_v31  ;;  %v106_v34 = vsel %vm61_vm0, 0.0, %v74_v30  ;;  %v107_v38 = vsel %vm61_vm0, 0.0, %v77_v35  ;;  %v114_v39 = vsel %vm61_vm0, %v75_v31, 0.0  ;;  %s4767_s24 = smov 16   ;;  %s4768_s25 = smov 48  }
  0x17   :  { %v115_v43 = vsel %vm61_vm0, %v78_v40, 0.0  ;;  %v79_v44 = vsel %vm61_vm0, %v77_v35, %v78_v40  ;;  %v81_v46 = vrot.slane %v42_v42, 7  ;;  %v108_v49 = vsel %vm61_vm0, 0.0, %v80_v45  ;;  %s4769_s26 = smov 80   ;;  %s4770_s27 = smov 112  }
  0x18   :  { %v83_v50 = vrot.slane %v43_v47, 7  ;;  %v84_v54 = vrot.slane %v44_v51, 7  ;;  %vm206_vm1 = vcmask 7168   ;;  %vm231_vm2 = vcmask 138240  }
  0x19   :  { %v82_v48 = vsel %vm61_vm0, %v80_v45, %v81_v46  ;;  %v116_v53 = vsel %vm61_vm0, %v81_v46, 0.0  ;;  %vm1615_vm3 = vcmask 1046528   ;;  %vm3008_vm4 = vcmask 1045504  }
  0x1a   :  { %144 = vrot.lane.b32.xlu1 %v111_v14, %s4758_s19  ;;  %142 = vrot.lane.b32.xlu0 %v67_v15, %s4758_s19  ;;  %v109_v52 = vsel %vm61_vm0, 0.0, %v83_v50  ;;  %v117_v55 = vsel %vm61_vm0, %v84_v54, 0.0  ;;  %v85_v56 = vsel %vm61_vm0, %v83_v50, %v84_v54  ;;  %v261_v54 = vlaneseq }
  0x1b   :  { %vm448_vm5 = vcmask 130048   ;;  %vm450_vm6 = vcmask 261120   ;;  %vm452_vm7 = vcmask 392192   ;;  %vm454_vm8 = vcmask 523264  }
  0x1c   :  { %vm456_vm9 = vcmask 654336   ;;  %vm458_vm10 = vcmask 785408   ;;  %vm460_vm11 = vcmask 916480   ;;  %vm4445_vm12 = vcmask 1043456  }
  0x1d   :  { %vm4463_vm13 = vcmask 293888  }
  0x1e   :  { %148 = vrot.lane.b32.xlu1 %v70_v19, %s4758_s19  ;;  %146 = vrot.lane.b32.xlu0 %v104_v20, %s4758_s19 }
  0x22   :  { %152 = vrot.lane.b32.xlu1 %v105_v23, %s4758_s19  ;;  %150 = vrot.lane.b32.xlu0 %v112_v24, %s4758_s19 }
  0x26   :  { %156 = vrot.lane.b32.xlu1 %v113_v28, %s4758_s19  ;;  %154 = vrot.lane.b32.xlu0 %v73_v29, %s4758_s19 }
  0x2a   :  { %160 = vrot.lane.b32.xlu1 %v76_v33, %s4758_s19  ;;  %158 = vrot.lane.b32.xlu0 %v106_v34, %s4758_s19 }
  0x2e   :  { %164 = vrot.lane.b32.xlu1 %v107_v38, %s4758_s19  ;;  %162 = vrot.lane.b32.xlu0 %v114_v39, %s4758_s19 }
  0x32   :  { %168 = vrot.lane.b32.xlu1 %v115_v43, %s4758_s19  ;;  %166 = vrot.lane.b32.xlu0 %v79_v44, %s4758_s19 }
  0x36   :  { %172 = vrot.lane.b32.xlu1 %v82_v48, %s4758_s19  ;;  %170 = vrot.lane.b32.xlu0 %v108_v49, %s4758_s19 }
  0x3a   :  { %176 = vrot.lane.b32.xlu1 %v109_v52, %s4758_s19  ;;  %174 = vrot.lane.b32.xlu0 %v116_v53, %s4758_s19  ;;  %v4761_v52 = vmov 1983009808  }
  0x3b   :  { %v259_v53 = vunpack.c.l.s4 %v4761_v52 }
  0x3e   :  { %180 = vrot.lane.b32.xlu1 %v117_v55, %s4758_s19  ;;  %178 = vrot.lane.b32.xlu0 %v85_v56, %s4758_s19 }
  0x84   :  { %v139_v57 = vpop.permute.xlu1 %138  ;;  %v135_v58 = vpop.permute.xlu0 %134 }
  0x85   :  { %v209_v59 = vsel %vm206_vm1, 0.0, %v139_v57  ;;  %v207_v60 = vsel %vm206_vm1, 0.0, %v135_v58 }
  0x86   :  { %v234_v61 = vsel %vm231_vm2, %v209_v59, 0.0  ;;  %v4851_v62 = vsel %vm231_vm2, %v207_v60, 0.0 }
  0x87   :  { %683 = vrot.lane.b32.xlu0 %v4851_v62, %s4760_s0  ;;  %v1619_v1 = vrot.slane %v234_v61, 1  ;;  %v3012_v4 = vrot.slane %v234_v61, 2  ;;  %v1616_v7 = vrot.slane %v4851_v62, 1  ;;  %v3009_v12 = vrot.slane %v4851_v62, 2 }
  0x88   :  { %v141_v63 = vpop.permute.xlu1 %140  ;;  %v137_v0 = vpop.permute.xlu0 %136  ;;  %v260_v61 = vunpack.c.0.s8 %v259_v53 }
  0x89   :  { %v210_v2 = vsel %vm206_vm1, 0.0, %v141_v63  ;;  %v208_v3 = vsel %vm206_vm1, 0.0, %v137_v0  ;;  %v262_v63 = vshrl.u32 %v261_v54, 7 }
  0x8a   :  { %v4858_v5 = vsel %vm231_vm2, %v210_v2, 0.0  ;;  %v4861_v6 = vsel %vm231_vm2, %v208_v3, 0.0 }
  0x8b   :  { %v1617_v8 = vrot.slane %v4861_v6, 1  ;;  %685 = vrot.lane.b32.xlu1 %v4861_v6, %s4760_s0  ;;  %687 = vrot.lane.b32.xlu0 %v4858_v5, %s4760_s0  ;;  %v3010_v9 = vrot.slane %v4861_v6, 2 }
  0x8c   :  { %v145_v10 = vpop.permute.xlu1 %144  ;;  %v143_v11 = vpop.permute.xlu0 %142 }
  0x8d   :  { %v4872_v13 = vsel %vm1615_vm3, %v1616_v7, %v1617_v8  ;;  %v212_v14 = vsel %vm206_vm1, 0.0, %v145_v10  ;;  %v211_v15 = vsel %vm206_vm1, 0.0, %v143_v11  ;;  %v4877_v16 = vsel %vm1615_vm3, %v1617_v8, %v1619_v1 }
  0x8e   :  { %v4880_v17 = vsel %vm231_vm2, %v212_v14, 0.0  ;;  %v4883_v18 = vsel %vm231_vm2, %v211_v15, 0.0  ;;  %v4886_v19 = vsel %vm3008_vm4, %v3010_v9, %v3012_v4  ;;  %v4889_v20 = vsel %vm3008_vm4, %v3009_v12, %v3010_v9 }
  0x8f   :  { %7980 = vst [vmem:[#allocation8_spill] sm:$0xff] %v4886_v19  ;;  %7981 = vst [vmem:[#allocation9_spill] sm:$0xff] %v4889_v20  ;;  %689 = vrot.lane.b32.xlu1 %v4883_v18, %s4760_s0  ;;  %v4971_v9 = vsub.s32 %v260_v61, %v262_v63  ;;  %v4762_v10 = vmov 1934713408  }
  0x90   :  { %v149_v21 = vpop.permute.xlu1 %148  ;;  %v147_v22 = vpop.permute.xlu0 %146  ;;  %v291_v11 = vunpack.c.l.s4 %v4762_v10 }
  0x91   :  { %v214_v23 = vsel %vm206_vm1, 0.0, %v149_v21  ;;  %v213_v24 = vsel %vm206_vm1, 0.0, %v147_v22 }
  0x92   :  { %v4896_v25 = vsel %vm231_vm2, %v214_v23, 0.0  ;;  %v4899_v26 = vsel %vm231_vm2, %v213_v24, 0.0 }
  0x93   :  { %693 = vrot.lane.b32.xlu1 %v4896_v25, %s4760_s0  ;;  %691 = vrot.lane.b32.xlu0 %v4899_v26, %s4760_s0  ;;  %v324_v12 = vcombine.low %v4861_v6, %v4896_v25  ;;  %v257_v54 = vcombine.high %v4851_v62, %v4899_v26 }
  0x94   :  { %v153_v27 = vpop.permute.xlu1 %152  ;;  %v151_v28 = vpop.permute.xlu0 %150 }
  0x95   :  { %v216_v29 = vsel %vm206_vm1, 0.0, %v153_v27  ;;  %v215_v30 = vsel %vm206_vm1, 0.0, %v151_v28 }
  0x96   :  { %v4908_v31 = vsel %vm231_vm2, %v216_v29, 0.0  ;;  %v4911_v32 = vsel %vm231_vm2, %v215_v30, 0.0  ;;  %v256_v30 = vcombine.low %v4851_v62, %v4899_v26 }
  0x97   :  { %695 = vrot.lane.b32.xlu0 %v4908_v31, %s4760_s0  ;;  %v272_v21 = vcombine.low %v4858_v5, %v4908_v31 }
  0x98   :  { %v157_v33 = vpop.permute.xlu1 %156  ;;  %v155_v34 = vpop.permute.xlu0 %154  ;;  %v264_v53 = vrot.slane %v256_v30, %v4971_v9 }
  0x99   :  { %v218_v35 = vsel %vm206_vm1, 0.0, %v157_v33  ;;  %v217_v37 = vsel %vm206_vm1, 0.0, %v155_v34  ;;  %v292_v33 = vunpack.c.0.s8 %v291_v11  ;;  %v4995_v34 = vrot.slane %v324_v12, %v4971_v9 }
  0x9a   :  { %v4918_v38 = vsel %vm231_vm2, %v218_v35, 0.0  ;;  %v4921_v39 = vsel %vm231_vm2, %v217_v37, 0.0  ;;  %v325_v35 = vcombine.high %v4861_v6, %v4896_v25 }
  0x9b   :  { %697 = vrot.lane.b32.xlu1 %v4921_v39, %s4760_s0  ;;  %v340_v4 = vcombine.low %v4883_v18, %v4921_v39  ;;  %v341_v27 = vcombine.high %v4883_v18, %v4921_v39 }
  0x9c   :  { %v161_v40 = vpop.permute.xlu1 %160  ;;  %v159_v41 = vpop.permute.xlu0 %158 }
  0x9d   :  { %v220_v42 = vsel %vm206_vm1, 0.0, %v161_v40  ;;  %v219_v43 = vsel %vm206_vm1, 0.0, %v159_v41  ;;  %v4980_v24 = vrot.slane %v340_v4, %v4971_v9  ;;  %v5000_v41 = vrot.slane %v272_v21, %v4971_v9 }
  0x9e   :  { %v4928_v44 = vsel %vm231_vm2, %v220_v42, 0.0  ;;  %v4931_v45 = vsel %vm231_vm2, %v219_v43, 0.0  ;;  %v273_v42 = vcombine.high %v4858_v5, %v4908_v31 }
  0x9f   :  { %7982 = vst [vmem:[#allocation10_spill] sm:$0xff] %v4931_v45  ;;  %921 = vrot.lane.b32.xlu0 %v4931_v45, %s4760_s0  ;;  %923 = vrot.lane.b32.xlu1 %v4928_v44, %s4760_s0 }
  0xa0   :  { %v165_v46 = vpop.permute.xlu1 %164  ;;  %v163_v47 = vpop.permute.xlu0 %162 }
  0xa1   :  { %v222_v48 = vsel %vm206_vm1, 0.0, %v165_v46  ;;  %v221_v49 = vsel %vm206_vm1, 0.0, %v163_v47  ;;  %v357_v47 = vcombine.high %v4995_v34, %v4980_v24 }
  0xa2   :  { %v4940_v50 = vsel %vm231_vm2, %v222_v48, 0.0  ;;  %v4943_v51 = vsel %vm231_vm2, %v221_v49, 0.0  ;;  %v355_v48 = vrot.slane %v341_v27, %v4971_v9 }
  0xa3   :  { %7983 = vst [vmem:[#allocation11_spill] sm:$0xff] %v4943_v51  ;;  %925 = vrot.lane.b32.xlu0 %v4940_v50, %s4760_s0 }
  0xa4   :  { %v169_v55 = vpop.permute.xlu1 %168  ;;  %v167_v56 = vpop.permute.xlu0 %166 }
  0xa5   :  { %v224_v57 = vsel %vm206_vm1, 0.0, %v169_v55  ;;  %v223_v58 = vsel %vm206_vm1, 0.0, %v167_v56  ;;  %v5022_v55 = vsub.s32 %v292_v33, %v262_v63  ;;  %v339_v56 = vrot.slane %v325_v35, %v4971_v9 }
  0xa6   :  { %v4950_v59 = vsel %vm231_vm2, %v224_v57, 0.0  ;;  %v4953_v60 = vsel %vm231_vm2, %v223_v58, 0.0  ;;  %v289_v57 = vcombine.high %v264_v53, %v5000_v41  ;;  %v287_v58 = vrot.slane %v273_v42, %v4971_v9 }
  0xa7   :  { %7984 = vst [vmem:[#allocation12_spill] sm:$0xff] %v4950_v59  ;;  %927 = vrot.lane.b32.xlu1 %v4953_v60, %s4760_s0  ;;  %v5028_v61 = vrot.slane %v357_v47, %v5022_v55 }
  0xa8   :  { %v173_v0 = vpop.permute.xlu1 %172  ;;  %v171_v1 = vpop.permute.xlu0 %170 }
  0xa9   :  { %v226_v2 = vsel %vm206_vm1, 0.0, %v173_v0  ;;  %v225_v3 = vsel %vm206_vm1, 0.0, %v171_v1  ;;  %v372_v0 = vcombine.low %v339_v56, %v355_v48 }
  0xaa   :  { %v4962_v7 = vsel %vm231_vm2, %v226_v2, 0.0  ;;  %v4965_v8 = vsel %vm231_vm2, %v225_v3, 0.0  ;;  %v303_v2 = vrot.slane %v289_v57, %v5022_v55  ;;  %v373_v3 = vcombine.high %v339_v56, %v355_v48 }
  0xab   :  { %931 = vrot.lane.b32.xlu1 %v4962_v7, %s4760_s0  ;;  %929 = vrot.lane.b32.xlu0 %v4965_v8, %s4760_s0  ;;  %v537_v63 = vcombine.low %v4928_v44, %v4962_v7  ;;  %v5041_v10 = vrot.slane %v372_v0, %v5022_v55  ;;  %v538_v21 = vcombine.high %v4928_v44, %v4962_v7 }
  0xac   :  { %v177_v14 = vpop.permute.xlu1 %176  ;;  %v175_v15 = vpop.permute.xlu0 %174 }
  0xad   :  { %v228_v22 = vsel %vm206_vm1, 0.0, %v177_v14  ;;  %v227_v23 = vsel %vm206_vm1, 0.0, %v175_v15  ;;  %v469_v15 = vcombine.low %v4931_v45, %v4965_v8  ;;  %v552_v42 = vrot.slane %v538_v21, %v4971_v9 }
  0xae   :  { %v4985_v28 = vsel %vm231_vm2, %v228_v22, 0.0  ;;  %v4988_v29 = vsel %vm231_vm2, %v227_v23, 0.0  ;;  %v5061_v22 = vrot.slane %v373_v3, %v5022_v55 }
  0xaf   :  { %7985 = vst [vmem:[#allocation13_spill] sm:$0xff] %v4988_v29  ;;  %933 = vrot.lane.b32.xlu0 %v4985_v28, %s4760_s0  ;;  %v485_v12 = vcombine.low %v4940_v50, %v4985_v28 }
  0xb0   :  { %v181_v37 = vpop.permute.xlu1 %180  ;;  %v179_v40 = vpop.permute.xlu0 %178 }
  0xb1   :  { %v230_v43 = vsel %vm206_vm1, 0.0, %v181_v37  ;;  %v229_v46 = vsel %vm206_vm1, 0.0, %v179_v40  ;;  %v493_v33 = vrot.slane %v485_v12, %v4971_v9  ;;  %v486_v37 = vcombine.high %v4940_v50, %v4985_v28 }
  0xb2   :  { %v5010_v49 = vsel %vm231_vm2, %v230_v43, 0.0  ;;  %v5013_v52 = vsel %vm231_vm2, %v229_v46, 0.0  ;;  %v477_v40 = vrot.slane %v469_v15, %v4971_v9  ;;  %v470_v43 = vcombine.high %v4931_v45, %v4965_v8 }
  0xb3   :  { %7986 = vst [vmem:[#allocation14_spill] sm:$0xff] %v5010_v49  ;;  %1151 = vrot.lane.b32.xlu0 %v4851_v62, %s4763_s20  ;;  %935 = vrot.lane.b32.xlu1 %v5013_v52, %s4760_s0  ;;  %v553_v1 = vcombine.low %v4953_v60, %v5013_v52  ;;  %v271_v62 = vrot.slane %v257_v54, %v4971_v9 }
  0xb4   :  { %v554_v14 = vcombine.high %v4953_v60, %v5013_v52  ;;  %v502_v48 = vcombine.high %v477_v40, %v493_v33  ;;  %v500_v56 = vrot.slane %v486_v37, %v4971_v9  ;;  %v484_v57 = vrot.slane %v470_v43, %v4971_v9 }
  0xb5   :  { %v304_v4 = vcombine.low %v271_v62, %v287_v58  ;;  %v5044_v11 = vrot.slane %v553_v1, %v4971_v9  ;;  %v305_v27 = vcombine.high %v271_v62, %v287_v58  ;;  %v288_v58 = vcombine.low %v264_v53, %v5000_v41 }
  0xb6   :  { %v568_v35 = vrot.slane %v554_v14, %v4971_v9  ;;  %v5088_v0 = vrot.slane %v502_v48, %v5022_v55  ;;  %v517_v62 = vcombine.low %v484_v57, %v500_v56  ;;  %v518_v53 = vcombine.high %v484_v57, %v500_v56 }
  0xb7   :  { %425 = vrot.lane.b32.xlu0 %v5028_v61, %s4764_s21  ;;  %1153 = vrot.lane.b32.xlu1 %v4861_v6, %s4763_s20  ;;  %v5054_v6 = vrot.slane %v537_v63, %v4971_v9  ;;  %v312_v23 = vrot.slane %v304_v4, %v5022_v55  ;;  %v319_v46 = vrot.slane %v305_v27, %v5022_v55  ;;  %v3017_v27 = vrot.slane %v4880_v17, 2 }
  0xb8   :  { %v585_v54 = vcombine.low %v552_v42, %v568_v35  ;;  %v586_v63 = vcombine.high %v552_v42, %v568_v35  ;;  %v5098_v3 = vrot.slane %v288_v58, %v5022_v55  ;;  %v5101_v4 = vrot.slane %v517_v62, %v5022_v55 }
  0xb9   :  { %v570_v30 = vcombine.high %v5054_v6, %v5044_v11  ;;  %v356_v12 = vcombine.low %v4995_v34, %v4980_v24  ;;  %v5113_v14 = vrot.slane %v518_v53, %v5022_v55  ;;  %v3014_v24 = vrot.slane %v4858_v5, 2 }
  0xba   :  { %v5091_v1 = vrot.slane %v585_v54, %v5022_v55  ;;  %7987 = vst [vmem:[#allocation15_spill] sm:$0xff] %v5098_v3  ;;  %v5104_v41 = vrot.slane %v586_v63, %v5022_v55  ;;  %v320_v15 = vcombine.high %v5098_v3, %v7878_v36  ;;  %v321_v35 = vcombine.high %v303_v2, %v7878_v36 }
  0xbb   :  { %433 = vrot.lane.b32.xlu0 %v5041_v10, %s4765_s22  ;;  %397 = vrot.lane.b32.xlu1 %v303_v2, %s4764_s21  ;;  %v5079_v47 = vrot.slane %v570_v30, %v5022_v55  ;;  %v5118_v21 = vrot.slane %v356_v12, %v5022_v55  ;;  %v3015_v30 = vrot.slane %v4883_v18, 2  ;;  %v501_v37 = vcombine.low %v477_v40, %v493_v33 }
  0xbc   :  { %v3022_v43 = vrot.slane %v4911_v32, 2  ;;  %v3020_v48 = vrot.slane %v4896_v25, 2  ;;  %v3019_v54 = vrot.slane %v4899_v26, 2  ;;  %v3027_v2 = vrot.slane %v4918_v38, 2 }
  0xbd   :  { %7988 = vst [vmem:[#allocation16_spill] sm:$0xff] %v5118_v21  ;;  %v388_v34 = vcombine.high %v5118_v21, %v7878_v36  ;;  %v5130_v42 = vsel %vm3008_vm4, %v3015_v30, %v3017_v27  ;;  %v5138_v56 = vsel %vm3008_vm4, %v3014_v24, %v3015_v30  ;;  %v3246_v33 = vrot.slane %v4943_v51, 2 }
  0xbe   :  { %7989 = vst [vmem:[#allocation17_spill] sm:$0xff] %v5130_v42  ;;  %7990 = vst [vmem:[#allocation18_spill] sm:$0xff] %v5138_v56  ;;  %v389_v40 = vcombine.high %v5028_v61, %v7878_v36  ;;  %v322_v57 = vcombine.high %v312_v23, %v7878_v36  ;;  %v3261_v58 = vrot.slane %v5010_v49, 2  ;;  %v5147_v62 = vrot.slane %v501_v37, %v5022_v55 }
  0xbf   :  { %441 = vrot.lane.b32.xlu0 %v5061_v22, %s4766_s23  ;;  %405 = vrot.lane.b32.xlu1 %v312_v23, %s4765_s22  ;;  %v3025_v63 = vrot.slane %v4921_v39, 2  ;;  %v3259_v53 = vrot.slane %v5013_v52, 2  ;;  %v3251_v12 = vrot.slane %v4950_v59, 2  ;;  %v323_v27 = vcombine.high %v319_v46, %v7878_v36 }
  0xc0   :  { %7991 = vst [vmem:[#allocation19_spill] sm:$0xff] %v5147_v62  ;;  %v3024_v61 = vrot.slane %v4908_v31, 2  ;;  %v3256_v23 = vrot.slane %v4988_v29, 2  ;;  %v391_v30 = vcombine.high %v5061_v22, %v7878_v36  ;;  %v3249_v24 = vrot.slane %v4953_v60, 2 }
  0xc1   :  { %v3248_v37 = vrot.slane %v4940_v50, 2  ;;  %v5172_v22 = vsel %vm3008_vm4, %v3025_v63, %v3027_v2  ;;  %v5175_v21 = vsel %vm3008_vm4, %v3259_v53, %v3261_v58  ;;  %v5178_v3 = vsel %vm3008_vm4, %v3020_v48, %v3022_v43 }
  0xc2   :  { %7992 = vst [vmem:[#allocation20_spill] sm:$0xff] %v5172_v22  ;;  %7993 = vst [vmem:[#allocation21_spill] sm:$0xff] %v5175_v21  ;;  %v5193_v58 = vsel %vm3008_vm4, %v3019_v54, %v3020_v48  ;;  %v5196_v43 = vsel %vm3008_vm4, %v3249_v24, %v3251_v12 }
  0xc3   :  { %413 = vrot.lane.b32.xlu1 %v319_v46, %s4766_s23  ;;  %638 = vrot.lane.b32.xlu0 %v5079_v47, %s4764_s21  ;;  %v3254_v46 = vrot.slane %v4962_v7, 2  ;;  %7994 = vst [vmem:[#allocation22_spill] sm:$0xff] %v5178_v3  ;;  %7998 = vst [vmem:[#allocation26_spill] sm:$0xff] %v5193_v58 }
  0xc4   :  { %7999 = vst [vmem:[#allocation27_spill] sm:$0xff] %v5196_v43 }
  0xc5   :  { %v5190_v2 = vsel %vm3008_vm4, %v3254_v46, %v3256_v23  ;;  %v3106_v23 = vcombine.high %v4886_v19, %v5178_v3 }
  0xc6   :  { %7997 = vst [vmem:[#allocation25_spill] sm:$0xff] %v5190_v2 }
  0xc7   :  { %610 = vrot.lane.b32.xlu1 %v5088_v0, %s4764_s21  ;;  %646 = vrot.lane.b32.xlu0 %v5091_v1, %s4765_s22 }
  0xcb   :  { %618 = vrot.lane.b32.xlu1 %v5101_v4, %s4765_s22  ;;  %654 = vrot.lane.b32.xlu0 %v5104_v41, %s4766_s23 }
  0xcf   :  { %626 = vrot.lane.b32.xlu1 %v5113_v14, %s4766_s23  ;;  %393 = vrot.lane.b32.xlu0 %v320_v15, %s4767_s24  ;;  %v390_v15 = vcombine.high %v5041_v10, %v7878_v36  ;;  %v569_v10 = vcombine.low %v5054_v6, %v5044_v11  ;;  %v3243_v11 = vrot.slane %v4931_v45, 2  ;;  %v5182_v6 = vsel %vm3008_vm4, %v3024_v61, %v3025_v63 }
  0xd0   :  { %7995 = vst [vmem:[#allocation23_spill] sm:$0xff] %v5182_v6  ;;  %v3054_v54 = vcombine.high %v5138_v56, %v5182_v6 }
  0xd1   :  { %v5209_v61 = vrot.slane %v569_v10, %v5022_v55 }
  0xd3   :  { %421 = vrot.lane.b32.xlu1 %v388_v34, %s4767_s24  ;;  %401 = vrot.lane.b32.xlu0 %v321_v35, %s4768_s25  ;;  %v3258_v34 = vrot.slane %v4985_v28, 2  ;;  %v3253_v35 = vrot.slane %v4965_v8, 2  ;;  %8002 = vst [vmem:[#allocation30_spill] sm:$0xff] %v5209_v61 }
  0xd5   :  { %v5185_v51 = vsel %vm3008_vm4, %v3258_v34, %v3259_v53  ;;  %v5199_v63 = vsel %vm3008_vm4, %v3253_v35, %v3254_v46  ;;  %v3122_v53 = vcombine.high %v5130_v42, %v5172_v22 }
  0xd6   :  { %7996 = vst [vmem:[#allocation24_spill] sm:$0xff] %v5185_v51  ;;  %8000 = vst [vmem:[#allocation28_spill] sm:$0xff] %v5199_v63 }
  0xd7   :  { %429 = vrot.lane.b32.xlu1 %v389_v40, %s4768_s25  ;;  %409 = vrot.lane.b32.xlu0 %v322_v57, %s4769_s26  ;;  %v533_v40 = vcombine.high %v5147_v62, %v7878_v36  ;;  %v3244_v57 = vrot.slane %v4928_v44, 2  ;;  %v5232_v46 = vrot.slane %v3122_v53, %v4971_v9 }
  0xd9   :  { %v5212_v48 = vsel %vm3008_vm4, %v3244_v57, %v3246_v33  ;;  %v3038_v33 = vcombine.high %v4889_v20, %v5193_v58  ;;  %8005 = vst [vmem:[#allocation33_spill] sm:$0xff] %v5232_v46 }
  0xda   :  { %8003 = vst [vmem:[#allocation31_spill] sm:$0xff] %v5212_v48  ;;  %v3340_v34 = vcombine.high %v5212_v48, %v5190_v2 }
  0xdb   :  { %437 = vrot.lane.b32.xlu1 %v390_v15, %s4769_s26  ;;  %417 = vrot.lane.b32.xlu0 %v323_v27, %s4770_s27  ;;  %v3356_v15 = vcombine.high %v5196_v43, %v5175_v21  ;;  %v5206_v27 = vsel %vm3008_vm4, %v3248_v37, %v3249_v24  ;;  %v5223_v24 = vsel %vm3008_vm4, %v3243_v11, %v3244_v57 }
  0xdc   :  { %8001 = vst [vmem:[#allocation29_spill] sm:$0xff] %v5206_v27  ;;  %v3288_v12 = vcombine.high %v5206_v27, %v5185_v51  ;;  %8004 = vst [vmem:[#allocation32_spill] sm:$0xff] %v5223_v24  ;;  %v3272_v10 = vcombine.high %v5223_v24, %v5199_v63  ;;  %v534_v37 = vcombine.high %v5088_v0, %v7878_v36 }
  0xdd   :  { %v5235_v35 = vrot.slane %v3356_v15, %v4971_v9  ;;  %v5248_v11 = vrot.slane %v3106_v23, %v4971_v9  ;;  %v5251_v53 = vrot.slane %v3340_v34, %v4971_v9  ;;  %v5256_v0 = vrot.slane %v3038_v33, %v4971_v9 }
  0xde   :  { %v5245_v57 = vrot.slane %v3288_v12, %v4971_v9  ;;  %v5259_v15 = vrot.slane %v3272_v10, %v4971_v9  ;;  %v535_v23 = vcombine.high %v5101_v4, %v7878_v36  ;;  %v602_v34 = vcombine.high %v5079_v47, %v7878_v36 }
  0xdf   :  { %445 = vrot.lane.b32.xlu1 %v391_v30, %s4770_s27  ;;  %606 = vrot.lane.b32.xlu0 %v533_v40, %s4767_s24  ;;  %8006 = vst [vmem:[#allocation34_spill] sm:$0xff] %v5235_v35  ;;  %v601_v30 = vcombine.high %v5209_v61, %v7878_v36  ;;  %v5242_v40 = vrot.slane %v3054_v54, %v4971_v9  ;;  %8009 = vst [vmem:[#allocation37_spill] sm:$0xff] %v5248_v11 }
  0xe0   :  { %8008 = vst [vmem:[#allocation36_spill] sm:$0xff] %v5245_v57  ;;  %8010 = vst [vmem:[#allocation38_spill] sm:$0xff] %v5251_v53  ;;  %v536_v10 = vcombine.high %v5113_v14, %v7878_v36  ;;  %v604_v47 = vcombine.high %v5104_v41, %v7878_v36 }
  0xe1   :  { %8007 = vst [vmem:[#allocation35_spill] sm:$0xff] %v5242_v40  ;;  %8011 = vst [vmem:[#allocation39_spill] sm:$0xff] %v5256_v0 }
  0xe2   :  { %8012 = vst [vmem:[#allocation40_spill] sm:$0xff] %v5259_v15 }
  0xe3   :  { %614 = vrot.lane.b32.xlu0 %v534_v37, %s4768_s25  ;;  %634 = vrot.lane.b32.xlu1 %v601_v30, %s4767_s24  ;;  %v603_v30 = vcombine.high %v5091_v1, %v7878_v36 }
  0xe7   :  { %622 = vrot.lane.b32.xlu0 %v535_v23, %s4769_s26  ;;  %642 = vrot.lane.b32.xlu1 %v602_v34, %s4768_s25 }
  0xeb   :  { %630 = vrot.lane.b32.xlu0 %v536_v10, %s4770_s27  ;;  %650 = vrot.lane.b32.xlu1 %v603_v30, %s4769_s26 }
  0xef   :  { %1155 = vrot.lane.b32.xlu0 %v4858_v5, %s4763_s20  ;;  %658 = vrot.lane.b32.xlu1 %v604_v47, %s4770_s27 }
  0xf3   :  { %1159 = vrot.lane.b32.xlu0 %v4899_v26, %s4763_s20  ;;  %1157 = vrot.lane.b32.xlu1 %v4883_v18, %s4763_s20 }
  0xf7   :  { %1163 = vrot.lane.b32.xlu0 %v4908_v31, %s4763_s20  ;;  %1161 = vrot.lane.b32.xlu1 %v4896_v25, %s4763_s20 }
  0xf9   :  { %v684_v1 = vpop.permute.xlu0 %683 }
  0xfb   :  { %1381 = vrot.lane.b32.xlu0 %v4931_v45, %s4763_s20  ;;  %1165 = vrot.lane.b32.xlu1 %v4921_v39, %s4763_s20 }
  0xfd   :  { %v686_v4 = vpop.permute.xlu1 %685  ;;  %v688_v41 = vpop.permute.xlu0 %687 }
  0xff   :  { %1385 = vrot.lane.b32.xlu0 %v4940_v50, %s4763_s20  ;;  %1383 = vrot.lane.b32.xlu1 %v4928_v44, %s4763_s20 }
 0x101   :  { %v690_v14 = vpop.permute.xlu1 %689 }
 0x103   :  { %1389 = vrot.lane.b32.xlu0 %v4965_v8, %s4763_s20  ;;  %1387 = vrot.lane.b32.xlu1 %v4953_v60, %s4763_s20 }
 0x105   :  { %v692_v23 = vpop.permute.xlu0 %691  ;;  %v694_v34 = vpop.permute.xlu1 %693 }
 0x106   :  { %v707_v10 = vcombine.low %v684_v1, %v692_v23  ;;  %v708_v30 = vcombine.high %v684_v1, %v692_v23  ;;  %v775_v12 = vcombine.low %v686_v4, %v694_v34  ;;  %v776_v61 = vcombine.high %v686_v4, %v694_v34 }
 0x107   :  { %1393 = vrot.lane.b32.xlu0 %v4985_v28, %s4763_s20  ;;  %1391 = vrot.lane.b32.xlu1 %v4962_v7, %s4763_s20 }
 0x108   :  { %v5313_v54 = vrot.slane %v707_v10, %v4971_v9  ;;  %v722_v15 = vrot.slane %v708_v30, %v4971_v9  ;;  %v5325_v10 = vrot.slane %v775_v12, %v4971_v9  ;;  %v790_v30 = vrot.slane %v776_v61, %v4971_v9 }
 0x109   :  { %v696_v47 = vpop.permute.xlu0 %695 }
 0x10a   :  { %v723_v33 = vcombine.low %v688_v41, %v696_v47  ;;  %v724_v37 = vcombine.high %v688_v41, %v696_v47 }
 0x10b   :  { %1395 = vrot.lane.b32.xlu1 %v5013_v52, %s4763_s20 }
 0x10c   :  { %v5316_v36 = vrot.slane %v723_v33, %v4971_v9  ;;  %v738_v62 = vrot.slane %v724_v37, %v4971_v9 }
 0x10d   :  { %v698_v57 = vpop.permute.xlu1 %697 }
 0x10e   :  { %v791_v41 = vcombine.low %v690_v14, %v698_v57  ;;  %v792_v23 = vcombine.high %v690_v14, %v698_v57  ;;  %v740_v47 = vcombine.high %v5313_v54, %v5316_v36  ;;  %v755_v34 = vcombine.low %v722_v15, %v738_v62 }
 0x10f   :  { %v756_v0 = vcombine.high %v722_v15, %v738_v62 }
 0x110   :  { %v5328_v33 = vrot.slane %v791_v41, %v4971_v9  ;;  %v806_v37 = vrot.slane %v792_v23, %v4971_v9  ;;  %v5332_v4 = vrot.slane %v740_v47, %v5022_v55  ;;  %v5345_v23 = vrot.slane %v755_v34, %v5022_v55 }
 0x111   :  { %v922_v14 = vpop.permute.xlu0 %921  ;;  %v924_v41 = vpop.permute.xlu1 %923  ;;  %v5355_v40 = vrot.slane %v756_v0, %v5022_v55 }
 0x112   :  { %848 = vrot.lane.b32.xlu1 %v5332_v4, %s4764_s21  ;;  %v808_v12 = vcombine.high %v5325_v10, %v5328_v33  ;;  %v823_v47 = vcombine.low %v790_v30, %v806_v37 }
 0x114   :  { %v5342_v1 = vrot.slane %v808_v12, %v5022_v55  ;;  %v5352_v57 = vrot.slane %v823_v47, %v5022_v55  ;;  %v824_v12 = vcombine.high %v790_v30, %v806_v37 }
 0x115   :  { %v926_v61 = vpop.permute.xlu0 %925 }
 0x116   :  { %876 = vrot.lane.b32.xlu0 %v5342_v1, %s4764_s21  ;;  %856 = vrot.lane.b32.xlu1 %v5345_v23, %s4765_s22  ;;  %v5362_v62 = vrot.slane %v824_v12, %v5022_v55 }
 0x119   :  { %v928_v53 = vpop.permute.xlu1 %927 }
 0x11a   :  { %884 = vrot.lane.b32.xlu0 %v5352_v57, %s4765_s22  ;;  %864 = vrot.lane.b32.xlu1 %v5355_v40, %s4766_s23 }
 0x11d   :  { %v930_v15 = vpop.permute.xlu0 %929  ;;  %v932_v34 = vpop.permute.xlu1 %931 }
 0x11e   :  { %892 = vrot.lane.b32.xlu0 %v5362_v62, %s4766_s23  ;;  %v945_v47 = vcombine.low %v922_v14, %v930_v15  ;;  %v946_v35 = vcombine.high %v922_v14, %v930_v15  ;;  %v1013_v30 = vcombine.low %v924_v41, %v932_v34  ;;  %v1014_v27 = vcombine.high %v924_v41, %v932_v34 }
 0x120   :  { %v5367_v46 = vrot.slane %v945_v47, %v4971_v9  ;;  %v960_v6 = vrot.slane %v946_v35, %v4971_v9 }
 0x121   :  { %v934_v0 = vpop.permute.xlu0 %933 }
 0x122   :  { %v961_v11 = vcombine.low %v926_v61, %v934_v0  ;;  %v962_v37 = vcombine.high %v926_v61, %v934_v0  ;;  %v5381_v0 = vrot.slane %v1013_v30, %v4971_v9 }
 0x124   :  { %v5370_v51 = vrot.slane %v961_v11, %v4971_v9  ;;  %v976_v12 = vrot.slane %v962_v37, %v4971_v9 }
 0x125   :  { %v936_v56 = vpop.permute.xlu1 %935  ;;  %v5374_v21 = vpop.permute.xlu0 %1151 }
 0x126   :  { %v1029_v15 = vcombine.low %v928_v53, %v936_v56  ;;  %v1030_v61 = vcombine.high %v928_v53, %v936_v56  ;;  %v978_v47 = vcombine.high %v5367_v46, %v5370_v51  ;;  %v993_v34 = vcombine.low %v960_v6, %v976_v12 }
 0x127   :  { %v1028_v56 = vrot.slane %v1014_v27, %v4971_v9  ;;  %v994_v43 = vcombine.high %v960_v6, %v976_v12 }
 0x128   :  { %v5384_v11 = vrot.slane %v1029_v15, %v4971_v9  ;;  %v1044_v41 = vrot.slane %v1030_v61, %v4971_v9  ;;  %v5388_v35 = vrot.slane %v978_v47, %v5022_v55  ;;  %v5405_v61 = vrot.slane %v993_v34, %v5022_v55 }
 0x129   :  { %v5390_v37 = vpop.permute.xlu1 %1153  ;;  %v5392_v14 = vpop.permute.xlu0 %425 }
 0x12a   :  { %8013 = vst [vmem:[#allocation41_spill] sm:$0xff] %v5392_v14  ;;  %1086 = vrot.lane.b32.xlu1 %v5388_v35, %s4764_s21  ;;  %v1046_v30 = vcombine.high %v5381_v0, %v5384_v11  ;;  %v1061_v47 = vcombine.low %v1028_v56, %v1044_v41  ;;  %v1062_v34 = vcombine.high %v1028_v56, %v1044_v41 }
 0x12c   :  { %v5402_v15 = vrot.slane %v1046_v30, %v5022_v55  ;;  %v5416_v53 = vrot.slane %v1061_v47, %v5022_v55  ;;  %v5419_v30 = vrot.slane %v994_v43, %v5022_v55  ;;  %v5430_v12 = vrot.slane %v1062_v34, %v5022_v55 }
 0x12d   :  { %v5407_v14 = vpop.permute.xlu1 %397  ;;  %v5409_v27 = vpop.permute.xlu0 %433 }
 0x12e   :  { %8014 = vst [vmem:[#allocation42_spill] sm:$0xff] %v5407_v14  ;;  %8015 = vst [vmem:[#allocation43_spill] sm:$0xff] %v5409_v27  ;;  %1114 = vrot.lane.b32.xlu0 %v5402_v15, %s4764_s21  ;;  %1094 = vrot.lane.b32.xlu1 %v5405_v61, %s4765_s22 }
 0x131   :  { %v5421_v22 = vpop.permute.xlu1 %405  ;;  %v5423_v6 = vpop.permute.xlu0 %441 }
 0x132   :  { %8016 = vst [vmem:[#allocation44_spill] sm:$0xff] %v5421_v22  ;;  %8017 = vst [vmem:[#allocation45_spill] sm:$0xff] %v5423_v6  ;;  %1122 = vrot.lane.b32.xlu0 %v5416_v53, %s4765_s22  ;;  %1102 = vrot.lane.b32.xlu1 %v5419_v30, %s4766_s23 }
 0x135   :  { %v5432_v27 = vpop.permute.xlu1 %413  ;;  %v5434_v47 = vpop.permute.xlu0 %638 }
 0x136   :  { %8018 = vst [vmem:[#allocation46_spill] sm:$0xff] %v5432_v27  ;;  %8019 = vst [vmem:[#allocation47_spill] sm:$0xff] %v5434_v47  ;;  %1130 = vrot.lane.b32.xlu0 %v5430_v12, %s4766_s23 }
 0x139   :  { %v5438_v43 = vpop.permute.xlu1 %610  ;;  %v5440_v41 = vpop.permute.xlu0 %646 }
 0x13a   :  { %8020 = vst [vmem:[#allocation48_spill] sm:$0xff] %v5438_v43  ;;  %8021 = vst [vmem:[#allocation49_spill] sm:$0xff] %v5440_v41 }
 0x13d   :  { %v5442_v56 = vpop.permute.xlu1 %618  ;;  %v5444_v6 = vpop.permute.xlu0 %654 }
 0x13e   :  { %8022 = vst [vmem:[#allocation50_spill] sm:$0xff] %v5442_v56  ;;  %8023 = vst [vmem:[#allocation51_spill] sm:$0xff] %v5444_v6 }
 0x141   :  { %v5446_v22 = vpop.permute.xlu1 %626  ;;  %v5448_v14 = vpop.permute.xlu0 %393 }
 0x142   :  { %8024 = vst [vmem:[#allocation52_spill] sm:$0xff] %v5446_v22  ;;  %8025 = vst [vmem:[#allocation53_spill] sm:$0xff] %v5448_v14 }
 0x145   :  { %v5450_v34 = vpop.permute.xlu1 %421  ;;  %v5452_v27 = vpop.permute.xlu0 %401 }
 0x146   :  { %8026 = vst [vmem:[#allocation54_spill] sm:$0xff] %v5450_v34  ;;  %8027 = vst [vmem:[#allocation55_spill] sm:$0xff] %v5452_v27 }
 0x149   :  { %v5454_v47 = vpop.permute.xlu1 %429  ;;  %v5456_v42 = vpop.permute.xlu0 %409 }
 0x14a   :  { %8028 = vst [vmem:[#allocation56_spill] sm:$0xff] %v5454_v47  ;;  %8029 = vst [vmem:[#allocation57_spill] sm:$0xff] %v5456_v42 }
 0x14d   :  { %v5458_v63 = vpop.permute.xlu1 %437  ;;  %v5460_v43 = vpop.permute.xlu0 %417 }
 0x14e   :  { %8030 = vst [vmem:[#allocation58_spill] sm:$0xff] %v5458_v63  ;;  %8031 = vst [vmem:[#allocation59_spill] sm:$0xff] %v5460_v43 }
 0x151   :  { %v5462_v41 = vpop.permute.xlu1 %445  ;;  %v5464_v56 = vpop.permute.xlu0 %606 }
 0x152   :  { %8032 = vst [vmem:[#allocation60_spill] sm:$0xff] %v5462_v41  ;;  %8033 = vst [vmem:[#allocation61_spill] sm:$0xff] %v5464_v56 }
 0x155   :  { %v5466_v6 = vpop.permute.xlu1 %634  ;;  %v5468_v22 = vpop.permute.xlu0 %614 }
 0x156   :  { %8034 = vst [vmem:[#allocation62_spill] sm:$0xff] %v5466_v6  ;;  %8035 = vst [vmem:[#allocation63_spill] sm:$0xff] %v5468_v22 }
 0x159   :  { %v5470_v14 = vpop.permute.xlu1 %642  ;;  %v5472_v34 = vpop.permute.xlu0 %622 }
 0x15a   :  { %8036 = vst [vmem:[#allocation64_spill] sm:$0xff] %v5470_v14  ;;  %8037 = vst [vmem:[#allocation65_spill] sm:$0xff] %v5472_v34 }
 0x15d   :  { %v5474_v27 = vpop.permute.xlu1 %650  ;;  %v5476_v47 = vpop.permute.xlu0 %630 }
 0x15e   :  { %8038 = vst [vmem:[#allocation66_spill] sm:$0xff] %v5474_v27  ;;  %8039 = vst [vmem:[#allocation67_spill] sm:$0xff] %v5476_v47 }
 0x161   :  { %v5478_v42 = vpop.permute.xlu1 %658  ;;  %v1156_v63 = vpop.permute.xlu0 %1155 }
 0x162   :  { %8040 = vst [vmem:[#allocation68_spill] sm:$0xff] %v5478_v42 }
 0x165   :  { %v1158_v43 = vpop.permute.xlu1 %1157  ;;  %v1160_v24 = vpop.permute.xlu0 %1159 }
 0x166   :  { %v1175_v41 = vcombine.low %v5374_v21, %v1160_v24  ;;  %v1176_v22 = vcombine.high %v5374_v21, %v1160_v24 }
 0x168   :  { %v5487_v47 = vrot.slane %v1175_v41, %v4971_v9 }
 0x169   :  { %v1162_v56 = vpop.permute.xlu1 %1161  ;;  %v1164_v58 = vpop.permute.xlu0 %1163 }
 0x16a   :  { %v1191_v6 = vcombine.low %v1156_v63, %v1164_v58  ;;  %v1192_v20 = vcombine.high %v1156_v63, %v1164_v58  ;;  %v1243_v14 = vcombine.low %v5390_v37, %v1162_v56  ;;  %v1244_v48 = vcombine.high %v5390_v37, %v1162_v56 }
 0x16b   :  { %v1190_v58 = vrot.slane %v1176_v22, %v4971_v9 }
 0x16c   :  { %v5484_v34 = vrot.slane %v1191_v6, %v4971_v9  ;;  %v1206_v42 = vrot.slane %v1192_v20, %v4971_v9  ;;  %v5497_v24 = vrot.slane %v1243_v14, %v4971_v9  ;;  %v1258_v22 = vrot.slane %v1244_v48, %v4971_v9 }
 0x16d   :  { %v1166_v27 = vpop.permute.xlu1 %1165  ;;  %v5490_v2 = vpop.permute.xlu0 %1381 }
 0x16e   :  { %v1259_v3 = vcombine.low %v1158_v43, %v1166_v27  ;;  %v1260_v63 = vcombine.high %v1158_v43, %v1166_v27  ;;  %v1208_v21 = vcombine.high %v5487_v47, %v5484_v34  ;;  %v1223_v41 = vcombine.low %v1190_v58, %v1206_v42 }
 0x16f   :  { %v1224_v43 = vcombine.high %v1190_v58, %v1206_v42 }
 0x170   :  { %v5500_v6 = vrot.slane %v1259_v3, %v4971_v9  ;;  %v1274_v20 = vrot.slane %v1260_v63, %v4971_v9  ;;  %v5506_v37 = vrot.slane %v1208_v21, %v5022_v55  ;;  %v5519_v63 = vrot.slane %v1223_v41, %v5022_v55 }
 0x171   :  { %v5503_v19 = vpop.permute.xlu0 %1385  ;;  %v5533_v42 = vrot.slane %v1224_v43, %v5022_v55 }
 0x172   :  { %v1276_v27 = vcombine.high %v5497_v24, %v5500_v6  ;;  %1316 = vrot.lane.b32.xlu1 %v5506_v37, %s4764_s21  ;;  %v1291_v14 = vcombine.low %v1258_v22, %v1274_v20  ;;  %v1292_v48 = vcombine.high %v1258_v22, %v1274_v20 }
 0x174   :  { %v5514_v3 = vrot.slane %v1276_v27, %v5022_v55  ;;  %v5528_v29 = vrot.slane %v1291_v14, %v5022_v55  ;;  %v5548_v22 = vrot.slane %v1292_v48, %v5022_v55  ;;  %v8041_v14 = vcombine.low %v5313_v54, %v5316_v36 }
 0x175   :  { %v5516_v56 = vpop.permute.xlu0 %1389  ;;  %v8044_v48 = vcombine.low %v5325_v10, %v5328_v33 }
 0x176   :  { %1344 = vrot.lane.b32.xlu0 %v5514_v3, %s4764_s21  ;;  %1324 = vrot.lane.b32.xlu1 %v5519_v63, %s4765_s22  ;;  %v1405_v21 = vcombine.low %v5490_v2, %v5516_v56  ;;  %v5554_v43 = vrot.slane %v8041_v14, %v5022_v55 }
 0x177   :  { %v5569_v45 = vrot.slane %v8044_v48, %v5022_v55  ;;  %v1207_v48 = vcombine.low %v5487_v47, %v5484_v34 }
 0x178   :  { %v5542_v41 = vrot.slane %v1405_v21, %v4971_v9  ;;  %8042 = vst [vmem:[#allocation69_spill] sm:$0xff] %v5554_v43  ;;  %v8043_v21 = vmov 0.0  }
 0x179   :  { %v5530_v27 = vpop.permute.xlu0 %1393  ;;  %v771_v49 = vcombine.high %v5554_v43, %v8043_v21  ;;  %8045 = vst [vmem:[#allocation70_spill] sm:$0xff] %v5569_v45  ;;  %v772_v36 = vcombine.high %v5332_v4, %v8043_v21  ;;  %v839_v54 = vcombine.high %v5569_v45, %v8043_v21  ;;  %v773_v10 = vcombine.high %v5345_v23, %v8043_v21 }
 0x17a   :  { %v1421_v58 = vcombine.low %v5503_v19, %v5530_v27  ;;  %1352 = vrot.lane.b32.xlu0 %v5528_v29, %s4765_s22  ;;  %1332 = vrot.lane.b32.xlu1 %v5533_v42, %s4766_s23  ;;  %v774_v33 = vcombine.high %v5355_v40, %v8043_v21  ;;  %v8046_v4 = vcombine.low %v5367_v46, %v5370_v51 }
 0x17b   :  { %v8048_v40 = vcombine.low %v5381_v0, %v5384_v11  ;;  %v1010_v51 = vcombine.high %v5388_v35, %v8043_v21  ;;  %v1078_v0 = vcombine.high %v5402_v15, %v8043_v21  ;;  %v1011_v11 = vcombine.high %v5405_v61, %v8043_v21 }
 0x17c   :  { %v5545_v20 = vrot.slane %v1421_v58, %v4971_v9  ;;  %v5594_v14 = vrot.slane %v8046_v4, %v5022_v55  ;;  %v1079_v35 = vcombine.high %v5416_v53, %v8043_v21  ;;  %v5633_v15 = vrot.slane %v1207_v48, %v5022_v55 }
 0x17d   :  { %v1080_v47 = vcombine.high %v5430_v12, %v8043_v21  ;;  %v1308_v12 = vcombine.high %v5514_v3, %v8043_v21  ;;  %v1242_v3 = vcombine.high %v5533_v42, %v8043_v21  ;;  %v1621_v48 = vrot.slane %v4858_v5, 1 }
 0x17e   :  { %v1438_v59 = vcombine.high %v5542_v41, %v5545_v20  ;;  %1360 = vrot.lane.b32.xlu0 %v5548_v22, %s4766_s23  ;;  %8047 = vst [vmem:[#allocation71_spill] sm:$0xff] %v5594_v14  ;;  %v1009_v23 = vcombine.high %v5594_v14, %v8043_v21  ;;  %8050 = vst [vmem:[#allocation73_spill] sm:$0xff] %v5633_v15  ;;  %v1239_v53 = vcombine.high %v5633_v15, %v8043_v21 }
 0x180   :  { %v5563_v58 = vrot.slane %v1438_v59, %v5022_v55  ;;  %v840_v59 = vcombine.high %v5342_v1, %v8043_v21  ;;  %v842_v1 = vcombine.high %v5362_v62, %v8043_v21  ;;  %v5616_v62 = vpop.permute.xlu1 %1383 }
 0x182   :  { %844 = vrot.lane.b32.xlu0 %v771_v49, %s4767_s24  ;;  %1546 = vrot.lane.b32.xlu1 %v5563_v58, %s4764_s21  ;;  %v841_v49 = vcombine.high %v5352_v57, %v8043_v21  ;;  %v5606_v57 = vrot.slane %v8048_v40, %v5022_v55  ;;  %v1632_v40 = vrot.slane %v4921_v39, 1  ;;  %v1626_v39 = vrot.slane %v4899_v26, 1 }
 0x184   :  { %8049 = vst [vmem:[#allocation72_spill] sm:$0xff] %v5606_v57  ;;  %v1077_v46 = vcombine.high %v5606_v57, %v8043_v21  ;;  %v1388_v61 = vpop.permute.xlu1 %1387 }
 0x186   :  { %852 = vrot.lane.b32.xlu0 %v772_v36, %s4768_s25  ;;  %872 = vrot.lane.b32.xlu1 %v839_v54, %s4767_s24  ;;  %v1012_v36 = vcombine.high %v5419_v30, %v8043_v21  ;;  %v1275_v54 = vcombine.low %v5497_v24, %v5500_v6  ;;  %v1240_v24 = vcombine.high %v5506_v37, %v8043_v21 }
 0x188   :  { %v5642_v34 = vrot.slane %v1275_v54, %v5022_v55  ;;  %v1392_v30 = vpop.permute.xlu1 %1391 }
 0x18a   :  { %860 = vrot.lane.b32.xlu0 %v773_v10, %s4769_s26  ;;  %880 = vrot.lane.b32.xlu1 %v840_v59, %s4768_s25  ;;  %8051 = vst [vmem:[#allocation74_spill] sm:$0xff] %v5642_v34  ;;  %v1307_v6 = vcombine.high %v5642_v34, %v8043_v21  ;;  %v1422_v59 = vcombine.high %v5503_v19, %v5530_v27 }
 0x18b   :  { %v1437_v10 = vcombine.low %v5542_v41, %v5545_v20  ;;  %v1309_v27 = vcombine.high %v5528_v29, %v8043_v21  ;;  %v1310_v20 = vcombine.high %v5548_v22, %v8043_v21  ;;  %v1470_v22 = vcombine.high %v5563_v58, %v8043_v21 }
 0x18c   :  { %v1396_v37 = vpop.permute.xlu1 %1395  ;;  %v1436_v4 = vrot.slane %v1422_v59, %v4971_v9 }
 0x18d   :  { %v1489_v19 = vcombine.low %v1388_v61, %v1396_v37  ;;  %v5670_v41 = vrot.slane %v1437_v10, %v5022_v55 }
 0x18e   :  { %868 = vrot.lane.b32.xlu0 %v774_v33, %s4770_s27  ;;  %888 = vrot.lane.b32.xlu1 %v841_v49, %s4769_s26  ;;  %v1241_v49 = vcombine.high %v5519_v63, %v8043_v21  ;;  %v1406_v33 = vcombine.high %v5490_v2, %v5516_v56  ;;  %v1473_v2 = vcombine.low %v5616_v62, %v1392_v30 }
 0x18f   :  { %8052 = vst [vmem:[#allocation75_spill] sm:$0xff] %v5670_v41  ;;  %v1497_v42 = vrot.slane %v1489_v19, %v4971_v9  ;;  %v1469_v29 = vcombine.high %v5670_v41, %v8043_v21  ;;  %v1624_v19 = vrot.slane %v4880_v17, 1 }
 0x190   :  { %v1420_v63 = vrot.slane %v1406_v33, %v4971_v9 }
 0x192   :  { %1082 = vrot.lane.b32.xlu0 %v1009_v23, %s4767_s24  ;;  %896 = vrot.lane.b32.xlu1 %v842_v1, %s4770_s27  ;;  %v1453_v56 = vcombine.low %v1420_v63, %v1436_v4  ;;  %v1481_v1 = vrot.slane %v1473_v2, %v4971_v9  ;;  %v1631_v23 = vrot.slane %v4908_v31, 1  ;;  %v1627_v31 = vrot.slane %v4896_v25, 1 }
 0x194   :  { %v5697_v54 = vsel %vm1615_vm3, %v1631_v23, %v1632_v40  ;;  %v1506_v5 = vcombine.high %v1481_v1, %v1497_v42  ;;  %v5712_v26 = vsel %vm1615_vm3, %v1626_v39, %v1627_v31  ;;  %v5752_v23 = vpop.permute.xlu0 %876 }
 0x195   :  { %v1644_v59 = vcombine.low %v4872_v13, %v5712_v26  ;;  %v1645_v17 = vcombine.high %v4872_v13, %v5712_v26  ;;  %8055 = vst [vmem:[#allocation78_spill] sm:$0xff] %v5752_v23 }
 0x196   :  { %1090 = vrot.lane.b32.xlu0 %v1010_v51, %s4768_s25  ;;  %1110 = vrot.lane.b32.xlu1 %v1077_v46, %s4767_s24  ;;  %v1454_v51 = vcombine.high %v1420_v63, %v1436_v4  ;;  %v1490_v46 = vcombine.high %v1388_v61, %v1396_v37 }
 0x197   :  { %v1652_v4 = vrot.slane %v1644_v59, %v4971_v9 }
 0x198   :  { %v1468_v61 = vrot.slane %v1454_v51, %v5022_v55  ;;  %v1504_v58 = vrot.slane %v1490_v46, %v4971_v9 }
 0x19a   :  { %1098 = vrot.lane.b32.xlu0 %v1011_v11, %s4769_s26  ;;  %1118 = vrot.lane.b32.xlu1 %v1078_v0, %s4768_s25  ;;  %v1505_v0 = vcombine.low %v1481_v1, %v1497_v42  ;;  %v1461_v11 = vrot.slane %v1453_v56, %v5022_v55 }
 0x19e   :  { %1106 = vrot.lane.b32.xlu0 %v1012_v36, %s4770_s27  ;;  %1126 = vrot.lane.b32.xlu1 %v1079_v35, %s4769_s26  ;;  %v1622_v35 = vrot.slane %v4883_v18, 1  ;;  %v1474_v36 = vcombine.high %v5616_v62, %v1392_v30  ;;  %v1471_v18 = vcombine.high %v1461_v11, %v8043_v21  ;;  %v5703_v62 = vrot.slane %v1505_v0, %v5022_v55 }
 0x1a0   :  { %8053 = vst [vmem:[#allocation76_spill] sm:$0xff] %v5703_v62  ;;  %v1488_v25 = vrot.slane %v1474_v36, %v4971_v9 }
 0x1a2   :  { %1312 = vrot.lane.b32.xlu0 %v1239_v53, %s4767_s24  ;;  %1134 = vrot.lane.b32.xlu1 %v1080_v47, %s4770_s27  ;;  %v5706_v47 = vsel %vm1615_vm3, %v1621_v48, %v1622_v35  ;;  %v1521_v30 = vcombine.low %v1488_v25, %v1504_v58  ;;  %v1522_v10 = vcombine.high %v1488_v25, %v1504_v58 }
 0x1a3   :  { %v1660_v53 = vcombine.low %v5706_v47, %v5697_v54  ;;  %v1661_v42 = vcombine.high %v5706_v47, %v5697_v54 }
 0x1a4   :  { %v1529_v37 = vrot.slane %v1521_v30, %v5022_v55  ;;  %v1536_v2 = vrot.slane %v1522_v10, %v5022_v55  ;;  %v1859_v10 = vrot.slane %v4940_v50, 1 }
 0x1a5   :  { %v1668_v33 = vrot.slane %v1660_v53, %v4971_v9  ;;  %v1675_v46 = vrot.slane %v1661_v42, %v4971_v9 }
 0x1a6   :  { %1320 = vrot.lane.b32.xlu0 %v1240_v24, %s4768_s25  ;;  %1340 = vrot.lane.b32.xlu1 %v1307_v6, %s4767_s24  ;;  %v1537_v24 = vcombine.high %v5703_v62, %v8043_v21  ;;  %v1472_v6 = vcombine.high %v1468_v61, %v8043_v21  ;;  %v1539_v63 = vcombine.high %v1529_v37, %v8043_v21 }
 0x1a7   :  { %v1676_v56 = vcombine.low %v1652_v4, %v1668_v33  ;;  %v1677_v1 = vcombine.high %v1652_v4, %v1668_v33 }
 0x1a9   :  { %v5756_v51 = vrot.slane %v1676_v56, %v5022_v55 }
 0x1aa   :  { %1328 = vrot.lane.b32.xlu0 %v1241_v49, %s4769_s26  ;;  %1348 = vrot.lane.b32.xlu1 %v1308_v12, %s4768_s25  ;;  %v1520_v12 = vrot.slane %v1506_v5, %v5022_v55  ;;  %v1869_v5 = vrot.slane %v4985_v28, 1  ;;  %v1860_v28 = vrot.slane %v4953_v60, 1 }
 0x1ab   :  { %8056 = vst [vmem:[#allocation79_spill] sm:$0xff] %v5756_v51  ;;  %v1708_v36 = vcombine.high %v5756_v51, %v8043_v21 }
 0x1ac   :  { %v1538_v49 = vcombine.high %v1520_v12, %v8043_v21 }
 0x1ae   :  { %1336 = vrot.lane.b32.xlu0 %v1242_v3, %s4770_s27  ;;  %1356 = vrot.lane.b32.xlu1 %v1309_v27, %s4769_s26  ;;  %v1634_v3 = vrot.slane %v4918_v38, 1  ;;  %v1629_v27 = vrot.slane %v4911_v32, 1  ;;  %v5747_v32 = vsel %vm1615_vm3, %v1622_v35, %v1624_v19  ;;  %v1691_v35 = vrot.slane %v1677_v1, %v5022_v55 }
 0x1b0   :  { %v5738_v38 = vsel %vm1615_vm3, %v1632_v40, %v1634_v3  ;;  %v1540_v40 = vcombine.high %v1536_v2, %v8043_v21  ;;  %v1709_v30 = vcombine.high %v1691_v35, %v8043_v21 }
 0x1b1   :  { %v1728_v0 = vcombine.low %v5747_v32, %v5738_v38  ;;  %v1729_v25 = vcombine.high %v5747_v32, %v5738_v38 }
 0x1b2   :  { %1364 = vrot.lane.b32.xlu1 %v1310_v20, %s4770_s27  ;;  %1542 = vrot.lane.b32.xlu0 %v1469_v29, %s4767_s24  ;;  %v5740_v20 = vpop.permute.xlu1 %848  ;;  %v5750_v29 = vsel %vm1615_vm3, %v1627_v31, %v1629_v27  ;;  %v1855_v27 = vrot.slane %v4928_v44, 1 }
 0x1b3   :  { %8054 = vst [vmem:[#allocation77_spill] sm:$0xff] %v5740_v20  ;;  %v1736_v39 = vrot.slane %v1728_v0, %v4971_v9  ;;  %v1713_v59 = vcombine.high %v4877_v16, %v5750_v29  ;;  %v1743_v33 = vrot.slane %v1729_v25, %v4971_v9 }
 0x1b5   :  { %v1727_v56 = vrot.slane %v1713_v59, %v4971_v9  ;;  %v8069_v59 = vld [vmem:[#allocation13_spill] sm:$0xff] }
 0x1b6   :  { %1554 = vrot.lane.b32.xlu1 %v1461_v11, %s4765_s22  ;;  %1550 = vrot.lane.b32.xlu0 %v1470_v22, %s4768_s25  ;;  %v1712_v11 = vcombine.low %v4877_v16, %v5750_v29  ;;  %v1659_v22 = vrot.slane %v1645_v17, %v4971_v9  ;;  %v5766_v48 = vpop.permute.xlu1 %856 }
 0x1b7   :  { %8057 = vst [vmem:[#allocation80_spill] sm:$0xff] %v5766_v48  ;;  %v1760_v0 = vcombine.low %v1727_v56, %v1743_v33 }
 0x1b8   :  { %v1692_v31 = vcombine.low %v1659_v22, %v1675_v46  ;;  %v1720_v58 = vrot.slane %v1712_v11, %v4971_v9 }
 0x1ba   :  { %1562 = vrot.lane.b32.xlu1 %v1468_v61, %s4766_s23  ;;  %1558 = vrot.lane.b32.xlu0 %v1471_v18, %s4769_s26  ;;  %v5772_v61 = vpop.permute.xlu0 %884  ;;  %v1870_v18 = vrot.slane %v5013_v52, 1  ;;  %v1700_v53 = vrot.slane %v1692_v31, %v5022_v55  ;;  %v1865_v52 = vrot.slane %v4962_v7, 1  ;;  %v1745_v19 = vcombine.high %v1720_v58, %v1736_v39  ;;  %v8062_v7 = vld [vmem:[#allocation10_spill] sm:$0xff] }
 0x1bb   :  { %8058 = vst [vmem:[#allocation81_spill] sm:$0xff] %v5772_v61  ;;  %v1768_v31 = vrot.slane %v1760_v0, %v5022_v55 }
 0x1bc   :  { %v1710_v50 = vcombine.high %v1700_v53, %v8043_v21 }
 0x1be   :  { %1570 = vrot.lane.b32.xlu1 %v1537_v24, %s4767_s24  ;;  %1566 = vrot.lane.b32.xlu0 %v1472_v6, %s4770_s27  ;;  %v1693_v24 = vcombine.high %v1659_v22, %v1675_v46  ;;  %v1744_v6 = vcombine.low %v1720_v58, %v1736_v39  ;;  %v5797_v3 = vpop.permute.xlu0 %892  ;;  %v1759_v46 = vrot.slane %v1745_v19, %v5022_v55  ;;  %v8070_v19 = vld [vmem:[#allocation11_spill] sm:$0xff] }
 0x1bf   :  { %8060 = vst [vmem:[#allocation83_spill] sm:$0xff] %v5797_v3  ;;  %v1761_v39 = vcombine.high %v1727_v56, %v1743_v33 }
 0x1c0   :  { %v1707_v4 = vrot.slane %v1693_v24, %v5022_v55  ;;  %v5802_v60 = vrot.slane %v1744_v6, %v5022_v55  ;;  %v8068_v24 = vld [vmem:[#allocation12_spill] sm:$0xff] }
 0x1c1   :  { %v1862_v6 = vrot.slane %v8068_v24, 1  ;;  %v1775_v33 = vrot.slane %v1761_v39, %v5022_v55 }
 0x1c2   :  { %1578 = vrot.lane.b32.xlu1 %v1538_v49, %s4768_s25  ;;  %1574 = vrot.lane.b32.xlu0 %v1520_v12, %s4764_s21  ;;  %v5783_v12 = vpop.permute.xlu1 %864  ;;  %v1864_v49 = vrot.slane %v4965_v8, 1  ;;  %8061 = vst [vmem:[#allocation84_spill] sm:$0xff] %v5802_v60  ;;  %v5819_v44 = vpop.permute.xlu0 %1114  ;;  %v1776_v1 = vcombine.high %v5802_v60, %v8043_v21 }
 0x1c3   :  { %8059 = vst [vmem:[#allocation82_spill] sm:$0xff] %v5783_v12  ;;  %8064 = vst [vmem:[#allocation85_spill] sm:$0xff] %v5819_v44 }
 0x1c4   :  { %v5815_v42 = vsel %vm1615_vm3, %v1864_v49, %v1865_v52  ;;  %v1778_v49 = vcombine.high %v1768_v31, %v8043_v21 }
 0x1c6   :  { %1586 = vrot.lane.b32.xlu1 %v1539_v63, %s4769_s26  ;;  %1582 = vrot.lane.b32.xlu0 %v1529_v37, %s4765_s22  ;;  %v5794_v37 = vsel %vm1615_vm3, %v1869_v5, %v1870_v18  ;;  %v1854_v63 = vrot.slane %v8062_v7, 1  ;;  %v5806_v8 = vpop.permute.xlu1 %1086  ;;  %v8066_v5 = vld [vmem:[#allocation14_spill] sm:$0xff]  ;;  %v1857_v7 = vrot.slane %v8070_v19, 1 }
 0x1c7   :  { %8063 = vst [vmem:[#allocation10_spill] sm:$0xff] %v5806_v8  ;;  %v1872_v25 = vrot.slane %v8066_v5, 1 }
 0x1c8   :  { %v5826_v11 = vsel %vm1615_vm3, %v1854_v63, %v1855_v27  ;;  %v5875_v39 = vsel %vm1615_vm3, %v1855_v27, %v1857_v7 }
 0x1c9   :  { %v1882_v22 = vcombine.low %v5826_v11, %v5815_v42  ;;  %v5851_v63 = vsel %vm1615_vm3, %v1870_v18, %v1872_v25  ;;  %v1779_v18 = vcombine.high %v1775_v33, %v8043_v21 }
 0x1ca   :  { %1594 = vrot.lane.b32.xlu1 %v1540_v40, %s4770_s27  ;;  %1590 = vrot.lane.b32.xlu0 %v1536_v2, %s4766_s23  ;;  %v5809_v2 = vsel %vm1615_vm3, %v1859_v10, %v1860_v28  ;;  %v1711_v40 = vcombine.high %v1707_v4, %v8043_v21  ;;  %v1867_v10 = vrot.slane %v8069_v59, 1 }
 0x1cb   :  { %v1898_v17 = vcombine.low %v5809_v2, %v5794_v37 }
 0x1cd   :  { %v1906_v58 = vrot.slane %v1898_v17, %v4971_v9  ;;  %v1883_v17 = vcombine.high %v5826_v11, %v5815_v42 }
 0x1ce   :  { %1785 = vrot.lane.b32.xlu1 %v1691_v35, %s4764_s21  ;;  %1781 = vrot.lane.b32.xlu0 %v1708_v36, %s4767_s24  ;;  %v5832_v35 = vpop.permute.xlu1 %1094  ;;  %v1777_v36 = vcombine.high %v1759_v46, %v8043_v21 }
 0x1cf   :  { %8065 = vst [vmem:[#allocation86_spill] sm:$0xff] %v5832_v35 }
 0x1d2   :  { %1793 = vrot.lane.b32.xlu1 %v1700_v53, %s4765_s22  ;;  %1789 = vrot.lane.b32.xlu0 %v1709_v30, %s4768_s25  ;;  %v5838_v53 = vpop.permute.xlu0 %1122  ;;  %v1890_v30 = vrot.slane %v1882_v22, %v4971_v9  ;;  %v5853_v56 = vpop.permute.xlu1 %1102 }
 0x1d3   :  { %8067 = vst [vmem:[#allocation14_spill] sm:$0xff] %v5838_v53  ;;  %8071 = vst [vmem:[#allocation12_spill] sm:$0xff] %v5853_v56 }
 0x1d6   :  { %1801 = vrot.lane.b32.xlu1 %v1707_v4, %s4766_s23  ;;  %1797 = vrot.lane.b32.xlu0 %v1710_v50, %s4769_s26  ;;  %v1914_v4 = vcombine.low %v1890_v30, %v1906_v58  ;;  %v1899_v50 = vcombine.high %v5809_v2, %v5794_v37  ;;  %v5865_v0 = vpop.permute.xlu0 %1130 }
 0x1d7   :  { %8072 = vst [vmem:[#allocation13_spill] sm:$0xff] %v5865_v0 }
 0x1d8   :  { %v5869_v22 = vrot.slane %v1914_v4, %v5022_v55 }
 0x1da   :  { %1809 = vrot.lane.b32.xlu1 %v1776_v1, %s4767_s24  ;;  %1805 = vrot.lane.b32.xlu0 %v1711_v40, %s4770_s27  ;;  %v5860_v1 = vsel %vm1615_vm3, %v1860_v28, %v1862_v6  ;;  %v5863_v40 = vsel %vm1615_vm3, %v1865_v52, %v1867_v10  ;;  %8073 = vst [vmem:[#allocation11_spill] sm:$0xff] %v5869_v22 }
 0x1db   :  { %v1950_v52 = vcombine.low %v5875_v39, %v5863_v40  ;;  %v1967_v19 = vcombine.high %v5860_v1, %v5851_v63  ;;  %v1951_v7 = vcombine.high %v5875_v39, %v5863_v40 }
 0x1dd   :  { %v1958_v59 = vrot.slane %v1950_v52, %v4971_v9 }
 0x1de   :  { %1817 = vrot.lane.b32.xlu1 %v1777_v36, %s4768_s25  ;;  %1813 = vrot.lane.b32.xlu0 %v1759_v46, %s4764_s21  ;;  %v1915_v46 = vcombine.high %v1890_v30, %v1906_v58  ;;  %v1913_v36 = vrot.slane %v1899_v50, %v4971_v9  ;;  %v1897_v58 = vrot.slane %v1883_v17, %v4971_v9 }
 0x1df   :  { %v1946_v30 = vcombine.high %v5869_v22, %v8043_v21 }
 0x1e0   :  { %v1929_v25 = vrot.slane %v1915_v46, %v5022_v55  ;;  %v1930_v27 = vcombine.low %v1897_v58, %v1913_v36  ;;  %v1931_v10 = vcombine.high %v1897_v58, %v1913_v36  ;;  %v1981_v58 = vrot.slane %v1967_v19, %v4971_v9 }
 0x1e2   :  { %1825 = vrot.lane.b32.xlu1 %v1778_v49, %s4769_s26  ;;  %1821 = vrot.lane.b32.xlu0 %v1768_v31, %s4765_s22  ;;  %v1966_v31 = vcombine.low %v5860_v1, %v5851_v63  ;;  %v1947_v4 = vcombine.high %v1929_v25, %v8043_v21  ;;  %v1945_v17 = vrot.slane %v1931_v10, %v5022_v55 }
 0x1e4   :  { %v5877_v28 = vpop.permute.xlu1 %1316  ;;  %v1974_v24 = vrot.slane %v1966_v31, %v4971_v9 }
 0x1e5   :  { %8074 = vst [vmem:[#allocation87_spill] sm:$0xff] %v5877_v28 }
 0x1e6   :  { %1833 = vrot.lane.b32.xlu1 %v1779_v18, %s4770_s27  ;;  %1829 = vrot.lane.b32.xlu0 %v1775_v33, %s4766_s23  ;;  %v1938_v33 = vrot.slane %v1930_v27, %v5022_v55  ;;  %v1982_v50 = vcombine.low %v1958_v59, %v1974_v24  ;;  %v1983_v52 = vcombine.high %v1958_v59, %v1974_v24 }
 0x1e8   :  { %v5884_v5 = vpop.permute.xlu0 %1344  ;;  %v5890_v6 = vpop.permute.xlu1 %1324  ;;  %v1948_v36 = vcombine.high %v1938_v33, %v8043_v21  ;;  %v5912_v31 = vrot.slane %v1982_v50, %v5022_v55 }
 0x1e9   :  { %8075 = vst [vmem:[#allocation88_spill] sm:$0xff] %v5884_v5  ;;  %8076 = vst [vmem:[#allocation89_spill] sm:$0xff] %v5890_v6 }
 0x1ea   :  { %2023 = vrot.lane.b32.xlu1 %v1929_v25, %s4764_s21  ;;  %2019 = vrot.lane.b32.xlu0 %v1946_v30, %s4767_s24  ;;  %8080 = vst [vmem:[#allocation93_spill] sm:$0xff] %v5912_v31  ;;  %v1965_v25 = vrot.slane %v1951_v7, %v4971_v9  ;;  %v2014_v10 = vcombine.high %v5912_v31, %v8043_v21 }
 0x1ec   :  { %v5895_v49 = vpop.permute.xlu0 %1352  ;;  %v5906_v46 = vpop.permute.xlu1 %1332  ;;  %v1998_v24 = vcombine.low %v1965_v25, %v1981_v58 }
 0x1ed   :  { %8077 = vst [vmem:[#allocation90_spill] sm:$0xff] %v5895_v49  ;;  %8078 = vst [vmem:[#allocation91_spill] sm:$0xff] %v5906_v46 }
 0x1ee   :  { %2031 = vrot.lane.b32.xlu1 %v1938_v33, %s4765_s22  ;;  %2027 = vrot.lane.b32.xlu0 %v1947_v4, %s4768_s25  ;;  %v1949_v33 = vcombine.high %v1945_v17, %v8043_v21  ;;  %v1997_v4 = vrot.slane %v1983_v52, %v5022_v55  ;;  %v2006_v7 = vrot.slane %v1998_v24, %v5022_v55 }
 0x1f0   :  { %v5908_v18 = vpop.permute.xlu0 %1360  ;;  %v2015_v19 = vcombine.high %v1997_v4, %v8043_v21 }
 0x1f1   :  { %8079 = vst [vmem:[#allocation92_spill] sm:$0xff] %v5908_v18 }
 0x1f2   :  { %2039 = vrot.lane.b32.xlu1 %v1945_v17, %s4766_s23  ;;  %2035 = vrot.lane.b32.xlu0 %v1948_v36, %s4769_s26  ;;  %v1999_v36 = vcombine.high %v1965_v25, %v1981_v58 }
 0x1f4   :  { %v5918_v30 = vpop.permute.xlu1 %1546  ;;  %v5920_v27 = vpop.permute.xlu0 %844 }
 0x1f5   :  { %8081 = vst [vmem:[#allocation94_spill] sm:$0xff] %v5918_v30  ;;  %8082 = vst [vmem:[#allocation95_spill] sm:$0xff] %v5920_v27 }
 0x1f6   :  { %2047 = vrot.lane.b32.xlu1 %v2014_v10, %s4767_s24  ;;  %2043 = vrot.lane.b32.xlu0 %v1949_v33, %s4770_s27  ;;  %v2016_v10 = vcombine.high %v2006_v7, %v8043_v21  ;;  %v2013_v33 = vrot.slane %v1999_v36, %v5022_v55 }
 0x1f8   :  { %v5928_v59 = vpop.permute.xlu1 %872  ;;  %v5930_v50 = vpop.permute.xlu0 %852  ;;  %v2017_v58 = vcombine.high %v2013_v33, %v8043_v21 }
 0x1f9   :  { %8083 = vst [vmem:[#allocation96_spill] sm:$0xff] %v5928_v59  ;;  %8084 = vst [vmem:[#allocation97_spill] sm:$0xff] %v5930_v50 }
 0x1fa   :  { %2055 = vrot.lane.b32.xlu1 %v2015_v19, %s4768_s25  ;;  %2051 = vrot.lane.b32.xlu0 %v1997_v4, %s4764_s21 }
 0x1fc   :  { %v5936_v17 = vpop.permute.xlu1 %880  ;;  %v5938_v52 = vpop.permute.xlu0 %860 }
 0x1fd   :  { %8085 = vst [vmem:[#allocation98_spill] sm:$0xff] %v5936_v17  ;;  %8086 = vst [vmem:[#allocation99_spill] sm:$0xff] %v5938_v52 }
 0x1fe   :  { %2063 = vrot.lane.b32.xlu1 %v2016_v10, %s4769_s26  ;;  %2059 = vrot.lane.b32.xlu0 %v2006_v7, %s4765_s22 }
 0x200   :  { %v5944_v30 = vpop.permute.xlu1 %888  ;;  %v5946_v24 = vpop.permute.xlu0 %868 }
 0x201   :  { %8087 = vst [vmem:[#allocation100_spill] sm:$0xff] %v5944_v30  ;;  %8088 = vst [vmem:[#allocation101_spill] sm:$0xff] %v5946_v24 }
 0x202   :  { %2071 = vrot.lane.b32.xlu1 %v2017_v58, %s4770_s27  ;;  %2067 = vrot.lane.b32.xlu0 %v2013_v33, %s4766_s23 }
 0x204   :  { %v5951_v25 = vpop.permute.xlu1 %896  ;;  %v5953_v4 = vpop.permute.xlu0 %1082 }
 0x205   :  { %8089 = vst [vmem:[#allocation102_spill] sm:$0xff] %v5951_v25  ;;  %8090 = vst [vmem:[#allocation103_spill] sm:$0xff] %v5953_v4 }
 0x206   :  { %2090 = vrot.lane.b32.xlu1 %v4877_v16, %s4760_s0  ;;  %2088 = vrot.lane.b32.xlu0 %v4872_v13, %s4760_s0 }
 0x208   :  { %v5959_v19 = vpop.permute.xlu1 %1110  ;;  %v5961_v7 = vpop.permute.xlu0 %1090 }
 0x209   :  { %8091 = vst [vmem:[#allocation104_spill] sm:$0xff] %v5959_v19  ;;  %8092 = vst [vmem:[#allocation105_spill] sm:$0xff] %v5961_v7 }
 0x20a   :  { %2094 = vrot.lane.b32.xlu1 %v5747_v32, %s4760_s0  ;;  %2092 = vrot.lane.b32.xlu0 %v5706_v47, %s4760_s0 }
 0x20c   :  { %v5967_v36 = vpop.permute.xlu1 %1118  ;;  %v5969_v10 = vpop.permute.xlu0 %1098 }
 0x20d   :  { %8093 = vst [vmem:[#allocation106_spill] sm:$0xff] %v5967_v36  ;;  %8094 = vst [vmem:[#allocation107_spill] sm:$0xff] %v5969_v10 }
 0x20e   :  { %2098 = vrot.lane.b32.xlu1 %v5750_v29, %s4760_s0  ;;  %2096 = vrot.lane.b32.xlu0 %v5712_v26, %s4760_s0 }
 0x210   :  { %v5975_v33 = vpop.permute.xlu1 %1126  ;;  %v5977_v58 = vpop.permute.xlu0 %1106 }
 0x211   :  { %8095 = vst [vmem:[#allocation108_spill] sm:$0xff] %v5975_v33  ;;  %8096 = vst [vmem:[#allocation109_spill] sm:$0xff] %v5977_v58 }
 0x212   :  { %2102 = vrot.lane.b32.xlu1 %v5738_v38, %s4760_s0  ;;  %2100 = vrot.lane.b32.xlu0 %v5697_v54, %s4760_s0 }
 0x214   :  { %v5983_v31 = vpop.permute.xlu1 %1134  ;;  %v5985_v62 = vpop.permute.xlu0 %1312 }
 0x215   :  { %8097 = vst [vmem:[#allocation110_spill] sm:$0xff] %v5983_v31  ;;  %8098 = vst [vmem:[#allocation111_spill] sm:$0xff] %v5985_v62 }
 0x218   :  { %v5987_v22 = vpop.permute.xlu1 %1340  ;;  %v5989_v41 = vpop.permute.xlu0 %1320 }
 0x219   :  { %8099 = vst [vmem:[#allocation112_spill] sm:$0xff] %v5987_v22  ;;  %8100 = vst [vmem:[#allocation113_spill] sm:$0xff] %v5989_v41 }
 0x21c   :  { %v5991_v18 = vpop.permute.xlu1 %1348  ;;  %v5993_v46 = vpop.permute.xlu0 %1328 }
 0x21d   :  { %8101 = vst [vmem:[#allocation114_spill] sm:$0xff] %v5991_v18  ;;  %8102 = vst [vmem:[#allocation115_spill] sm:$0xff] %v5993_v46 }
 0x220   :  { %v5995_v0 = vpop.permute.xlu1 %1356  ;;  %v5997_v58 = vpop.permute.xlu0 %1336 }
 0x221   :  { %8103 = vst [vmem:[#allocation116_spill] sm:$0xff] %v5995_v0  ;;  %8104 = vst [vmem:[#allocation117_spill] sm:$0xff] %v5997_v58 }
 0x224   :  { %v5999_v49 = vpop.permute.xlu1 %1364  ;;  %v6001_v56 = vpop.permute.xlu0 %1542 }
 0x225   :  { %8105 = vst [vmem:[#allocation118_spill] sm:$0xff] %v5999_v49  ;;  %8106 = vst [vmem:[#allocation119_spill] sm:$0xff] %v6001_v56 }
 0x228   :  { %v6003_v6 = vpop.permute.xlu1 %1554  ;;  %v6005_v31 = vpop.permute.xlu0 %1550 }
 0x229   :  { %8107 = vst [vmem:[#allocation120_spill] sm:$0xff] %v6003_v6  ;;  %8108 = vst [vmem:[#allocation121_spill] sm:$0xff] %v6005_v31 }
 0x22c   :  { %v6007_v33 = vpop.permute.xlu1 %1562  ;;  %v6009_v53 = vpop.permute.xlu0 %1558 }
 0x22d   :  { %8109 = vst [vmem:[#allocation122_spill] sm:$0xff] %v6007_v33  ;;  %8110 = vst [vmem:[#allocation123_spill] sm:$0xff] %v6009_v53 }
 0x230   :  { %v6011_v10 = vpop.permute.xlu1 %1570  ;;  %v6013_v18 = vpop.permute.xlu0 %1566 }
 0x231   :  { %8111 = vst [vmem:[#allocation124_spill] sm:$0xff] %v6011_v10  ;;  %8112 = vst [vmem:[#allocation125_spill] sm:$0xff] %v6013_v18 }
 0x234   :  { %v6015_v46 = vpop.permute.xlu1 %1578  ;;  %v6017_v0 = vpop.permute.xlu0 %1574 }
 0x235   :  { %8113 = vst [vmem:[#allocation126_spill] sm:$0xff] %v6015_v46  ;;  %8114 = vst [vmem:[#allocation127_spill] sm:$0xff] %v6017_v0 }
 0x238   :  { %v6019_v58 = vpop.permute.xlu1 %1586  ;;  %v6021_v49 = vpop.permute.xlu0 %1582 }
 0x239   :  { %8115 = vst [vmem:[#allocation128_spill] sm:$0xff] %v6019_v58  ;;  %8116 = vst [vmem:[#allocation129_spill] sm:$0xff] %v6021_v49 }
 0x23c   :  { %v6023_v56 = vpop.permute.xlu1 %1594  ;;  %v6025_v6 = vpop.permute.xlu0 %1590 }
 0x23d   :  { %8117 = vst [vmem:[#allocation130_spill] sm:$0xff] %v6023_v56  ;;  %8118 = vst [vmem:[#allocation131_spill] sm:$0xff] %v6025_v6 }
 0x240   :  { %v6027_v31 = vpop.permute.xlu1 %1785  ;;  %v6029_v33 = vpop.permute.xlu0 %1781 }
 0x241   :  { %8119 = vst [vmem:[#allocation132_spill] sm:$0xff] %v6027_v31  ;;  %8120 = vst [vmem:[#allocation133_spill] sm:$0xff] %v6029_v33 }
 0x244   :  { %v6031_v53 = vpop.permute.xlu1 %1793  ;;  %v6033_v10 = vpop.permute.xlu0 %1789 }
 0x245   :  { %8121 = vst [vmem:[#allocation134_spill] sm:$0xff] %v6031_v53  ;;  %8122 = vst [vmem:[#allocation135_spill] sm:$0xff] %v6033_v10 }
 0x248   :  { %v6035_v18 = vpop.permute.xlu1 %1801  ;;  %v6037_v46 = vpop.permute.xlu0 %1797 }
 0x249   :  { %8123 = vst [vmem:[#allocation136_spill] sm:$0xff] %v6035_v18  ;;  %8124 = vst [vmem:[#allocation137_spill] sm:$0xff] %v6037_v46 }
 0x24c   :  { %v6039_v0 = vpop.permute.xlu1 %1809  ;;  %v6041_v58 = vpop.permute.xlu0 %1805 }
 0x24d   :  { %8125 = vst [vmem:[#allocation138_spill] sm:$0xff] %v6039_v0  ;;  %8126 = vst [vmem:[#allocation139_spill] sm:$0xff] %v6041_v58 }
 0x250   :  { %v6043_v49 = vpop.permute.xlu1 %1817  ;;  %v6045_v56 = vpop.permute.xlu0 %1813 }
 0x251   :  { %8127 = vst [vmem:[#allocation140_spill] sm:$0xff] %v6043_v49  ;;  %8128 = vst [vmem:[#allocation141_spill] sm:$0xff] %v6045_v56 }
 0x254   :  { %v6047_v6 = vpop.permute.xlu1 %1825  ;;  %v6049_v31 = vpop.permute.xlu0 %1821 }
 0x255   :  { %8129 = vst [vmem:[#allocation142_spill] sm:$0xff] %v6047_v6  ;;  %8130 = vst [vmem:[#allocation143_spill] sm:$0xff] %v6049_v31 }
 0x258   :  { %v6051_v5 = vpop.permute.xlu1 %1833  ;;  %v6053_v53 = vpop.permute.xlu0 %1829 }
 0x259   :  { %8131 = vst [vmem:[#allocation144_spill] sm:$0xff] %v6051_v5  ;;  %8132 = vst [vmem:[#allocation145_spill] sm:$0xff] %v6053_v53 }
 0x25c   :  { %v6055_v10 = vpop.permute.xlu1 %2023  ;;  %v6057_v18 = vpop.permute.xlu0 %2019 }
 0x25d   :  { %8133 = vst [vmem:[#allocation146_spill] sm:$0xff] %v6055_v10  ;;  %8134 = vst [vmem:[#allocation147_spill] sm:$0xff] %v6057_v18 }
 0x260   :  { %v6059_v46 = vpop.permute.xlu1 %2031  ;;  %v6061_v41 = vpop.permute.xlu0 %2027 }
 0x261   :  { %8135 = vst [vmem:[#allocation148_spill] sm:$0xff] %v6059_v46  ;;  %8136 = vst [vmem:[#allocation149_spill] sm:$0xff] %v6061_v41 }
 0x264   :  { %v6063_v58 = vpop.permute.xlu1 %2039  ;;  %v6065_v49 = vpop.permute.xlu0 %2035 }
 0x265   :  { %8137 = vst [vmem:[#allocation150_spill] sm:$0xff] %v6063_v58  ;;  %8138 = vst [vmem:[#allocation151_spill] sm:$0xff] %v6065_v49 }
 0x268   :  { %v6067_v35 = vpop.permute.xlu1 %2047  ;;  %v6069_v6 = vpop.permute.xlu0 %2043 }
 0x269   :  { %8139 = vst [vmem:[#allocation152_spill] sm:$0xff] %v6067_v35  ;;  %8140 = vst [vmem:[#allocation153_spill] sm:$0xff] %v6069_v6 }
 0x26c   :  { %v6071_v31 = vpop.permute.xlu1 %2055  ;;  %v6073_v5 = vpop.permute.xlu0 %2051 }
 0x26d   :  { %8141 = vst [vmem:[#allocation154_spill] sm:$0xff] %v6071_v31  ;;  %8142 = vst [vmem:[#allocation155_spill] sm:$0xff] %v6073_v5 }
 0x270   :  { %v6075_v53 = vpop.permute.xlu1 %2063  ;;  %v6077_v10 = vpop.permute.xlu0 %2059 }
 0x271   :  { %8143 = vst [vmem:[#allocation156_spill] sm:$0xff] %v6075_v53  ;;  %8144 = vst [vmem:[#allocation157_spill] sm:$0xff] %v6077_v10 }
 0x274   :  { %v6079_v18 = vpop.permute.xlu1 %2071  ;;  %v6081_v46 = vpop.permute.xlu0 %2067 }
 0x275   :  { %8145 = vst [vmem:[#allocation158_spill] sm:$0xff] %v6079_v18  ;;  %8146 = vst [vmem:[#allocation159_spill] sm:$0xff] %v6081_v46 }
 0x278   :  { %v2091_v41 = vpop.permute.xlu1 %2090  ;;  %v2089_v58 = vpop.permute.xlu0 %2088 }
 0x27c   :  { %v2095_v56 = vpop.permute.xlu1 %2094  ;;  %v2093_v49 = vpop.permute.xlu0 %2092 }
 0x280   :  { %v2099_v28 = vpop.permute.xlu1 %2098  ;;  %v2097_v35 = vpop.permute.xlu0 %2096 }
 0x281   :  { %v2112_v60 = vcombine.low %v2089_v58, %v2097_v35  ;;  %v2113_v5 = vcombine.high %v2089_v58, %v2097_v35  ;;  %v2180_v46 = vcombine.low %v2091_v41, %v2099_v28 }
 0x283   :  { %v2120_v10 = vrot.slane %v2112_v60, %v4971_v9  ;;  %v2127_v34 = vrot.slane %v2113_v5, %v4971_v9  ;;  %v2188_v35 = vrot.slane %v2180_v46, %v4971_v9 }
 0x284   :  { %v2101_v6 = vpop.permute.xlu0 %2100  ;;  %v2103_v0 = vpop.permute.xlu1 %2102 }
 0x285   :  { %v2128_v31 = vcombine.low %v2093_v49, %v2101_v6  ;;  %v2129_v51 = vcombine.high %v2093_v49, %v2101_v6  ;;  %v2196_v33 = vcombine.low %v2095_v56, %v2103_v0  ;;  %v2197_v60 = vcombine.high %v2095_v56, %v2103_v0 }
 0x287   :  { %v2136_v53 = vrot.slane %v2128_v31, %v4971_v9  ;;  %v2143_v18 = vrot.slane %v2129_v51, %v4971_v9  ;;  %v2204_v7 = vrot.slane %v2196_v33, %v4971_v9  ;;  %v2181_v31 = vcombine.high %v2091_v41, %v2099_v28 }
 0x289   :  { %v2144_v22 = vcombine.low %v2120_v10, %v2136_v53  ;;  %v2145_v36 = vcombine.high %v2120_v10, %v2136_v53  ;;  %v2160_v15 = vcombine.low %v2127_v34, %v2143_v18  ;;  %v2212_v49 = vcombine.low %v2188_v35, %v2204_v7 }
 0x28a   :  { %v2161_v5 = vcombine.high %v2127_v34, %v2143_v18  ;;  %v2213_v46 = vcombine.high %v2188_v35, %v2204_v7  ;;  %v2195_v34 = vrot.slane %v2181_v31, %v4971_v9  ;;  %v8153_v31 = vld [vmem:[#allocation9_spill] sm:$0xff] }
 0x28b   :  { %v2159_v62 = vrot.slane %v2145_v36, %v5022_v55  ;;  %v6090_v6 = vrot.slane %v2144_v22, %v5022_v55  ;;  %v2168_v53 = vrot.slane %v2160_v15, %v5022_v55  ;;  %v2211_v36 = vrot.slane %v2197_v60, %v4971_v9  ;;  %v8149_v60 = vld [vmem:[#allocation8_spill] sm:$0xff] }
 0x28c   :  { %v2175_v10 = vrot.slane %v2161_v5, %v5022_v55  ;;  %v6104_v56 = vrot.slane %v2212_v49, %v5022_v55  ;;  %v2227_v0 = vrot.slane %v2213_v46, %v5022_v55  ;;  %v8150_v49 = vld [vmem:[#allocation22_spill] sm:$0xff]  ;;  %v8151_v5 = vld [vmem:[#allocation31_spill] sm:$0xff]  ;;  %v8156_v46 = vld [vmem:[#allocation28_spill] sm:$0xff] }
 0x28d   :  { %8147 = vst [vmem:[#allocation160_spill] sm:$0xff] %v6090_v6  ;;  %2253 = vrot.lane.b32.xlu1 %v2159_v62, %s4764_s21  ;;  %v2176_v51 = vcombine.high %v6090_v6, %v8043_v21  ;;  %v2177_v22 = vcombine.high %v2159_v62, %v8043_v21  ;;  %v2178_v15 = vcombine.high %v2168_v53, %v8043_v21 }
 0x28e   :  { %8148 = vst [vmem:[#allocation161_spill] sm:$0xff] %v6104_v56  ;;  %v2228_v41 = vcombine.low %v2195_v34, %v2211_v36  ;;  %v2244_v62 = vcombine.high %v6104_v56, %v8043_v21  ;;  %v2179_v28 = vcombine.high %v2175_v10, %v8043_v21  ;;  %v2229_v18 = vcombine.high %v2195_v34, %v2211_v36  ;;  %v8155_v36 = vld [vmem:[#allocation32_spill] sm:$0xff] }
 0x28f   :  { %2249 = vrot.lane.b32.xlu0 %v2176_v51, %s4767_s24  ;;  %v2245_v7 = vcombine.high %v2227_v0, %v8043_v21 }
 0x290   :  { %v2236_v33 = vrot.slane %v2228_v41, %v5022_v55  ;;  %v2243_v35 = vrot.slane %v2229_v18, %v5022_v55 }
 0x291   :  { %2261 = vrot.lane.b32.xlu1 %v2168_v53, %s4765_s22  ;;  %v8152_v53 = vld [vmem:[#allocation25_spill] sm:$0xff] }
 0x292   :  { %v2246_v58 = vcombine.high %v2236_v33, %v8043_v21  ;;  %v2247_v51 = vcombine.high %v2243_v35, %v8043_v21 }
 0x293   :  { %2257 = vrot.lane.b32.xlu0 %v2177_v22, %s4768_s25  ;;  %v8154_v22 = vld [vmem:[#allocation26_spill] sm:$0xff] }
 0x295   :  { %2269 = vrot.lane.b32.xlu1 %v2175_v10, %s4766_s23 }
 0x297   :  { %2265 = vrot.lane.b32.xlu0 %v2178_v15, %s4769_s26 }
 0x299   :  { %2277 = vrot.lane.b32.xlu1 %v2244_v62, %s4767_s24 }
 0x29b   :  { %2273 = vrot.lane.b32.xlu0 %v2179_v28, %s4770_s27 }
 0x29d   :  { %2285 = vrot.lane.b32.xlu1 %v2245_v7, %s4768_s25  ;;  %v8175_v7 = vld [vmem:[#allocation27_spill] sm:$0xff] }
 0x29f   :  { %2281 = vrot.lane.b32.xlu0 %v2227_v0, %s4764_s21 }
 0x2a1   :  { %2293 = vrot.lane.b32.xlu1 %v2246_v58, %s4769_s26 }
 0x2a3   :  { %2289 = vrot.lane.b32.xlu0 %v2236_v33, %s4765_s22 }
 0x2a5   :  { %2301 = vrot.lane.b32.xlu1 %v2247_v51, %s4770_s27  ;;  %v8172_v51 = vld [vmem:[#allocation17_spill] sm:$0xff] }
 0x2a7   :  { %2297 = vrot.lane.b32.xlu0 %v2243_v35, %s4766_s23 }
 0x2a9   :  { %2320 = vrot.lane.b32.xlu1 %v5875_v39, %s4760_s0 }
 0x2ab   :  { %2318 = vrot.lane.b32.xlu0 %v5826_v11, %s4760_s0 }
 0x2ad   :  { %2324 = vrot.lane.b32.xlu1 %v5860_v1, %s4760_s0 }
 0x2af   :  { %2322 = vrot.lane.b32.xlu0 %v5809_v2, %s4760_s0 }
 0x2b1   :  { %2328 = vrot.lane.b32.xlu1 %v5863_v40, %s4760_s0 }
 0x2b3   :  { %2326 = vrot.lane.b32.xlu0 %v5815_v42, %s4760_s0 }
 0x2b5   :  { %2332 = vrot.lane.b32.xlu1 %v5851_v63, %s4760_s0 }
 0x2b7   :  { %2330 = vrot.lane.b32.xlu0 %v5794_v37, %s4760_s0 }
 0x2b9   :  { %3479 = vrot.lane.b32.xlu1 %v8149_v60, %s4760_s0 }
 0x2bd   :  { %3487 = vrot.lane.b32.xlu1 %v8150_v49, %s4760_s0 }
 0x2c1   :  { %3709 = vrot.lane.b32.xlu1 %v8151_v5, %s4760_s0 }
 0x2c5   :  { %3717 = vrot.lane.b32.xlu1 %v8152_v53, %s4760_s0 }
 0x2c9   :  { %3477 = vrot.lane.b32.xlu1 %v8153_v31, %s4760_s0 }
 0x2cd   :  { %3485 = vrot.lane.b32.xlu1 %v8154_v22, %s4760_s0 }
 0x2d1   :  { %3707 = vrot.lane.b32.xlu1 %v8155_v36, %s4760_s0 }
 0x2d5   :  { %3715 = vrot.lane.b32.xlu1 %v8156_v46, %s4760_s0 }
 0x2d9   :  { %3939 = vrot.lane.b32.xlu1 %v8149_v60, %s4763_s20 }
 0x2dd   :  { %3947 = vrot.lane.b32.xlu1 %v8150_v49, %s4763_s20 }
 0x2e1   :  { %4169 = vrot.lane.b32.xlu1 %v8151_v5, %s4763_s20 }
 0x2e5   :  { %4177 = vrot.lane.b32.xlu1 %v8152_v53, %s4763_s20 }
 0x2e9   :  { %2550 = vrot.lane.b32.xlu1 %v4877_v16, %s4763_s20 }
 0x2ed   :  { %2558 = vrot.lane.b32.xlu1 %v5750_v29, %s4763_s20 }
 0x2f1   :  { %2780 = vrot.lane.b32.xlu1 %v5875_v39, %s4763_s20 }
 0x2f5   :  { %2788 = vrot.lane.b32.xlu1 %v5863_v40, %s4763_s20 }
 0x2f9   :  { %3937 = vrot.lane.b32.xlu1 %v8153_v31, %s4763_s20 }
 0x2fd   :  { %3945 = vrot.lane.b32.xlu1 %v8154_v22, %s4763_s20 }
 0x2ff   :  { %v6233_v35 = vpop.permute.xlu1 %2253 }
 0x300   :  { %8171 = vst [vmem:[#allocation168_spill] sm:$0xff] %v6233_v35 }
 0x301   :  { %4167 = vrot.lane.b32.xlu1 %v8155_v36, %s4763_s20  ;;  %v6181_v10 = vpop.permute.xlu0 %2249 }
 0x302   :  { %8157 = vst [vmem:[#allocation8_spill] sm:$0xff] %v6181_v10 }
 0x305   :  { %4175 = vrot.lane.b32.xlu1 %v8156_v46, %s4763_s20  ;;  %v6185_v16 = vpop.permute.xlu0 %2257 }
 0x306   :  { %8158 = vst [vmem:[#allocation22_spill] sm:$0xff] %v6185_v16 }
 0x309   :  { %2548 = vrot.lane.b32.xlu1 %v4872_v13, %s4763_s20  ;;  %v6189_v29 = vpop.permute.xlu0 %2265 }
 0x30a   :  { %8159 = vst [vmem:[#allocation31_spill] sm:$0xff] %v6189_v29  ;;  %v8180_v29 = vld [vmem:[#allocation23_spill] sm:$0xff] }
 0x30d   :  { %2556 = vrot.lane.b32.xlu1 %v5712_v26, %s4763_s20  ;;  %v6193_v40 = vpop.permute.xlu0 %2273 }
 0x30e   :  { %8160 = vst [vmem:[#allocation25_spill] sm:$0xff] %v6193_v40  ;;  %v8177_v40 = vld [vmem:[#allocation21_spill] sm:$0xff] }
 0x311   :  { %2778 = vrot.lane.b32.xlu1 %v5826_v11, %s4763_s20  ;;  %v6197_v39 = vpop.permute.xlu0 %2281 }
 0x312   :  { %8161 = vst [vmem:[#allocation9_spill] sm:$0xff] %v6197_v39 }
 0x315   :  { %2786 = vrot.lane.b32.xlu1 %v5815_v42, %s4763_s20  ;;  %v6201_v34 = vpop.permute.xlu0 %2289 }
 0x316   :  { %8162 = vst [vmem:[#allocation26_spill] sm:$0xff] %v6201_v34 }
 0x319   :  { %v6203_v15 = vpop.permute.xlu0 %2297 }
 0x31a   :  { %8163 = vst [vmem:[#allocation32_spill] sm:$0xff] %v6203_v15 }
 0x31d   :  { %v6205_v13 = vpop.permute.xlu0 %2318 }
 0x31e   :  { %8164 = vst [vmem:[#allocation28_spill] sm:$0xff] %v6205_v13 }
 0x321   :  { %v6207_v41 = vpop.permute.xlu0 %2322 }
 0x322   :  { %8165 = vst [vmem:[#allocation162_spill] sm:$0xff] %v6207_v41 }
 0x325   :  { %v6209_v62 = vpop.permute.xlu0 %2326 }
 0x326   :  { %8166 = vst [vmem:[#allocation163_spill] sm:$0xff] %v6209_v62  ;;  %v2342_v26 = vcombine.low %v6205_v13, %v6209_v62 }
 0x328   :  { %v6218_v42 = vrot.slane %v2342_v26, %v4971_v9  ;;  %v6237_v26 = vpop.permute.xlu1 %2261 }
 0x329   :  { %v6213_v0 = vpop.permute.xlu0 %2330  ;;  %8173 = vst [vmem:[#allocation17_spill] sm:$0xff] %v6237_v26  ;;  %v8182_v26 = vld [vmem:[#allocation29_spill] sm:$0xff] }
 0x32a   :  { %8167 = vst [vmem:[#allocation164_spill] sm:$0xff] %v6213_v0  ;;  %v2358_v11 = vcombine.low %v6207_v41, %v6213_v0  ;;  %8168 = vst [vmem:[#allocation165_spill] sm:$0xff] %v6218_v42 }
 0x32c   :  { %v6221_v28 = vrot.slane %v2358_v11, %v4971_v9  ;;  %v8174_v11 = vld [vmem:[#allocation20_spill] sm:$0xff] }
 0x32e   :  { %8169 = vst [vmem:[#allocation166_spill] sm:$0xff] %v6221_v28  ;;  %v2374_v18 = vcombine.low %v6218_v42, %v6221_v28 }
 0x330   :  { %v6228_v33 = vrot.slane %v2374_v18, %v5022_v55  ;;  %v6243_v18 = vpop.permute.xlu1 %2269 }
 0x331   :  { %8176 = vst [vmem:[#allocation20_spill] sm:$0xff] %v6243_v18  ;;  %v8184_v18 = vld [vmem:[#allocation24_spill] sm:$0xff] }
 0x332   :  { %8170 = vst [vmem:[#allocation167_spill] sm:$0xff] %v6228_v33  ;;  %v2406_v58 = vcombine.high %v6228_v33, %v8043_v21 }
 0x334   :  { %2479 = vrot.lane.b32.xlu0 %v2406_v58, %s4767_s24  ;;  %v6247_v15 = vpop.permute.xlu1 %2277  ;;  %v8179_v58 = vld [vmem:[#allocation18_spill] sm:$0xff] }
 0x335   :  { %8178 = vst [vmem:[#allocation27_spill] sm:$0xff] %v6247_v15 }
 0x338   :  { %3483 = vrot.lane.b32.xlu0 %v8172_v51, %s4760_s0  ;;  %v6253_v34 = vpop.permute.xlu1 %2285 }
 0x339   :  { %8181 = vst [vmem:[#allocation21_spill] sm:$0xff] %v6253_v34 }
 0x33c   :  { %3491 = vrot.lane.b32.xlu0 %v8174_v11, %s4760_s0  ;;  %v6257_v16 = vpop.permute.xlu1 %2293 }
 0x33d   :  { %8183 = vst [vmem:[#allocation18_spill] sm:$0xff] %v6257_v16 }
 0x340   :  { %3713 = vrot.lane.b32.xlu0 %v8175_v7, %s4760_s0  ;;  %v6263_v39 = vpop.permute.xlu1 %2301 }
 0x341   :  { %8185 = vst [vmem:[#allocation23_spill] sm:$0xff] %v6263_v39 }
 0x344   :  { %3721 = vrot.lane.b32.xlu0 %v8177_v40, %s4760_s0  ;;  %v6267_v35 = vpop.permute.xlu1 %2320 }
 0x348   :  { %3481 = vrot.lane.b32.xlu0 %v8179_v58, %s4760_s0  ;;  %v6273_v16 = vpop.permute.xlu1 %2324 }
 0x34c   :  { %3489 = vrot.lane.b32.xlu0 %v8180_v29, %s4760_s0  ;;  %v6277_v34 = vpop.permute.xlu1 %2328 }
 0x350   :  { %3711 = vrot.lane.b32.xlu0 %v8182_v26, %s4760_s0  ;;  %v6283_v39 = vpop.permute.xlu1 %2332 }
 0x354   :  { %3719 = vrot.lane.b32.xlu0 %v8184_v18, %s4760_s0  ;;  %v3480_v56 = vpop.permute.xlu1 %3479 }
 0x358   :  { %3943 = vrot.lane.b32.xlu0 %v8172_v51, %s4763_s20 }
 0x35c   :  { %3951 = vrot.lane.b32.xlu0 %v8174_v11, %s4763_s20 }
 0x360   :  { %4173 = vrot.lane.b32.xlu0 %v8175_v7, %s4763_s20 }
 0x364   :  { %4181 = vrot.lane.b32.xlu0 %v8177_v40, %s4763_s20 }
 0x368   :  { %2554 = vrot.lane.b32.xlu0 %v5747_v32, %s4763_s20  ;;  %v3488_v32 = vpop.permute.xlu1 %3487 }
 0x369   :  { %v3569_v24 = vcombine.low %v3480_v56, %v3488_v32  ;;  %v3570_v12 = vcombine.high %v3480_v56, %v3488_v32 }
 0x36b   :  { %v3577_v14 = vrot.slane %v3569_v24, %v4971_v9 }
 0x36c   :  { %2562 = vrot.lane.b32.xlu0 %v5738_v38, %s4763_s20  ;;  %v3710_v38 = vpop.permute.xlu1 %3709 }
 0x370   :  { %2784 = vrot.lane.b32.xlu0 %v5860_v1, %s4763_s20  ;;  %v3718_v1 = vpop.permute.xlu1 %3717 }
 0x371   :  { %v3799_v32 = vcombine.low %v3710_v38, %v3718_v1  ;;  %v3800_v50 = vcombine.high %v3710_v38, %v3718_v1 }
 0x373   :  { %v6332_v20 = vrot.slane %v3800_v50, %v4971_v9 }
 0x374   :  { %2792 = vrot.lane.b32.xlu0 %v5851_v63, %s4763_s20  ;;  %v3478_v63 = vpop.permute.xlu1 %3477 }
 0x378   :  { %3941 = vrot.lane.b32.xlu0 %v8179_v58, %s4763_s20  ;;  %v3486_v15 = vpop.permute.xlu1 %3485 }
 0x379   :  { %v3502_v61 = vcombine.high %v3478_v63, %v3486_v15 }
 0x37b   :  { %v6354_v23 = vrot.slane %v3502_v61, %v4971_v9 }
 0x37c   :  { %3949 = vrot.lane.b32.xlu0 %v8180_v29, %s4763_s20  ;;  %v6303_v6 = vpop.permute.xlu1 %3707 }
 0x380   :  { %4171 = vrot.lane.b32.xlu0 %v8182_v26, %s4763_s20  ;;  %v6305_v10 = vpop.permute.xlu1 %3715 }
 0x381   :  { %v3731_v61 = vcombine.low %v6303_v6, %v6305_v10 }
 0x384   :  { %4179 = vrot.lane.b32.xlu0 %v8184_v18, %s4763_s20  ;;  %v6309_v8 = vpop.permute.xlu1 %3939 }
 0x388   :  { %2552 = vrot.lane.b32.xlu0 %v5706_v47, %s4763_s20 }
 0x38c   :  { %2560 = vrot.lane.b32.xlu0 %v5697_v54, %s4763_s20  ;;  %v6311_v54 = vpop.permute.xlu1 %3947 }
 0x390   :  { %2782 = vrot.lane.b32.xlu0 %v5809_v2, %s4763_s20  ;;  %v6321_v25 = vpop.permute.xlu1 %4169 }
 0x394   :  { %2790 = vrot.lane.b32.xlu0 %v5794_v37, %s4763_s20  ;;  %v6315_v37 = vrot.slane %v3570_v12, %v4971_v9  ;;  %v6334_v30 = vpop.permute.xlu1 %4177 }
 0x398   :  { %v6346_v43 = vpop.permute.xlu1 %2550 }
 0x3a6   :  { %v6307_v44 = vpop.permute.xlu0 %2479 }
 0x3a7   :  { %8186 = vst [vmem:[#allocation29_spill] sm:$0xff] %v6307_v44 }
 0x3aa   :  { %v3484_v47 = vpop.permute.xlu0 %3483 }
 0x3ae   :  { %v3492_v57 = vpop.permute.xlu0 %3491 }
 0x3af   :  { %v3585_v19 = vcombine.low %v3484_v47, %v3492_v57  ;;  %v3586_v2 = vcombine.high %v3484_v47, %v3492_v57 }
 0x3b1   :  { %v3593_v4 = vrot.slane %v3585_v19, %v4971_v9  ;;  %v6319_v52 = vrot.slane %v3586_v2, %v4971_v9  ;;  %v3807_v2 = vrot.slane %v3799_v32, %v4971_v9 }
 0x3b2   :  { %v3714_v48 = vpop.permute.xlu0 %3713 }
 0x3b3   :  { %v3601_v3 = vcombine.low %v3577_v14, %v3593_v4  ;;  %v3602_v27 = vcombine.high %v3577_v14, %v3593_v4 }
 0x3b5   :  { %v6326_v57 = vrot.slane %v3601_v3, %v5022_v55 }
 0x3b6   :  { %v3722_v24 = vpop.permute.xlu0 %3721 }
 0x3b7   :  { %8187 = vst [vmem:[#allocation24_spill] sm:$0xff] %v6326_v57  ;;  %v3815_v12 = vcombine.low %v3714_v48, %v3722_v24  ;;  %v3816_v47 = vcombine.high %v3714_v48, %v3722_v24  ;;  %v3633_v19 = vcombine.high %v6326_v57, %v8043_v21  ;;  %v3501_v24 = vcombine.low %v3478_v63, %v3486_v15 }
 0x3b8   :  { %v6387_v48 = vrot.slane %v3731_v61, %v4971_v9 }
 0x3b9   :  { %v3823_v56 = vrot.slane %v3815_v12, %v4971_v9  ;;  %v6338_v38 = vrot.slane %v3816_v47, %v4971_v9  ;;  %3666 = vrot.lane.b32.xlu1 %v3633_v19, %s4767_s24  ;;  %v6351_v19 = vrot.slane %v3501_v24, %v4971_v9  ;;  %v6368_v24 = vrot.slane %v3602_v27, %v5022_v55 }
 0x3ba   :  { %v3482_v3 = vpop.permute.xlu0 %3481 }
 0x3bb   :  { %v3831_v1 = vcombine.low %v3807_v2, %v3823_v56  ;;  %v3832_v4 = vcombine.high %v3807_v2, %v3823_v56 }
 0x3bd   :  { %v6344_v32 = vrot.slane %v3831_v1, %v5022_v55  ;;  %v6382_v27 = vrot.slane %v3832_v4, %v5022_v55 }
 0x3be   :  { %v3490_v50 = vpop.permute.xlu0 %3489 }
 0x3bf   :  { %8188 = vst [vmem:[#allocation169_spill] sm:$0xff] %v6344_v32  ;;  %v3517_v12 = vcombine.low %v3482_v3, %v3490_v50  ;;  %v3518_v17 = vcombine.high %v3482_v3, %v3490_v50  ;;  %v3863_v47 = vcombine.high %v6344_v32, %v8043_v21  ;;  %v6374_v50 = vpop.permute.xlu1 %2558 }
 0x3c1   :  { %v6357_v15 = vrot.slane %v3517_v12, %v4971_v9  ;;  %v6360_v63 = vrot.slane %v3518_v17, %v4971_v9  ;;  %3896 = vrot.lane.b32.xlu0 %v3863_v47, %s4767_s24  ;;  %v3732_v17 = vcombine.high %v6303_v6, %v6305_v10 }
 0x3c2   :  { %v3712_v14 = vpop.permute.xlu0 %3711 }
 0x3c3   :  { %v3533_v3 = vcombine.low %v6351_v19, %v6357_v15  ;;  %v6390_v6 = vrot.slane %v3732_v17, %v4971_v9  ;;  %v6401_v4 = vpop.permute.xlu1 %2780 }
 0x3c5   :  { %3670 = vrot.lane.b32.xlu0 %v6368_v24, %s4764_s21  ;;  %v6379_v56 = vrot.slane %v3533_v3, %v5022_v55 }
 0x3c6   :  { %v3720_v2 = vpop.permute.xlu0 %3719 }
 0x3c7   :  { %8189 = vst [vmem:[#allocation170_spill] sm:$0xff] %v6379_v56  ;;  %v3747_v12 = vcombine.low %v3712_v14, %v3720_v2  ;;  %v3748_v47 = vcombine.high %v3712_v14, %v3720_v2  ;;  %v3565_v1 = vcombine.high %v6379_v56, %v8043_v21  ;;  %v4029_v2 = vcombine.low %v6309_v8, %v6311_v54  ;;  %v2789_v32 = vpop.permute.xlu1 %2788 }
 0x3c9   :  { %v6393_v10 = vrot.slane %v3747_v12, %v4971_v9  ;;  %v6396_v3 = vrot.slane %v3748_v47, %v4971_v9  ;;  %3900 = vrot.lane.b32.xlu0 %v6382_v27, %s4764_s21  ;;  %3638 = vrot.lane.b32.xlu1 %v3565_v1, %s4767_s24  ;;  %v4030_v12 = vcombine.high %v6309_v8, %v6311_v54 }
 0x3ca   :  { %v3944_v14 = vpop.permute.xlu0 %3943  ;;  %v6417_v44 = vrot.slane %v4029_v2, %v4971_v9  ;;  %v4260_v2 = vcombine.high %v6321_v25, %v6334_v30 }
 0x3cb   :  { %v3763_v61 = vcombine.low %v6387_v48, %v6393_v10  ;;  %v6420_v17 = vrot.slane %v4030_v12, %v4971_v9 }
 0x3cd   :  { %v6412_v47 = vrot.slane %v3763_v61, %v5022_v55  ;;  %v4259_v61 = vcombine.low %v6321_v25, %v6334_v30 }
 0x3ce   :  { %v3952_v45 = vpop.permute.xlu0 %3951 }
 0x3cf   :  { %8190 = vst [vmem:[#allocation171_spill] sm:$0xff] %v6412_v47  ;;  %v4045_v1 = vcombine.low %v3944_v14, %v3952_v45  ;;  %v4046_v59 = vcombine.high %v3944_v14, %v3952_v45  ;;  %v3795_v33 = vcombine.high %v6412_v47, %v8043_v21  ;;  %v6445_v13 = vrot.slane %v4259_v61, %v4971_v9 }
 0x3d0   :  { %v6448_v14 = vrot.slane %v4260_v2, %v4971_v9  ;;  %v3105_v2 = vcombine.low %v8149_v60, %v8150_v49 }
 0x3d1   :  { %v6423_v57 = vrot.slane %v4045_v1, %v4971_v9  ;;  %v6426_v8 = vrot.slane %v4046_v59, %v4971_v9  ;;  %3868 = vrot.lane.b32.xlu1 %v3795_v33, %s4767_s24  ;;  %v6440_v1 = vpop.permute.xlu1 %3937 }
 0x3d2   :  { %v4174_v54 = vpop.permute.xlu0 %4173  ;;  %v6478_v60 = vrot.slane %v3105_v2, %v4971_v9 }
 0x3d3   :  { %v4061_v45 = vcombine.low %v6417_v44, %v6423_v57 }
 0x3d5   :  { %v6438_v12 = vrot.slane %v4061_v45, %v5022_v55 }
 0x3d6   :  { %v4182_v59 = vpop.permute.xlu0 %4181 }
 0x3d7   :  { %8191 = vst [vmem:[#allocation172_spill] sm:$0xff] %v6438_v12  ;;  %v4275_v33 = vcombine.low %v4174_v54, %v4182_v59  ;;  %v4276_v47 = vcombine.high %v4174_v54, %v4182_v59  ;;  %v4093_v56 = vcombine.high %v6438_v12, %v8043_v21  ;;  %v3121_v54 = vcombine.low %v8172_v51, %v8174_v11 }
 0x3d8   :  { %v2640_v59 = vcombine.low %v6346_v43, %v6374_v50 }
 0x3d9   :  { %v6451_v62 = vrot.slane %v4275_v33, %v4971_v9  ;;  %v6454_v30 = vrot.slane %v4276_v47, %v4971_v9  ;;  %4126 = vrot.lane.b32.xlu1 %v4093_v56, %s4767_s24  ;;  %v2641_v47 = vcombine.high %v6346_v43, %v6374_v50  ;;  %v3946_v56 = vpop.permute.xlu1 %3945  ;;  %v6473_v11 = vrot.slane %v3121_v54, %v4971_v9 }
 0x3da   :  { %v2555_v25 = vpop.permute.xlu0 %2554  ;;  %v6481_v49 = vrot.slane %v2640_v59, %v4971_v9 }
 0x3db   :  { %v4291_v45 = vcombine.low %v6445_v13, %v6451_v62  ;;  %v6484_v43 = vrot.slane %v2641_v47, %v4971_v9 }
 0x3dd   :  { %v6470_v33 = vrot.slane %v4291_v45, %v5022_v55  ;;  %v6495_v2 = vpop.permute.xlu1 %4167 }
 0x3de   :  { %v2563_v51 = vpop.permute.xlu0 %2562 }
 0x3df   :  { %8192 = vst [vmem:[#allocation173_spill] sm:$0xff] %v6470_v33  ;;  %v2656_v12 = vcombine.low %v2555_v25, %v2563_v51  ;;  %v2657_v41 = vcombine.high %v2555_v25, %v2563_v51  ;;  %v4323_v61 = vcombine.high %v6470_v33, %v8043_v21  ;;  %v3355_v25 = vcombine.low %v8175_v7, %v8177_v40 }
 0x3e0   :  { %v2871_v51 = vcombine.high %v6401_v4, %v2789_v32 }
 0x3e1   :  { %v6487_v50 = vrot.slane %v2656_v12, %v4971_v9  ;;  %v6490_v54 = vrot.slane %v2657_v41, %v4971_v9  ;;  %4356 = vrot.lane.b32.xlu0 %v4323_v61, %s4767_s24  ;;  %v3137_v12 = vcombine.low %v6478_v60, %v6473_v11  ;;  %v3339_v41 = vcombine.low %v8151_v5, %v8152_v53 }
 0x3e2   :  { %v2785_v45 = vpop.permute.xlu0 %2784  ;;  %v2870_v61 = vcombine.low %v6401_v4, %v2789_v32  ;;  %v6511_v7 = vrot.slane %v3355_v25, %v4971_v9  ;;  %v6525_v32 = vrot.slane %v2871_v51, %v4971_v9  ;;  %v4176_v4 = vpop.permute.xlu1 %4175 }
 0x3e3   :  { %v2672_v59 = vcombine.low %v6481_v49, %v6487_v50  ;;  %v6516_v42 = vrot.slane %v3137_v12, %v5022_v55  ;;  %v6519_v5 = vrot.slane %v3339_v41, %v4971_v9 }
 0x3e4   :  { %v6522_v53 = vrot.slane %v2870_v61, %v4971_v9  ;;  %8195 = vst [vmem:[#allocation176_spill] sm:$0xff] %v6525_v32 }
 0x3e5   :  { %v6508_v40 = vrot.slane %v2672_v59, %v5022_v55  ;;  %8194 = vst [vmem:[#allocation175_spill] sm:$0xff] %v6516_v42  ;;  %v3371_v12 = vcombine.low %v6519_v5, %v6511_v7 }
 0x3e6   :  { %v2793_v33 = vpop.permute.xlu0 %2792  ;;  %v2549_v61 = vpop.permute.xlu1 %2548 }
 0x3e7   :  { %8193 = vst [vmem:[#allocation174_spill] sm:$0xff] %v6508_v40  ;;  %v2886_v0 = vcombine.low %v2785_v45, %v2793_v33  ;;  %v2887_v28 = vcombine.high %v2785_v45, %v2793_v33  ;;  %v2704_v47 = vcombine.high %v6508_v40, %v8043_v21  ;;  %v3534_v45 = vcombine.high %v6351_v19, %v6357_v15 }
 0x3e8   :  { %v6554_v40 = vrot.slane %v3371_v12, %v5022_v55 }
 0x3e9   :  { %v6528_v25 = vrot.slane %v2886_v0, %v4971_v9  ;;  %v6531_v33 = vrot.slane %v2887_v28, %v4971_v9  ;;  %2737 = vrot.lane.b32.xlu1 %v2704_v47, %s4767_s24  ;;  %v3169_v0 = vcombine.high %v6516_v42, %v8043_v21  ;;  %v3961_v28 = vcombine.low %v6440_v1, %v3946_v56 }
 0x3ea   :  { %v3942_v59 = vpop.permute.xlu0 %3941  ;;  %v3962_v47 = vcombine.high %v6440_v1, %v3946_v56  ;;  %v6551_v51 = vrot.slane %v3534_v45, %v5022_v55  ;;  %8198 = vst [vmem:[#allocation179_spill] sm:$0xff] %v6554_v40  ;;  %v3764_v42 = vcombine.high %v6387_v48, %v6393_v10 }
 0x3eb   :  { %8196 = vst [vmem:[#allocation177_spill] sm:$0xff] %v6531_v33  ;;  %v2902_v41 = vcombine.low %v6522_v53, %v6528_v25  ;;  %v6561_v56 = vrot.slane %v3961_v28, %v4971_v9  ;;  %v4192_v28 = vcombine.high %v6495_v2, %v4176_v4 }
 0x3ed   :  { %3202 = vrot.lane.b32.xlu1 %v3169_v0, %s4767_s24  ;;  %v6548_v19 = vrot.slane %v2902_v41, %v5022_v55  ;;  %v6564_v41 = vrot.slane %v3962_v47, %v4971_v9  ;;  %v6580_v0 = vrot.slane %v3764_v42, %v5022_v55  ;;  %v2557_v47 = vpop.permute.xlu1 %2556 }
 0x3ee   :  { %v3950_v15 = vpop.permute.xlu0 %3949 }
 0x3ef   :  { %8197 = vst [vmem:[#allocation178_spill] sm:$0xff] %v6548_v19  ;;  %v3977_v32 = vcombine.low %v3942_v59, %v3950_v15  ;;  %v3978_v33 = vcombine.high %v3942_v59, %v3950_v15  ;;  %v2934_v1 = vcombine.high %v6548_v19, %v8043_v21  ;;  %8199 = vst [vmem:[#allocation180_spill] sm:$0xff] %v6564_v41 }
 0x3f0   :  { %v3634_v19 = vcombine.high %v6368_v24, %v8043_v21  ;;  %v4062_v24 = vcombine.high %v6417_v44, %v6423_v57  ;;  %v4292_v57 = vcombine.high %v6445_v13, %v6451_v62  ;;  %v3053_v13 = vcombine.low %v8179_v58, %v8180_v29 }
 0x3f1   :  { %v6567_v45 = vrot.slane %v3977_v32, %v4971_v9  ;;  %v6570_v12 = vrot.slane %v3978_v33, %v4971_v9  ;;  %3642 = vrot.lane.b32.xlu1 %v6551_v51, %s4764_s21  ;;  %2967 = vrot.lane.b32.xlu0 %v2934_v1, %s4767_s24  ;;  %v3403_v32 = vcombine.high %v6554_v40, %v8043_v21 }
 0x3f2   :  { %v4172_v48 = vpop.permute.xlu0 %4171  ;;  %v4191_v33 = vcombine.low %v6495_v2, %v4176_v4  ;;  %v6600_v4 = vrot.slane %v4192_v28, %v4971_v9  ;;  %v6623_v44 = vrot.slane %v4062_v24, %v5022_v55  ;;  %v2673_v62 = vcombine.high %v6481_v49, %v6487_v50 }
 0x3f3   :  { %8200 = vst [vmem:[#allocation181_spill] sm:$0xff] %v6570_v12  ;;  %v3993_v10 = vcombine.low %v6561_v56, %v6567_v45  ;;  %v6663_v58 = vrot.slane %v3053_v13, %v4971_v9  ;;  %v3287_v49 = vcombine.low %v8182_v26, %v8184_v18  ;;  %v3271_v13 = vcombine.low %v8155_v36, %v8156_v46 }
 0x3f4   :  { %v6597_v2 = vrot.slane %v4191_v33, %v4971_v9  ;;  %v3138_v36 = vcombine.high %v6478_v60, %v6473_v11 }
 0x3f5   :  { %3872 = vrot.lane.b32.xlu1 %v6580_v0, %s4764_s21  ;;  %3436 = vrot.lane.b32.xlu0 %v3403_v32, %s4767_s24  ;;  %v6590_v15 = vrot.slane %v3993_v10, %v5022_v55 }
 0x3f6   :  { %v4180_v1 = vpop.permute.xlu0 %4179  ;;  %v3152_v11 = vrot.slane %v3138_v36, %v5022_v55 }
 0x3f7   :  { %8201 = vst [vmem:[#allocation182_spill] sm:$0xff] %v6590_v15  ;;  %v4207_v59 = vcombine.low %v4172_v48, %v4180_v1  ;;  %v4208_v42 = vcombine.high %v4172_v48, %v4180_v1  ;;  %v4025_v40 = vcombine.high %v6590_v15, %v8043_v21  ;;  %v2779_v1 = vpop.permute.xlu1 %2778  ;;  %v2573_v15 = vcombine.high %v2549_v61, %v2557_v47 }
 0x3f9   :  { %v6603_v32 = vrot.slane %v4207_v59, %v4971_v9  ;;  %v6606_v10 = vrot.slane %v4208_v42, %v4971_v9  ;;  %3674 = vrot.lane.b32.xlu0 %v3634_v19, %s4768_s25  ;;  %4098 = vrot.lane.b32.xlu1 %v4025_v40, %s4767_s24  ;;  %v3864_v59 = vcombine.high %v6382_v27, %v8043_v21 }
 0x3fa   :  { %v2553_v48 = vpop.permute.xlu0 %2552  ;;  %v2572_v42 = vcombine.low %v2549_v61, %v2557_v47  ;;  %v6633_v61 = vrot.slane %v2573_v15, %v4971_v9 }
 0x3fb   :  { %v4223_v33 = vcombine.low %v6597_v2, %v6603_v32  ;;  %v2787_v47 = vpop.permute.xlu1 %2786 }
 0x3fc   :  { %v6630_v27 = vrot.slane %v2572_v42, %v4971_v9  ;;  %v2803_v42 = vcombine.high %v2779_v1, %v2787_v47 }
 0x3fd   :  { %3904 = vrot.lane.b32.xlu0 %v3864_v59, %s4768_s25  ;;  %v6620_v40 = vrot.slane %v4223_v33, %v5022_v55  ;;  %v3037_v59 = vcombine.low %v8153_v31, %v8154_v22  ;;  %v2903_v31 = vcombine.high %v6522_v53, %v6528_v25  ;;  %v6691_v25 = vrot.slane %v3287_v49, %v4971_v9 }
 0x3fe   :  { %v2561_v19 = vpop.permute.xlu0 %2560  ;;  %v6681_v18 = vrot.slane %v2803_v42, %v4971_v9  ;;  %v3372_v49 = vcombine.high %v6519_v5, %v6511_v7 }
 0x3ff   :  { %v2588_v41 = vcombine.low %v2553_v48, %v2561_v19  ;;  %v2589_v12 = vcombine.high %v2553_v48, %v2561_v19  ;;  %v4255_v28 = vcombine.high %v6620_v40, %v8043_v21  ;;  %v6668_v19 = vrot.slane %v2673_v62, %v5022_v55 }
 0x400   :  { %8203 = vst [vmem:[#allocation184_spill] sm:$0xff] %v6681_v18 }
 0x401   :  { %v6636_v33 = vrot.slane %v2588_v41, %v4971_v9  ;;  %v6639_v24 = vrot.slane %v2589_v12, %v4971_v9  ;;  %4130 = vrot.lane.b32.xlu0 %v6623_v44, %s4764_s21  ;;  %4328 = vrot.lane.b32.xlu1 %v4255_v28, %s4767_s24  ;;  %v6653_v12 = vrot.slane %v4292_v57, %v5022_v55 }
 0x402   :  { %v2783_v15 = vpop.permute.xlu0 %2782  ;;  %v2802_v28 = vcombine.low %v2779_v1, %v2787_v47  ;;  %v6675_v47 = vrot.slane %v3037_v59, %v4971_v9 }
 0x403   :  { %v2604_v48 = vcombine.low %v6630_v27, %v6636_v33 }
 0x404   :  { %v2810_v26 = vrot.slane %v2802_v28, %v4971_v9  ;;  %v3069_v59 = vcombine.low %v6675_v47, %v6663_v58  ;;  %v3279_v28 = vrot.slane %v3271_v13, %v4971_v9 }
 0x405   :  { %4360 = vrot.lane.b32.xlu0 %v6653_v12, %s4764_s21  ;;  %v6660_v29 = vrot.slane %v2604_v48, %v5022_v55  ;;  %v2917_v48 = vrot.slane %v2903_v31, %v5022_v55 }
 0x406   :  { %v2791_v50 = vpop.permute.xlu0 %2790  ;;  %v3303_v31 = vcombine.low %v3279_v28, %v6691_v25 }
 0x407   :  { %8202 = vst [vmem:[#allocation183_spill] sm:$0xff] %v6660_v29  ;;  %v2818_v22 = vcombine.low %v2783_v15, %v2791_v50  ;;  %v2819_v1 = vcombine.high %v2783_v15, %v2791_v50  ;;  %v2636_v57 = vcombine.high %v6660_v29, %v8043_v21  ;;  %v6711_v50 = vrot.slane %v3069_v59, %v5022_v55 }
 0x408   :  { %v6722_v5 = vrot.slane %v3303_v31, %v5022_v55 }
 0x409   :  { %v2826_v62 = vrot.slane %v2818_v22, %v4971_v9  ;;  %v6685_v53 = vrot.slane %v2819_v1, %v4971_v9  ;;  %2741 = vrot.lane.b32.xlu0 %v6668_v19, %s4764_s21  ;;  %2709 = vrot.lane.b32.xlu1 %v2636_v57, %s4767_s24  ;;  %8206 = vst [vmem:[#allocation187_spill] sm:$0xff] %v6711_v50 }
 0x40a   :  { %v3617_v22 = vcombine.low %v6315_v37, %v6319_v52  ;;  %v3386_v1 = vrot.slane %v3372_v49, %v5022_v55  ;;  %v3101_v7 = vcombine.high %v6711_v50, %v8043_v21  ;;  %8207 = vst [vmem:[#allocation188_spill] sm:$0xff] %v6722_v5  ;;  %v3847_v57 = vcombine.low %v6332_v20, %v6338_v38 }
 0x40b   :  { %8204 = vst [vmem:[#allocation185_spill] sm:$0xff] %v6685_v53  ;;  %v2834_v46 = vcombine.low %v2810_v26, %v2826_v62  ;;  %v3335_v36 = vcombine.high %v6722_v5, %v8043_v21  ;;  %v3566_v49 = vcombine.high %v6551_v51, %v8043_v21 }
 0x40c   :  { %v3625_v13 = vrot.slane %v3617_v22, %v5022_v55  ;;  %v3855_v59 = vrot.slane %v3847_v57, %v5022_v55  ;;  %v3994_v22 = vcombine.high %v6561_v56, %v6567_v45  ;;  %v3796_v57 = vcombine.high %v6580_v0, %v8043_v21 }
 0x40d   :  { %2971 = vrot.lane.b32.xlu0 %v2917_v48, %s4764_s21  ;;  %v6703_v42 = vrot.slane %v2834_v46, %v5022_v55  ;;  %v2426_v46 = vcombine.low %v6273_v16, %v6283_v39  ;;  %v4324_v56 = vcombine.high %v6653_v12, %v8043_v21  ;;  %v2835_v0 = vcombine.high %v2810_v26, %v2826_v62 }
 0x40e   :  { %v4008_v45 = vrot.slane %v3994_v22, %v5022_v55  ;;  %v2705_v12 = vcombine.high %v6668_v19, %v8043_v21  ;;  %v3304_v26 = vcombine.high %v3279_v28, %v6691_v25  ;;  %v3549_v62 = vcombine.low %v6354_v23, %v6360_v63 }
 0x40f   :  { %8205 = vst [vmem:[#allocation186_spill] sm:$0xff] %v6703_v42  ;;  %v2866_v60 = vcombine.high %v6703_v42, %v8043_v21  ;;  %v2434_v31 = vrot.slane %v2426_v46, %v4971_v9  ;;  %v2605_v46 = vcombine.high %v6630_v27, %v6636_v33  ;;  %v3070_v27 = vcombine.high %v6675_v47, %v6663_v58 }
 0x410   :  { %v3318_v58 = vrot.slane %v3304_v26, %v5022_v55  ;;  %v2935_v47 = vcombine.high %v2917_v48, %v8043_v21  ;;  %v3779_v19 = vcombine.low %v6390_v6, %v6396_v3  ;;  %v3557_v25 = vrot.slane %v3549_v62, %v5022_v55 }
 0x411   :  { %3206 = vrot.lane.b32.xlu0 %v3152_v11, %s4764_s21  ;;  %2939 = vrot.lane.b32.xlu1 %v2866_v60, %s4767_s24  ;;  %v2410_v60 = vcombine.low %v6267_v35, %v6277_v34  ;;  %v3084_v33 = vrot.slane %v3070_v27, %v5022_v55  ;;  %v3170_v28 = vcombine.high %v3152_v11, %v8043_v21 }
 0x412   :  { %v3787_v22 = vrot.slane %v3779_v19, %v5022_v55  ;;  %v4026_v48 = vcombine.high %v4008_v45, %v8043_v21  ;;  %v8211_v19 = vld [vmem:[#allocation37_spill] sm:$0xff]  ;;  %v3567_v41 = vcombine.high %v3557_v25, %v8043_v21 }
 0x413   :  { %v2418_v51 = vrot.slane %v2410_v60, %v4971_v9 }
 0x414   :  { %v3797_v5 = vcombine.high %v3787_v22, %v8043_v21 }
 0x415   :  { %3440 = vrot.lane.b32.xlu0 %v3386_v1, %s4764_s21  ;;  %3174 = vrot.lane.b32.xlu1 %v3101_v7, %s4767_s24  ;;  %v4094_v7 = vcombine.high %v6623_v44, %v8043_v21  ;;  %v2619_v44 = vrot.slane %v2605_v46, %v5022_v55  ;;  %v2443_v11 = vcombine.high %v2418_v51, %v2434_v31 }
 0x417   :  { %v2637_v62 = vcombine.high %v2619_v44, %v8043_v21 }
 0x419   :  { %3678 = vrot.lane.b32.xlu0 %v3625_v13, %s4765_s22  ;;  %3408 = vrot.lane.b32.xlu1 %v3335_v36, %s4767_s24  ;;  %v2442_v36 = vcombine.low %v2418_v51, %v2434_v31  ;;  %v8208_v51 = vld [vmem:[#allocation177_spill] sm:$0xff] }
 0x41d   :  { %3908 = vrot.lane.b32.xlu0 %v3855_v59, %s4765_s22  ;;  %3646 = vrot.lane.b32.xlu1 %v3566_v49, %s4768_s25  ;;  %v4224_v49 = vcombine.high %v6597_v2, %v6603_v32  ;;  %v2849_v2 = vrot.slane %v2835_v0, %v5022_v55 }
 0x41f   :  { %v4238_v60 = vrot.slane %v4224_v49, %v5022_v55  ;;  %v4077_v49 = vcombine.low %v6420_v17, %v6426_v8 }
 0x421   :  { %4134 = vrot.lane.b32.xlu0 %v4094_v7, %s4768_s25  ;;  %3876 = vrot.lane.b32.xlu1 %v3796_v57, %s4768_s25  ;;  %v6764_v7 = vrot.slane %v2442_v36, %v5022_v55  ;;  %v3404_v57 = vcombine.high %v3386_v1, %v8043_v21  ;;  %v3635_v36 = vcombine.high %v3625_v13, %v8043_v21 }
 0x422   :  { %v4256_v46 = vcombine.high %v4238_v60, %v8043_v21  ;;  %v3865_v1 = vcombine.high %v3855_v59, %v8043_v21  ;;  %v2688_v13 = vcombine.low %v6484_v43, %v6490_v54  ;;  %v4085_v31 = vrot.slane %v4077_v49, %v5022_v55  ;;  %v8209_v59 = vld [vmem:[#allocation176_spill] sm:$0xff]  ;;  %v8213_v49 = vld [vmem:[#allocation38_spill] sm:$0xff] }
 0x423   :  { %v2474_v32 = vcombine.high %v6764_v7, %v8043_v21  ;;  %v2918_v0 = vcombine.low %v8209_v59, %v8208_v51 }
 0x425   :  { %4364 = vrot.lane.b32.xlu0 %v4324_v56, %s4768_s25  ;;  %4102 = vrot.lane.b32.xlu1 %v4008_v45, %s4764_s21  ;;  %v4307_v56 = vcombine.low %v6448_v14, %v6454_v30  ;;  %v2457_v45 = vrot.slane %v2443_v11, %v5022_v55  ;;  %v2926_v26 = vrot.slane %v2918_v0, %v5022_v55  ;;  %v8212_v11 = vld [vmem:[#allocation34_spill] sm:$0xff] }
 0x429   :  { %2713 = vrot.lane.b32.xlu0 %v2619_v44, %s4764_s21  ;;  %4332 = vrot.lane.b32.xlu1 %v4238_v60, %s4764_s21  ;;  %v2696_v60 = vrot.slane %v2688_v13, %v5022_v55  ;;  %v3102_v13 = vcombine.high %v3084_v33, %v8043_v21 }
 0x42b   :  { %v6821_v27 = vpop.permute.xlu1 %3666 }
 0x42d   :  { %2943 = vrot.lane.b32.xlu0 %v2849_v2, %s4764_s21  ;;  %2507 = vrot.lane.b32.xlu1 %v2474_v32, %s4767_s24  ;;  %v4315_v32 = vrot.slane %v4307_v56, %v5022_v55 }
 0x431   :  { %3178 = vrot.lane.b32.xlu0 %v3084_v33, %s4764_s21  ;;  %2745 = vrot.lane.b32.xlu1 %v2705_v12, %s4768_s25 }
 0x433   :  { %v6823_v12 = vpop.permute.xlu0 %3896 }
 0x435   :  { %3412 = vrot.lane.b32.xlu0 %v3318_v58, %s4764_s21  ;;  %2975 = vrot.lane.b32.xlu1 %v2935_v47, %s4768_s25  ;;  %v8210_v47 = vld [vmem:[#allocation33_spill] sm:$0xff] }
 0x439   :  { %3650 = vrot.lane.b32.xlu0 %v3557_v25, %s4765_s22  ;;  %3210 = vrot.lane.b32.xlu1 %v3170_v28, %s4768_s25  ;;  %v3153_v28 = vcombine.low %v8211_v19, %v8210_v47 }
 0x43d   :  { %3880 = vrot.lane.b32.xlu0 %v3787_v22, %s4765_s22  ;;  %3444 = vrot.lane.b32.xlu1 %v3404_v57, %s4768_s25  ;;  %v6831_v57 = vpop.permute.xlu1 %3638 }
 0x441   :  { %4106 = vrot.lane.b32.xlu0 %v4026_v48, %s4768_s25  ;;  %3682 = vrot.lane.b32.xlu1 %v3635_v36, %s4769_s26  ;;  %v3161_v48 = vrot.slane %v3153_v28, %v5022_v55  ;;  %v2867_v36 = vcombine.high %v2849_v2, %v8043_v21 }
 0x443   :  { %v6841_v44 = vpop.permute.xlu1 %3868 }
 0x445   :  { %4336 = vrot.lane.b32.xlu0 %v4256_v46, %s4768_s25  ;;  %3912 = vrot.lane.b32.xlu1 %v3865_v1, %s4769_s26  ;;  %v3387_v46 = vcombine.low %v8213_v49, %v8212_v11  ;;  %v6837_v1 = vpop.permute.xlu0 %3670 }
 0x447   :  { %v3395_v56 = vrot.slane %v3387_v46, %v5022_v55 }
 0x449   :  { %2511 = vrot.lane.b32.xlu0 %v2457_v45, %s4764_s21  ;;  %4138 = vrot.lane.b32.xlu1 %v4085_v31, %s4765_s22  ;;  %v6847_v2 = vpop.permute.xlu0 %3900 }
 0x44b   :  { %v6849_v0 = vpop.permute.xlu1 %4126 }
 0x44d   :  { %2749 = vrot.lane.b32.xlu0 %v2696_v60, %s4765_s22  ;;  %4368 = vrot.lane.b32.xlu1 %v4315_v32, %s4765_s22 }
 0x451   :  { %2979 = vrot.lane.b32.xlu0 %v2926_v26, %s4765_s22  ;;  %2717 = vrot.lane.b32.xlu1 %v2637_v62, %s4768_s25  ;;  %v8214_v62 = vcombine.high %v6315_v37, %v6319_v52  ;;  %v8218_v52 = vld [vmem:[#allocation181_spill] sm:$0xff]  ;;  %v8219_v37 = vld [vmem:[#allocation180_spill] sm:$0xff] }
 0x453   :  { %v3632_v28 = vrot.slane %v8214_v62, %v5022_v55  ;;  %v6858_v33 = vpop.permute.xlu0 %4356 }
 0x454   :  { %8215 = vst [vmem:[#allocation177_spill] sm:$0xff] %v6858_v33 }
 0x455   :  { %3214 = vrot.lane.b32.xlu0 %v3161_v48, %s4765_s22  ;;  %2947 = vrot.lane.b32.xlu1 %v2867_v36, %s4768_s25  ;;  %v3336_v36 = vcombine.high %v3318_v58, %v8043_v21  ;;  %v4009_v58 = vcombine.low %v8219_v37, %v8218_v52 }
 0x457   :  { %v4017_v25 = vrot.slane %v4009_v58, %v5022_v55 }
 0x459   :  { %3448 = vrot.lane.b32.xlu0 %v3395_v56, %s4765_s22  ;;  %3182 = vrot.lane.b32.xlu1 %v3102_v13, %s4768_s25  ;;  %v8217_v13 = vcombine.high %v6332_v20, %v6338_v38  ;;  %v4239_v20 = vcombine.low %v6600_v4, %v6606_v10 }
 0x45b   :  { %v6860_v46 = vpop.permute.xlu1 %2737  ;;  %v3862_v15 = vrot.slane %v8217_v13, %v5022_v55  ;;  %v2475_v13 = vcombine.high %v2457_v45, %v8043_v21  ;;  %v2850_v45 = vcombine.low %v6681_v18, %v6685_v53  ;;  %v8230_v18 = vld [vmem:[#allocation40_spill] sm:$0xff] }
 0x45c   :  { %8216 = vst [vmem:[#allocation176_spill] sm:$0xff] %v6860_v46  ;;  %v8228_v46 = vld [vmem:[#allocation39_spill] sm:$0xff] }
 0x45d   :  { %3686 = vrot.lane.b32.xlu0 %v3632_v28, %s4766_s23  ;;  %3416 = vrot.lane.b32.xlu1 %v3336_v36, %s4768_s25  ;;  %v4095_v36 = vcombine.high %v4085_v31, %v8043_v21 }
 0x45f   :  { %v6875_v50 = vpop.permute.xlu1 %3202 }
 0x460   :  { %8221 = vst [vmem:[#allocation37_spill] sm:$0xff] %v6875_v50 }
 0x461   :  { %3916 = vrot.lane.b32.xlu0 %v3862_v15, %s4766_s23  ;;  %3654 = vrot.lane.b32.xlu1 %v3567_v41, %s4769_s26  ;;  %v4325_v41 = vcombine.high %v4315_v32, %v8043_v21  ;;  %v2620_v32 = vcombine.low %v6633_v61, %v6639_v24 }
 0x463   :  { %v6871_v62 = vpop.permute.xlu0 %2967  ;;  %v6887_v22 = vpop.permute.xlu1 %3642 }
 0x464   :  { %8220 = vst [vmem:[#allocation33_spill] sm:$0xff] %v6871_v62  ;;  %v8227_v62 = vld [vmem:[#allocation35_spill] sm:$0xff] }
 0x465   :  { %4142 = vrot.lane.b32.xlu0 %v4095_v36, %s4769_s26  ;;  %3884 = vrot.lane.b32.xlu1 %v3797_v5, %s4769_s26  ;;  %v4247_v5 = vrot.slane %v4239_v20, %v5022_v55  ;;  %v2706_v36 = vcombine.high %v2696_v60, %v8043_v21  ;;  %v2628_v60 = vrot.slane %v2620_v32, %v5022_v55 }
 0x466   :  { %v3085_v33 = vcombine.low %v8228_v46, %v8227_v62  ;;  %v3636_v62 = vcombine.high %v3632_v28, %v8043_v21 }
 0x467   :  { %v6881_v38 = vpop.permute.xlu0 %3436  ;;  %v6904_v29 = vpop.permute.xlu1 %3872 }
 0x468   :  { %8222 = vst [vmem:[#allocation34_spill] sm:$0xff] %v6881_v38  ;;  %v8224_v38 = vld [vmem:[#allocation166_spill] sm:$0xff]  ;;  %v3093_v53 = vrot.slane %v3085_v33, %v5022_v55 }
 0x469   :  { %4372 = vrot.lane.b32.xlu0 %v4325_v41, %s4769_s26  ;;  %4110 = vrot.lane.b32.xlu1 %v4017_v25, %s4765_s22  ;;  %v8223_v41 = vld [vmem:[#allocation165_spill] sm:$0xff] }
 0x46a   :  { %v8225_v42 = vcombine.high %v8223_v41, %v8224_v38  ;;  %v2858_v41 = vrot.slane %v2850_v45, %v5022_v55 }
 0x46b   :  { %v6889_v31 = vpop.permute.xlu0 %3674 }
 0x46c   :  { %v2389_v50 = vrot.slane %v8225_v42, %v5022_v55  ;;  %v6916_v42 = vpop.permute.xlu1 %4098 }
 0x46d   :  { %2515 = vrot.lane.b32.xlu0 %v2475_v13, %s4768_s25  ;;  %4340 = vrot.lane.b32.xlu1 %v4247_v5, %s4765_s22  ;;  %v2936_v13 = vcombine.high %v2926_v26, %v8043_v21 }
 0x46f   :  { %v6897_v58 = vpop.permute.xlu0 %3904 }
 0x471   :  { %2753 = vrot.lane.b32.xlu0 %v2706_v36, %s4769_s26  ;;  %2483 = vrot.lane.b32.xlu1 %v2389_v50, %s4764_s21  ;;  %v3171_v36 = vcombine.high %v3161_v48, %v8043_v21 }
 0x473   :  { %v6910_v20 = vpop.permute.xlu0 %4130  ;;  %v6926_v26 = vpop.permute.xlu1 %4328 }
 0x475   :  { %2983 = vrot.lane.b32.xlu0 %v2936_v13, %s4769_s26  ;;  %2721 = vrot.lane.b32.xlu1 %v2628_v60, %s4765_s22  ;;  %v3405_v13 = vcombine.high %v3395_v56, %v8043_v21  ;;  %v2427_v56 = vcombine.high %v6273_v16, %v6283_v39 }
 0x477   :  { %v6918_v38 = vpop.permute.xlu0 %4360  ;;  %v6960_v16 = vrot.slane %v2427_v56, %v4971_v9 }
 0x478   :  { %8226 = vst [vmem:[#allocation38_spill] sm:$0xff] %v6918_v38  ;;  %v8229_v38 = vld [vmem:[#allocation36_spill] sm:$0xff] }
 0x479   :  { %3218 = vrot.lane.b32.xlu0 %v3171_v36, %s4769_s26  ;;  %2951 = vrot.lane.b32.xlu1 %v2858_v41, %s4765_s22  ;;  %v3319_v48 = vcombine.low %v8230_v18, %v8229_v38  ;;  %v3866_v38 = vcombine.high %v3862_v15, %v8043_v21  ;;  %v8231_v18 = vcombine.high %v6354_v23, %v6360_v63 }
 0x47a   :  { %v8234_v15 = vcombine.high %v6420_v17, %v6426_v8  ;;  %v8237_v17 = vcombine.high %v6448_v14, %v6454_v30 }
 0x47b   :  { %v6928_v32 = vpop.permute.xlu0 %2741  ;;  %v6936_v45 = vpop.permute.xlu1 %2709  ;;  %v3327_v46 = vrot.slane %v3319_v48, %v5022_v55  ;;  %v3564_v28 = vrot.slane %v8231_v18, %v5022_v55  ;;  %v2411_v48 = vcombine.high %v6267_v35, %v6277_v34  ;;  %v8235_v34 = vcombine.high %v6390_v6, %v6396_v3 }
 0x47c   :  { %v4092_v23 = vrot.slane %v8234_v15, %v5022_v55  ;;  %v4322_v6 = vrot.slane %v8237_v17, %v5022_v55  ;;  %v4027_v3 = vcombine.high %v4017_v25, %v8043_v21  ;;  %v8238_v25 = vcombine.high %v6484_v43, %v6490_v54 }
 0x47d   :  { %3452 = vrot.lane.b32.xlu0 %v3405_v13, %s4769_s26  ;;  %3186 = vrot.lane.b32.xlu1 %v3093_v53, %s4765_s22  ;;  %v3794_v35 = vrot.slane %v8235_v34, %v5022_v55  ;;  %v6975_v63 = vrot.slane %v2411_v48, %v4971_v9  ;;  %v4257_v34 = vcombine.high %v4247_v5, %v8043_v21 }
 0x47e   :  { %v7007_v17 = vrot.slane %v8238_v25, %v5022_v55  ;;  %v2638_v43 = vcombine.high %v2628_v60, %v8043_v21  ;;  %v8240_v25 = vcombine.high %v8211_v19, %v8210_v47  ;;  %v3103_v47 = vcombine.high %v3093_v53, %v8043_v21 }
 0x47f   :  { %v6938_v36 = vpop.permute.xlu0 %2971  ;;  %v2458_v18 = vcombine.low %v6975_v63, %v6960_v16 }
 0x481   :  { %3690 = vrot.lane.b32.xlu0 %v3636_v62, %s4770_s27  ;;  %3420 = vrot.lane.b32.xlu1 %v3327_v46, %s4765_s22  ;;  %v6995_v15 = vrot.slane %v2458_v18, %v5022_v55 }
 0x483   :  { %v6946_v33 = vpop.permute.xlu1 %2939  ;;  %v6948_v13 = vpop.permute.xlu0 %3206 }
 0x485   :  { %3920 = vrot.lane.b32.xlu0 %v3866_v38, %s4770_s27  ;;  %3658 = vrot.lane.b32.xlu1 %v3564_v28, %s4766_s23 }
 0x487   :  { %v6962_v39 = vpop.permute.xlu1 %3174  ;;  %v6964_v62 = vpop.permute.xlu0 %3440 }
 0x488   :  { %8232 = vst [vmem:[#allocation181_spill] sm:$0xff] %v6962_v39  ;;  %8233 = vst [vmem:[#allocation180_spill] sm:$0xff] %v6964_v62  ;;  %v4096_v39 = vcombine.high %v4092_v23, %v8043_v21 }
 0x489   :  { %4146 = vrot.lane.b32.xlu0 %v4092_v23, %s4766_s23  ;;  %3888 = vrot.lane.b32.xlu1 %v3794_v35, %s4766_s23 }
 0x48b   :  { %v6981_v38 = vpop.permute.xlu1 %3408  ;;  %v6983_v56 = vpop.permute.xlu0 %3678 }
 0x48c   :  { %8236 = vst [vmem:[#allocation165_spill] sm:$0xff] %v6981_v38 }
 0x48d   :  { %4376 = vrot.lane.b32.xlu0 %v4322_v6, %s4766_s23  ;;  %4114 = vrot.lane.b32.xlu1 %v4027_v3, %s4769_s26  ;;  %v2407_v3 = vcombine.high %v2389_v50, %v8043_v21 }
 0x48f   :  { %v3647_v8 = vpop.permute.xlu1 %3646  ;;  %v6992_v48 = vpop.permute.xlu0 %3908 }
 0x491   :  { %2519 = vrot.lane.b32.xlu0 %v6995_v15, %s4765_s22  ;;  %4344 = vrot.lane.b32.xlu1 %v4257_v34, %s4769_s26  ;;  %v8239_v34 = vcombine.high %v8209_v59, %v8208_v51  ;;  %v2868_v51 = vcombine.high %v2858_v41, %v8043_v21 }
 0x493   :  { %v3877_v14 = vpop.permute.xlu1 %3876  ;;  %v7001_v30 = vpop.permute.xlu0 %4134  ;;  %v7021_v38 = vrot.slane %v8239_v34, %v5022_v55  ;;  %v8241_v34 = vcombine.high %v8213_v49, %v8212_v11  ;;  %v8243_v11 = vld [vmem:[#allocation164_spill] sm:$0xff]  ;;  %v8244_v49 = vld [vmem:[#allocation162_spill] sm:$0xff] }
 0x494   :  { %v2359_v53 = vcombine.high %v8244_v49, %v8243_v11 }
 0x495   :  { %2757 = vrot.lane.b32.xlu0 %v7007_v17, %s4766_s23  ;;  %2487 = vrot.lane.b32.xlu1 %v2407_v3, %s4768_s25  ;;  %v7035_v3 = vrot.slane %v8240_v25, %v5022_v55  ;;  %v3337_v25 = vcombine.high %v3327_v46, %v8043_v21  ;;  %v8245_v46 = vld [vmem:[#allocation163_spill] sm:$0xff] }
 0x496   :  { %v7081_v23 = vrot.slane %v2359_v53, %v4971_v9  ;;  %v8249_v53 = vld [vmem:[#allocation171_spill] sm:$0xff] }
 0x497   :  { %v7013_v5 = vpop.permute.xlu1 %4102  ;;  %v7015_v18 = vpop.permute.xlu0 %4364 }
 0x499   :  { %2987 = vrot.lane.b32.xlu0 %v7021_v38, %s4766_s23  ;;  %2725 = vrot.lane.b32.xlu1 %v2638_v43, %s4769_s26  ;;  %v7049_v43 = vrot.slane %v8241_v34, %v5022_v55 }
 0x49b   :  { %v7027_v54 = vpop.permute.xlu1 %4332  ;;  %v7029_v50 = vpop.permute.xlu0 %2713 }
 0x49d   :  { %3222 = vrot.lane.b32.xlu0 %v7035_v3, %s4766_s23  ;;  %2955 = vrot.lane.b32.xlu1 %v2868_v51, %s4769_s26  ;;  %v3798_v51 = vcombine.high %v3794_v35, %v8043_v21 }
 0x49f   :  { %v7041_v59 = vpop.permute.xlu1 %2507  ;;  %v7043_v60 = vpop.permute.xlu0 %2943 }
 0x4a1   :  { %3456 = vrot.lane.b32.xlu0 %v7049_v43, %s4766_s23  ;;  %3190 = vrot.lane.b32.xlu1 %v3103_v47, %s4769_s26  ;;  %v3568_v47 = vcombine.high %v3564_v28, %v8043_v21 }
 0x4a3   :  { %v7055_v19 = vpop.permute.xlu1 %2745  ;;  %v7057_v41 = vpop.permute.xlu0 %3178 }
 0x4a4   :  { %8242 = vst [vmem:[#allocation166_spill] sm:$0xff] %v7057_v41  ;;  %v8246_v41 = vld [vmem:[#allocation28_spill] sm:$0xff] }
 0x4a5   :  { %3424 = vrot.lane.b32.xlu1 %v3337_v25, %s4769_s26  ;;  %3892 = vrot.lane.b32.xlu0 %v3798_v51, %s4770_s27  ;;  %v2343_v35 = vcombine.high %v8246_v41, %v8245_v46  ;;  %v8247_v25 = vld [vmem:[#allocation170_spill] sm:$0xff] }
 0x4a6   :  { %v3693_v51 = vsel %vm448_vm5, %v8247_v25, %v6831_v57  ;;  %v8248_v57 = vcombine.high %v8219_v37, %v8218_v52 }
 0x4a7   :  { %v7065_v34 = vpop.permute.xlu1 %2975  ;;  %v7067_v62 = vpop.permute.xlu0 %3412  ;;  %v3694_v28 = vsel %vm450_vm6, %v3693_v51, %v6887_v22  ;;  %v7097_v22 = vrot.slane %v2343_v35, %v4971_v9  ;;  %v2476_v51 = vcombine.high %v6995_v15, %v8043_v21 }
 0x4a8   :  { %v3695_v11 = vsel %vm452_vm7, %v3694_v28, %v3647_v8  ;;  %v3923_v8 = vsel %vm448_vm5, %v8249_v53, %v6841_v44  ;;  %v8250_v44 = vcombine.high %v6600_v4, %v6606_v10  ;;  %v8251_v28 = vld [vmem:[#allocation24_spill] sm:$0xff]  ;;  %v8252_v4 = vld [vmem:[#allocation182_spill] sm:$0xff]  ;;  %v2707_v53 = vcombine.high %v7007_v17, %v8043_v21 }
 0x4a9   :  { %3662 = vrot.lane.b32.xlu1 %v3568_v47, %s4770_s27  ;;  %4150 = vrot.lane.b32.xlu0 %v4096_v39, %s4770_s27  ;;  %v7090_v47 = vrot.slane %v8248_v57, %v5022_v55  ;;  %v4326_v39 = vcombine.high %v4322_v6, %v8043_v21  ;;  %v3924_v52 = vsel %vm450_vm6, %v3923_v8, %v6904_v29  ;;  %v8253_v8 = vld [vmem:[#allocation169_spill] sm:$0xff] }
 0x4aa   :  { %v2390_v37 = vcombine.low %v7097_v22, %v7081_v23  ;;  %v3925_v6 = vsel %vm452_vm7, %v3924_v52, %v3877_v14  ;;  %v7116_v35 = vrot.slane %v8250_v44, %v5022_v55  ;;  %v3700_v29 = vsel %vm448_vm5, %v8251_v28, %v6821_v27 }
 0x4ab   :  { %v7084_v49 = vpop.permute.xlu1 %3210  ;;  %v3651_v41 = vpop.permute.xlu0 %3650  ;;  %v3701_v14 = vsel %vm450_vm6, %v3700_v29, %v6837_v1  ;;  %v4153_v10 = vsel %vm448_vm5, %v8252_v4, %v6916_v42  ;;  %v3930_v42 = vsel %vm448_vm5, %v8253_v8, %v6823_v12  ;;  %v4383_v12 = vsel %vm448_vm5, %v6620_v40, %v6926_v26  ;;  %v8255_v26 = vld [vmem:[#allocation172_spill] sm:$0xff] }
 0x4ac   :  { %v7094_v46 = vsel %vm454_vm8, %v3695_v11, %v3651_v41  ;;  %v3702_v15 = vsel %vm452_vm7, %v3701_v14, %v6889_v31  ;;  %v4154_v41 = vsel %vm450_vm6, %v4153_v10, %v7013_v5  ;;  %v3931_v5 = vsel %vm450_vm6, %v3930_v42, %v6847_v2  ;;  %v8256_v29 = vld [vmem:[#allocation184_spill] sm:$0xff] }
 0x4ad   :  { %4118 = vrot.lane.b32.xlu1 %v7090_v47, %s4766_s23  ;;  %4380 = vrot.lane.b32.xlu0 %v4326_v39, %s4770_s27  ;;  %v3703_v27 = vsel %vm454_vm8, %v3702_v15, %v6983_v56  ;;  %v7141_v39 = vrot.slane %v2390_v37, %v5022_v55  ;;  %v3932_v17 = vsel %vm452_vm7, %v3931_v5, %v6897_v58 }
 0x4ae   :  { %v3933_v52 = vsel %vm454_vm8, %v3932_v17, %v6992_v48  ;;  %v4384_v37 = vsel %vm450_vm6, %v4383_v12, %v7027_v54  ;;  %v2937_v58 = vcombine.high %v7021_v38, %v8043_v21  ;;  %v4160_v48 = vsel %vm448_vm5, %v8255_v26, %v6849_v0  ;;  %v8257_v0 = vld [vmem:[#allocation185_spill] sm:$0xff]  ;;  %v8264_v12 = vld [vmem:[#allocation39_spill] sm:$0xff] }
 0x4af   :  { %v7110_v25 = vpop.permute.xlu1 %3444  ;;  %v3881_v9 = vpop.permute.xlu0 %3880  ;;  %v2541_v38 = vsel %vm448_vm5, %v6764_v7, %v7041_v59  ;;  %v8258_v14 = vcombine.high %v8256_v29, %v8257_v0  ;;  %v3172_v10 = vcombine.high %v7035_v3, %v8043_v21  ;;  %v8261_v59 = vld [vmem:[#allocation176_spill] sm:$0xff]  ;;  %v8269_v26 = vld [vmem:[#allocation183_spill] sm:$0xff] }
 0x4b0   :  { %v7124_v11 = vsel %vm454_vm8, %v3925_v6, %v3881_v9  ;;  %v8254_v9 = vcombine.high %v6633_v61, %v6639_v24  ;;  %v4161_v61 = vsel %vm450_vm6, %v4160_v48, %v6910_v20  ;;  %v2764_v48 = vsel %vm448_vm5, %v8269_v26, %v6936_v45 }
 0x4b1   :  { %4348 = vrot.lane.b32.xlu1 %v7116_v35, %s4766_s23  ;;  %2523 = vrot.lane.b32.xlu0 %v2476_v51, %s4769_s26  ;;  %v4162_v24 = vsel %vm452_vm7, %v4161_v61, %v7001_v30  ;;  %v2865_v4 = vrot.slane %v8258_v14, %v5022_v55  ;;  %v8259_v30 = vld [vmem:[#allocation177_spill] sm:$0xff]  ;;  %v8270_v61 = vld [vmem:[#allocation40_spill] sm:$0xff]  ;;  %v2765_v29 = vsel %vm450_vm6, %v2764_v48, %v7029_v50 }
 0x4b2   :  { %v7172_v44 = vrot.slane %v8254_v9, %v5022_v55  ;;  %v4258_v45 = vcombine.high %v7116_v35, %v8043_v21 }
 0x4b3   :  { %v3683_v1 = vpop.permute.xlu1 %3682  ;;  %v4107_v57 = vpop.permute.xlu0 %4106 }
 0x4b4   :  { %v7149_v31 = vsel %vm456_vm9, %v3703_v27, %v3683_v1  ;;  %v7152_v56 = vsel %vm452_vm7, %v4154_v41, %v4107_v57  ;;  %v8260_v27 = vld [vmem:[#allocation173_spill] sm:$0xff]  ;;  %v8262_v41 = vld [vmem:[#allocation174_spill] sm:$0xff] }
 0x4b5   :  { %2491 = vrot.lane.b32.xlu1 %v7141_v39, %s4765_s22  ;;  %2761 = vrot.lane.b32.xlu0 %v2707_v53, %s4770_s27  ;;  %v4390_v7 = vsel %vm448_vm5, %v8260_v27, %v8259_v30  ;;  %v2771_v1 = vsel %vm448_vm5, %v8262_v41, %v8261_v59  ;;  %v8263_v57 = vld [vmem:[#allocation38_spill] sm:$0xff]  ;;  %v8273_v27 = vld [vmem:[#allocation37_spill] sm:$0xff] }
 0x4b6   :  { %v4391_v3 = vsel %vm450_vm6, %v4390_v7, %v8263_v57  ;;  %v2772_v53 = vsel %vm450_vm6, %v2771_v1, %v6928_v32  ;;  %v8274_v7 = vld [vmem:[#allocation175_spill] sm:$0xff]  ;;  %v4028_v57 = vcombine.high %v7090_v47, %v8043_v21 }
 0x4b7   :  { %v3913_v6 = vpop.permute.xlu1 %3912  ;;  %v4337_v2 = vpop.permute.xlu0 %4336  ;;  %v4392_v8 = vsel %vm452_vm7, %v4391_v3, %v7015_v18  ;;  %v2773_v42 = vsel %vm452_vm7, %v2772_v53, %v7055_v19  ;;  %v8267_v18 = vld [vmem:[#allocation33_spill] sm:$0xff] }
 0x4b8   :  { %v7177_v51 = vsel %vm456_vm9, %v3933_v52, %v3913_v6  ;;  %v7180_v40 = vsel %vm452_vm7, %v4384_v37, %v4337_v2  ;;  %v8265_v52 = vld [vmem:[#allocation35_spill] sm:$0xff]  ;;  %v3406_v2 = vcombine.high %v7049_v43, %v8043_v21 }
 0x4b9   :  { %2729 = vrot.lane.b32.xlu1 %v7172_v44, %s4766_s23  ;;  %2991 = vrot.lane.b32.xlu0 %v2937_v58, %s4770_s27  ;;  %v8266_v37 = vcombine.high %v8264_v12, %v8265_v52  ;;  %v8268_v58 = vld [vmem:[#allocation178_spill] sm:$0xff] }
 0x4ba   :  { %v3001_v19 = vsel %vm448_vm5, %v8268_v58, %v8267_v18  ;;  %v8281_v12 = vld [vmem:[#allocation166_spill] sm:$0xff]  ;;  %v2408_v58 = vcombine.high %v7141_v39, %v8043_v21 }
 0x4bb   :  { %v4139_v54 = vpop.permute.xlu1 %4138  ;;  %v2512_v28 = vpop.permute.xlu0 %2511  ;;  %v3100_v6 = vrot.slane %v8266_v37, %v5022_v55  ;;  %v3002_v43 = vsel %vm450_vm6, %v3001_v19, %v6938_v36  ;;  %v2869_v19 = vcombine.high %v2865_v4, %v8043_v21 }
 0x4bc   :  { %v7202_v15 = vsel %vm454_vm8, %v4162_v24, %v4139_v54  ;;  %v7205_v20 = vsel %vm450_vm6, %v2541_v38, %v2512_v28  ;;  %v8271_v24 = vld [vmem:[#allocation36_spill] sm:$0xff]  ;;  %v2459_v28 = vcombine.high %v6975_v63, %v6960_v16  ;;  %v3003_v0 = vsel %vm452_vm7, %v3002_v43, %v7065_v34  ;;  %v8275_v63 = vld [vmem:[#allocation186_spill] sm:$0xff]  ;;  %v8282_v43 = vld [vmem:[#allocation165_spill] sm:$0xff] }
 0x4bd   :  { %2959 = vrot.lane.b32.xlu1 %v2865_v4, %s4766_s23  ;;  %3226 = vrot.lane.b32.xlu0 %v3172_v10, %s4770_s27  ;;  %v8272_v38 = vcombine.high %v8270_v61, %v8271_v24  ;;  %v3236_v16 = vsel %vm448_vm5, %v8274_v7, %v8273_v27  ;;  %v2994_v50 = vsel %vm448_vm5, %v8275_v63, %v6946_v33  ;;  %v8283_v61 = vld [vmem:[#allocation188_spill] sm:$0xff] }
 0x4be   :  { %v3237_v34 = vsel %vm450_vm6, %v3236_v16, %v6948_v13  ;;  %v2995_v35 = vsel %vm450_vm6, %v2994_v50, %v7043_v60  ;;  %v2473_v3 = vrot.slane %v2459_v28, %v5022_v55  ;;  %v8276_v13 = vld [vmem:[#allocation34_spill] sm:$0xff]  ;;  %v3463_v24 = vsel %vm448_vm5, %v8283_v61, %v8282_v43  ;;  %v8285_v43 = vld [vmem:[#allocation167_spill] sm:$0xff] }
 0x4bf   :  { %v4369_v5 = vpop.permute.xlu1 %4368  ;;  %v2750_v17 = vpop.permute.xlu0 %2749  ;;  %v3334_v54 = vrot.slane %v8272_v38, %v5022_v55  ;;  %v3238_v59 = vsel %vm452_vm7, %v3237_v34, %v7084_v49  ;;  %v8278_v49 = vld [vmem:[#allocation181_spill] sm:$0xff]  ;;  %v2639_v4 = vcombine.high %v7172_v44, %v8043_v21 }
 0x4c0   :  { %v7230_v9 = vsel %vm454_vm8, %v4392_v8, %v4369_v5  ;;  %v7233_v32 = vsel %vm454_vm8, %v2773_v42, %v2750_v17  ;;  %v8277_v8 = vld [vmem:[#allocation179_spill] sm:$0xff]  ;;  %v8280_v5 = vld [vmem:[#allocation180_spill] sm:$0xff]  ;;  %v2477_v44 = vcombine.high %v2473_v3, %v8043_v21 }
 0x4c1   :  { %3194 = vrot.lane.b32.xlu1 %v3100_v6, %s4766_s23  ;;  %3460 = vrot.lane.b32.xlu0 %v3406_v2, %s4770_s27  ;;  %v3470_v60 = vsel %vm448_vm5, %v8277_v8, %v8276_v13  ;;  %v8279_v42 = vld [vmem:[#allocation187_spill] sm:$0xff]  ;;  %v3338_v28 = vcombine.high %v3334_v54, %v8043_v21 }
 0x4c2   :  { %v3229_v47 = vsel %vm448_vm5, %v8279_v42, %v8278_v49  ;;  %v3471_v17 = vsel %vm450_vm6, %v3470_v60, %v8280_v5 }
 0x4c3   :  { %v2718_v14 = vpop.permute.xlu1 %2717  ;;  %v2980_v10 = vpop.permute.xlu0 %2979  ;;  %v3230_v52 = vsel %vm450_vm6, %v3229_v47, %v8281_v12  ;;  %v3472_v37 = vsel %vm452_vm7, %v3471_v17, %v7110_v25  ;;  %v3464_v25 = vsel %vm450_vm6, %v3463_v24, %v7067_v62 }
 0x4c4   :  { %v7258_v36 = vsel %vm452_vm7, %v2765_v29, %v2718_v14  ;;  %v7261_v30 = vsel %vm454_vm8, %v3003_v0, %v2980_v10  ;;  %v2391_v14 = vcombine.high %v7097_v22, %v7081_v23  ;;  %v4625_v22 = vld [vmem:[%s7873_s2] sm:$0xff] }
 0x4c5   :  { %3428 = vrot.lane.b32.xlu1 %v3334_v54, %s4766_s23  ;;  %4352 = vrot.lane.b32.xlu0 %v4258_v45, %s4770_s27  ;;  %v3104_v45 = vcombine.high %v3100_v6, %v8043_v21 }
 0x4c6   :  { %v2405_v23 = vrot.slane %v2391_v14, %v5022_v55 }
 0x4c7   :  { %v2948_v41 = vpop.permute.xlu1 %2947  ;;  %v3215_v1 = vpop.permute.xlu0 %3214 }
 0x4c8   :  { %v7281_v53 = vsel %vm452_vm7, %v2995_v35, %v2948_v41  ;;  %v7284_v33 = vsel %vm454_vm8, %v3238_v59, %v3215_v1  ;;  %v2409_v50 = vcombine.high %v2405_v23, %v8043_v21 }
 0x4c9   :  { %4122 = vrot.lane.b32.xlu1 %v4028_v57, %s4770_s27  ;;  %2527 = vrot.lane.b32.xlu0 %v2473_v3, %s4766_s23 }
 0x4cb   :  { %v3183_v2 = vpop.permute.xlu1 %3182  ;;  %v3449_v18 = vpop.permute.xlu0 %3448 }
 0x4cc   :  { %v3231_v26 = vsel %vm452_vm7, %v3230_v52, %v3183_v2  ;;  %v3473_v48 = vsel %vm454_vm8, %v3472_v37, %v3449_v18 }
 0x4cd   :  { %2495 = vrot.lane.b32.xlu1 %v2408_v58, %s4769_s26  ;;  %2963 = vrot.lane.b32.xlu0 %v2869_v19, %s4770_s27 }
 0x4cf   :  { %v3417_v38 = vpop.permute.xlu1 %3416  ;;  %v3687_v39 = vpop.permute.xlu0 %3686 }
 0x4d0   :  { %v3465_v29 = vsel %vm452_vm7, %v3464_v25, %v3417_v38  ;;  %v3705_v0 = vsel %vm458_vm10, %v7149_v31, %v3687_v39 }
 0x4d1   :  { %2733 = vrot.lane.b32.xlu1 %v2639_v4, %s4770_s27  ;;  %3432 = vrot.lane.b32.xlu0 %v3338_v28, %s4770_s27 }
 0x4d3   :  { %v3655_v62 = vpop.permute.xlu1 %3654  ;;  %v3917_v10 = vpop.permute.xlu0 %3916 }
 0x4d4   :  { %v3697_v54 = vsel %vm456_vm9, %v7094_v46, %v3655_v62  ;;  %v7328_v27 = vsel %vm458_vm10, %v7177_v51, %v3917_v10  ;;  %v4771_v51 = vmov 0  }
 0x4d5   :  { %3198 = vrot.lane.b32.xlu1 %v3104_v45, %s4770_s27  ;;  %2531 = vrot.lane.b32.xlu0 %v2477_v44, %s4770_s27  ;;  %v8286_v44 = vld [vmem:[#allocation96_spill] sm:$0xff] }
 0x4d6   :  { %4710 = vset.pattern.permute.xlu0 %v4771_v51  ;;  %v8288_v51 = vld [vmem:[#allocation78_spill] sm:$0xff] }
 0x4d7   :  { %v3885_v31 = vpop.permute.xlu1 %3884  ;;  %v4143_v7 = vpop.permute.xlu0 %4142 }
 0x4d8   :  { %v3927_v6 = vsel %vm456_vm9, %v7124_v11, %v3885_v31  ;;  %v4164_v46 = vsel %vm456_vm9, %v7202_v15, %v4143_v7 }
 0x4d9   :  { %2499 = vrot.lane.b32.xlu1 %v2405_v23, %s4766_s23  ;;  %4628 = vperm.xlu0 %4710, %v4625_v22  }
 0x4db   :  { %v4111_v16 = vpop.permute.xlu1 %4110  ;;  %v4373_v63 = vpop.permute.xlu0 %4372 }
 0x4dc   :  { %v7344_v55 = vsel %vm454_vm8, %v7152_v56, %v4111_v16  ;;  %v4394_v34 = vsel %vm456_vm9, %v7230_v9, %v4373_v63  ;;  %v8289_v63 = vld [vmem:[#allocation53_spill] sm:$0xff] }
 0x4dd   :  { %2503 = vrot.lane.b32.xlu1 %v2409_v50, %s4770_s27  ;;  %v8290_v50 = vld [vmem:[#allocation15_spill] sm:$0xff] }
 0x4df   :  { %v4341_v11 = vpop.permute.xlu1 %4340  ;;  %v2516_v15 = vpop.permute.xlu0 %2515 }
 0x4e0   :  { %v7351_v35 = vsel %vm454_vm8, %v7180_v40, %v4341_v11  ;;  %v2543_v59 = vsel %vm452_vm7, %v7205_v20, %v2516_v15  ;;  %v449_v11 = vsel %vm448_vm5, %v8290_v50, %v8289_v63  ;;  %v8291_v15 = vld [vmem:[#allocation98_spill] sm:$0xff]  ;;  %v8306_v63 = vld [vmem:[#allocation19_spill] sm:$0xff] }
 0x4e3   :  { %v2484_v41 = vpop.permute.xlu1 %2483  ;;  %v2754_v21 = vpop.permute.xlu0 %2753 }
 0x4e4   :  { %v7357_v56 = vsel %vm456_vm9, %v7233_v32, %v2754_v21 }
 0x4e7   :  { %v2722_v1 = vpop.permute.xlu1 %2721  ;;  %v2984_v57 = vpop.permute.xlu0 %2983 }
 0x4e8   :  { %v7361_v9 = vsel %vm454_vm8, %v7258_v36, %v2722_v1  ;;  %v7365_v3 = vsel %vm456_vm9, %v7261_v30, %v2984_v57  ;;  %v8292_v1 = vld [vmem:[#allocation54_spill] sm:$0xff]  ;;  %v8293_v57 = vld [vmem:[#allocation16_spill] sm:$0xff] }
 0x4eb   :  { %v2952_v40 = vpop.permute.xlu1 %2951  ;;  %v3219_v13 = vpop.permute.xlu0 %3218 }
 0x4ec   :  { %v7369_v20 = vsel %vm454_vm8, %v7281_v53, %v2952_v40  ;;  %v7373_v32 = vsel %vm456_vm9, %v7284_v33, %v3219_v13  ;;  %v462_v40 = vsel %vm448_vm5, %v8293_v57, %v8292_v1  ;;  %v8310_v57 = vld [vmem:[#allocation57_spill] sm:$0xff] }
 0x4ef   :  { %v3187_v8 = vpop.permute.xlu1 %3186  ;;  %v3453_v60 = vpop.permute.xlu0 %3452 }
 0x4f0   :  { %v7376_v49 = vsel %vm454_vm8, %v3231_v26, %v3187_v8  ;;  %v7379_v36 = vsel %vm456_vm9, %v3473_v48, %v3453_v60  ;;  %v8284_v48 = vld [vmem:[#allocation29_spill] sm:$0xff]  ;;  %v8294_v8 = vld [vmem:[#allocation95_spill] sm:$0xff] }
 0x4f1   :  { %v2534_v61 = vsel %vm448_vm5, %v8285_v43, %v8284_v48  ;;  %v8295_v60 = vld [vmem:[#allocation69_spill] sm:$0xff]  ;;  %v8300_v43 = vld [vmem:[#allocation100_spill] sm:$0xff] }
 0x4f2   :  { %v2535_v24 = vsel %vm450_vm6, %v2534_v61, %v2484_v41 }
 0x4f3   :  { %v3421_v30 = vpop.permute.xlu1 %3420  ;;  %v3691_v42 = vpop.permute.xlu0 %3690 }
 0x4f4   :  { %v7382_v47 = vsel %vm454_vm8, %v3465_v29, %v3421_v30  ;;  %v7385_v53 = vsel %vm460_vm11, %v3705_v0, %v3691_v42  ;;  %v899_v30 = vsel %vm448_vm5, %v8295_v60, %v8294_v8  ;;  %v8296_v42 = vld [vmem:[#allocation42_spill] sm:$0xff]  ;;  %v8312_v60 = vld [vmem:[#allocation47_spill] sm:$0xff] }
 0x4f7   :  { %v3659_v5 = vpop.permute.xlu1 %3658  ;;  %v7387_v33 = vpop.permute.xlu0 %3920 }
 0x4f8   :  { %v7390_v17 = vsel %vm458_vm10, %v3697_v54, %v3659_v5  ;;  %v8287_v54 = vld [vmem:[#allocation70_spill] sm:$0xff]  ;;  %v451_v5 = vsel %vm450_vm6, %v449_v11, %v8296_v42  ;;  %v8307_v11 = vld [vmem:[#allocation97_spill] sm:$0xff] }
 0x4f9   :  { %v906_v31 = vsel %vm448_vm5, %v8287_v54, %v8286_v44  ;;  %v8301_v44 = vld [vmem:[#allocation56_spill] sm:$0xff]  ;;  %v8313_v42 = vld [vmem:[#allocation102_spill] sm:$0xff] }
 0x4fa   :  { %v907_v16 = vsel %vm450_vm6, %v906_v31, %v8288_v51  ;;  %v8302_v31 = vld [vmem:[#allocation62_spill] sm:$0xff] }
 0x4fb   :  { %v3889_v12 = vpop.permute.xlu1 %3888  ;;  %v4147_v52 = vpop.permute.xlu0 %4146 }
 0x4fc   :  { %v7393_v37 = vsel %vm458_vm10, %v3927_v6, %v3889_v12  ;;  %v4165_v7 = vsel %vm458_vm10, %v4164_v46, %v4147_v52  ;;  %v8297_v12 = vld [vmem:[#allocation81_spill] sm:$0xff]  ;;  %v8298_v52 = vld [vmem:[#allocation55_spill] sm:$0xff] }
 0x4ff   :  { %v7395_v2 = vpop.permute.xlu1 %4114  ;;  %v4377_v18 = vpop.permute.xlu0 %4376 }
 0x500   :  { %v4395_v46 = vsel %vm458_vm10, %v4394_v34, %v4377_v18  ;;  %v453_v18 = vsel %vm452_vm7, %v451_v5, %v8298_v52  ;;  %v8314_v52 = vld [vmem:[#allocation58_spill] sm:$0xff] }
 0x503   :  { %v7397_v58 = vpop.permute.xlu1 %4344  ;;  %v2520_v19 = vpop.permute.xlu0 %2519 }
 0x504   :  { %v7400_v26 = vsel %vm454_vm8, %v2543_v59, %v2520_v19  ;;  %v908_v59 = vsel %vm452_vm7, %v907_v16, %v8291_v15  ;;  %v8299_v19 = vld [vmem:[#allocation41_spill] sm:$0xff] }
 0x505   :  { %v909_v34 = vsel %vm454_vm8, %v908_v59, %v8297_v12  ;;  %v463_v48 = vsel %vm450_vm6, %v462_v40, %v8299_v19  ;;  %v8305_v16 = vld [vmem:[#allocation61_spill] sm:$0xff]  ;;  %v8308_v59 = vld [vmem:[#allocation44_spill] sm:$0xff] }
 0x506   :  { %v910_v61 = vsel %vm456_vm9, %v909_v34, %v8300_v43  ;;  %v464_v54 = vsel %vm452_vm7, %v463_v48, %v8301_v44  ;;  %v661_v50 = vsel %vm448_vm5, %v8306_v63, %v8305_v16  ;;  %v8315_v19 = vld [vmem:[#allocation48_spill] sm:$0xff] }
 0x507   :  { %v2488_v25 = vpop.permute.xlu1 %2487  ;;  %v7406_v38 = vpop.permute.xlu0 %2757  ;;  %v662_v48 = vsel %vm450_vm6, %v661_v50, %v8315_v19  ;;  %v8316_v43 = vld [vmem:[#allocation64_spill] sm:$0xff]  ;;  %v8329_v19 = vld [vmem:[#allocation50_spill] sm:$0xff] }
 0x508   :  { %v7409_v39 = vsel %vm452_vm7, %v2535_v24, %v2488_v25  ;;  %v8317_v44 = vld [vmem:[#allocation80_spill] sm:$0xff] }
 0x50b   :  { %v7411_v4 = vpop.permute.xlu1 %2725  ;;  %v7413_v28 = vpop.permute.xlu0 %2987 }
 0x50f   :  { %v7415_v29 = vpop.permute.xlu1 %2955  ;;  %v7417_v0 = vpop.permute.xlu0 %3222 }
 0x513   :  { %v7419_v14 = vpop.permute.xlu1 %3190  ;;  %v7421_v62 = vpop.permute.xlu0 %3456 }
 0x517   :  { %v7423_v10 = vpop.permute.xlu1 %3424  ;;  %v7425_v45 = vpop.permute.xlu0 %3892 }
 0x51b   :  { %v7431_v23 = vpop.permute.xlu1 %3662  ;;  %v4151_v22 = vpop.permute.xlu0 %4150 }
 0x51c   :  { %v4166_v6 = vsel %vm460_vm11, %v4165_v7, %v4151_v22  ;;  %v8303_v7 = vld [vmem:[#allocation30_spill] sm:$0xff] }
 0x51d   :  { %4681 = vmatprep.subr.msk.mxu0 %vm4445_vm12, %v4166_v6  ;;  %v668_v22 = vsel %vm448_vm5, %v8303_v7, %v8302_v31  ;;  %v8304_v6 = vld [vmem:[#allocation77_spill] sm:$0xff]  ;;  %v8318_v31 = vld [vmem:[#allocation63_spill] sm:$0xff] }
 0x51e   :  { %v900_v51 = vsel %vm450_vm6, %v899_v30, %v8304_v6  ;;  %v669_v30 = vsel %vm450_vm6, %v668_v22, %v8312_v60  ;;  %v663_v7 = vsel %vm452_vm7, %v662_v48, %v8318_v31  ;;  %v8319_v22 = vld [vmem:[#allocation99_spill] sm:$0xff]  ;;  %v8327_v60 = vld [vmem:[#allocation49_spill] sm:$0xff] }
 0x51f   :  { %v7443_v41 = vpop.permute.xlu1 %4118  ;;  %v4381_v21 = vpop.permute.xlu0 %4380  ;;  %v901_v15 = vsel %vm452_vm7, %v900_v51, %v8307_v11  ;;  %v8320_v51 = vld [vmem:[#allocation46_spill] sm:$0xff]  ;;  %v8321_v11 = vld [vmem:[#allocation103_spill] sm:$0xff]  ;;  %v7531_v48 = vsel %vm454_vm8, %v663_v7, %v8329_v19  ;;  %v8332_v31 = vld [vmem:[#allocation101_spill] sm:$0xff] }
 0x520   :  { %v4396_v13 = vsel %vm460_vm11, %v4395_v46, %v4381_v21  ;;  %v455_v46 = vsel %vm454_vm8, %v453_v18, %v8308_v59  ;;  %v8309_v21 = vld [vmem:[#allocation83_spill] sm:$0xff]  ;;  %v8336_v7 = vld [vmem:[#allocation73_spill] sm:$0xff] }
 0x521   :  { %4684 = vmatprep.subr.msk.mxu1 %vm4445_vm12, %v4396_v13  ;;  %v911_v1 = vsel %vm458_vm10, %v910_v61, %v8309_v21  ;;  %v457_v40 = vsel %vm456_vm9, %v455_v46, %v8310_v57  ;;  %v8311_v13 = vld [vmem:[#allocation43_spill] sm:$0xff]  ;;  %v670_v61 = vsel %vm452_vm7, %v669_v30, %v8316_v43  ;;  %v8323_v46 = vld [vmem:[#allocation104_spill] sm:$0xff]  ;;  %v8330_v43 = vld [vmem:[#allocation66_spill] sm:$0xff] }
 0x522   :  { %v465_v8 = vsel %vm454_vm8, %v464_v54, %v8311_v13  ;;  %v912_v5 = vsel %vm460_vm11, %v911_v1, %v8313_v42  ;;  %v902_v54 = vsel %vm454_vm8, %v901_v15, %v8317_v44  ;;  %v459_v16 = vsel %vm458_vm10, %v457_v40, %v8320_v51  ;;  %v8322_v59 = vld [vmem:[#allocation71_spill] sm:$0xff]  ;;  %v8324_v21 = vld [vmem:[#allocation72_spill] sm:$0xff]  ;;  %v8326_v13 = vld [vmem:[#allocation45_spill] sm:$0xff] }
 0x523   :  { %v7463_v24 = vpop.permute.xlu1 %4348  ;;  %v7465_v25 = vpop.permute.xlu0 %2523  ;;  %v466_v18 = vsel %vm456_vm9, %v465_v8, %v8314_v52  ;;  %v903_v6 = vsel %vm456_vm9, %v902_v54, %v8319_v22  ;;  %v4402_v63 = vrot.slane %v912_v5, 4  ;;  %v1137_v50 = vsel %vm448_vm5, %v8322_v59, %v8321_v11  ;;  %v8325_v57 = vld [vmem:[#allocation59_spill] sm:$0xff]  ;;  %v8328_v5 = vld [vmem:[#allocation60_spill] sm:$0xff]  ;;  %v8331_v54 = vld [vmem:[#allocation82_spill] sm:$0xff] }
 0x524   :  { %v1144_v1 = vsel %vm448_vm5, %v8324_v21, %v8323_v46  ;;  %v7517_v15 = vsel %vm460_vm11, %v459_v16, %v8325_v57  ;;  %v467_v8 = vsel %vm458_vm10, %v466_v18, %v8326_v13  ;;  %v671_v30 = vsel %vm454_vm8, %v670_v61, %v8327_v60  ;;  %v8333_v22 = vld [vmem:[#allocation10_spill] sm:$0xff]  ;;  %v8334_v16 = vld [vmem:[#allocation85_spill] sm:$0xff]  ;;  %v8335_v59 = vld [vmem:[#allocation111_spill] sm:$0xff] }
 0x525   :  { %v468_v52 = vsel %vm460_vm11, %v467_v8, %v8328_v5  ;;  %v7535_v44 = vsel %vm456_vm9, %v671_v30, %v8330_v43  ;;  %v904_v18 = vsel %vm458_vm10, %v903_v6, %v8331_v54  ;;  %v1138_v51 = vsel %vm450_vm6, %v1137_v50, %v8333_v22  ;;  %v8337_v21 = vld [vmem:[#allocation105_spill] sm:$0xff]  ;;  %v8338_v13 = vld [vmem:[#allocation106_spill] sm:$0xff]  ;;  %v8339_v8 = vld [vmem:[#allocation112_spill] sm:$0xff] }
 0x526   :  { %v7541_v61 = vsel %vm460_vm11, %v904_v18, %v8332_v31  ;;  %v1145_v11 = vsel %vm450_vm6, %v1144_v1, %v8334_v16  ;;  %v1367_v46 = vsel %vm448_vm5, %v8336_v7, %v8335_v59  ;;  %v1139_v57 = vsel %vm452_vm7, %v1138_v51, %v8337_v21  ;;  %v8340_v60 = vld [vmem:[#allocation74_spill] sm:$0xff]  ;;  %v8341_v50 = vld [vmem:[#allocation133_spill] sm:$0xff]  ;;  %v8342_v19 = vld [vmem:[#allocation79_spill] sm:$0xff] }
 0x527   :  { %v7491_v12 = vpop.permute.xlu1 %2491  ;;  %v7493_v34 = vpop.permute.xlu0 %2761  ;;  %v1146_v6 = vsel %vm452_vm7, %v1145_v11, %v8338_v13  ;;  %v1374_v30 = vsel %vm448_vm5, %v8340_v60, %v8339_v8  ;;  %v7558_v5 = vsel %vm4445_vm12, %v468_v52, %v4402_v63  ;;  %v1836_v1 = vsel %vm448_vm5, %v8342_v19, %v8341_v50  ;;  %v8343_v43 = vld [vmem:[#allocation138_spill] sm:$0xff]  ;;  %v8344_v54 = vld [vmem:[#allocation84_spill] sm:$0xff]  ;;  %v8345_v11 = vld [vmem:[#allocation87_spill] sm:$0xff] }
 0x528   :  { %v1843_v18 = vsel %vm448_vm5, %v8344_v54, %v8343_v43  ;;  %v4438_v31 = vrot.slane %v7385_v53, 4  ;;  %v3241_v22 = vsel %vm458_vm10, %v7373_v32, %v7417_v0  ;;  %v1368_v63 = vsel %vm450_vm6, %v1367_v46, %v8345_v11  ;;  %v8346_v52 = vld [vmem:[#allocation141_spill] sm:$0xff]  ;;  %v8347_v53 = vld [vmem:[#allocation86_spill] sm:$0xff]  ;;  %v8349_v0 = vld [vmem:[#allocation88_spill] sm:$0xff] }
 0x529   :  { %v1844_v59 = vsel %vm450_vm6, %v1843_v18, %v8346_v52  ;;  %v3936_v7 = vsel %vm460_vm11, %v7328_v27, %v7387_v33  ;;  %v1140_v13 = vsel %vm454_vm8, %v1139_v57, %v8347_v53  ;;  %v8348_v8 = vld [vmem:[#allocation113_spill] sm:$0xff]  ;;  %v1375_v60 = vsel %vm450_vm6, %v1374_v30, %v8349_v0  ;;  %v8350_v50 = vld [vmem:[#allocation107_spill] sm:$0xff]  ;;  %v8351_v43 = vld [vmem:[#allocation14_spill] sm:$0xff] }
 0x52a   :  { %v1369_v32 = vsel %vm452_vm7, %v1368_v63, %v8348_v8  ;;  %v1141_v19 = vsel %vm456_vm9, %v1140_v13, %v8350_v50  ;;  %v1147_v27 = vsel %vm454_vm8, %v1146_v6, %v8351_v43  ;;  %v8352_v33 = vld [vmem:[#allocation114_spill] sm:$0xff]  ;;  %v8353_v18 = vld [vmem:[#allocation132_spill] sm:$0xff]  ;;  %v3475_v63 = vsel %vm458_vm10, %v7379_v36, %v7421_v62  ;;  %v8357_v13 = vld [vmem:[#allocation89_spill] sm:$0xff] }
 0x52b   :  { %v7523_v40 = vpop.permute.xlu1 %2729  ;;  %v7525_v42 = vpop.permute.xlu0 %2991  ;;  %v1376_v54 = vsel %vm452_vm7, %v1375_v60, %v8352_v33  ;;  %v1837_v57 = vsel %vm450_vm6, %v1836_v1, %v8353_v18  ;;  %v8355_v11 = vld [vmem:[#allocation140_spill] sm:$0xff]  ;;  %v1370_v1 = vsel %vm454_vm8, %v1369_v32, %v8357_v13  ;;  %v8358_v8 = vld [vmem:[#allocation143_spill] sm:$0xff]  ;;  %v8361_v62 = vld [vmem:[#allocation90_spill] sm:$0xff] }
 0x52c   :  { %v1845_v30 = vsel %vm452_vm7, %v1844_v59, %v8355_v11  ;;  %v8359_v59 = vld [vmem:[#allocation12_spill] sm:$0xff]  ;;  %v8360_v50 = vld [vmem:[#allocation115_spill] sm:$0xff]  ;;  %v1377_v43 = vsel %vm454_vm8, %v1376_v54, %v8361_v62  ;;  %v8366_v54 = vld [vmem:[#allocation137_spill] sm:$0xff] }
 0x52d   :  { %v1846_v0 = vsel %vm454_vm8, %v1845_v30, %v8358_v8  ;;  %v1371_v36 = vsel %vm456_vm9, %v1370_v1, %v8360_v50  ;;  %v8363_v32 = vld [vmem:[#allocation116_spill] sm:$0xff]  ;;  %v8365_v30 = vld [vmem:[#allocation13_spill] sm:$0xff] }
 0x52e   :  { %v8371_v50 = vld [vmem:[#allocation117_spill] sm:$0xff]  ;;  %v8372_v62 = vld [vmem:[#allocation92_spill] sm:$0xff] }
 0x52f   :  { %v7570_v51 = vpop.permute.xlu1 %2959  ;;  %v3227_v16 = vpop.permute.xlu0 %3226 }
 0x530   :  { %v3242_v21 = vsel %vm460_vm11, %v3241_v22, %v3227_v16  ;;  %v8354_v22 = vld [vmem:[#allocation135_spill] sm:$0xff] }
 0x531   :  { %v7587_v46 = vsel %vm4445_vm12, %v3242_v21, %v4438_v31  ;;  %v1838_v16 = vsel %vm452_vm7, %v1837_v57, %v8354_v22  ;;  %v4440_v31 = vrot.slane %v3936_v7, 4  ;;  %v8356_v21 = vld [vmem:[#allocation108_spill] sm:$0xff]  ;;  %v1142_v7 = vsel %vm458_vm10, %v1141_v19, %v8359_v59  ;;  %v8364_v22 = vld [vmem:[#allocation134_spill] sm:$0xff]  ;;  %v8369_v59 = vld [vmem:[#allocation91_spill] sm:$0xff] }
 0x532   :  { %v1148_v53 = vsel %vm456_vm9, %v1147_v27, %v8356_v21  ;;  %v8362_v27 = vld [vmem:[#allocation109_spill] sm:$0xff]  ;;  %v1378_v57 = vsel %vm456_vm9, %v1377_v43, %v8363_v32  ;;  %v1839_v11 = vsel %vm454_vm8, %v1838_v16, %v8364_v22  ;;  %v4387_v19 = vsel %vm456_vm9, %v7351_v35, %v7397_v58  ;;  %v8373_v43 = vld [vmem:[#allocation119_spill] sm:$0xff] }
 0x533   :  { %v7604_v52 = vpop.permute.xlu1 %3194  ;;  %v3461_v6 = vpop.permute.xlu0 %3460  ;;  %v7622_v18 = vsel %vm460_vm11, %v1142_v7, %v8362_v27  ;;  %v4388_v13 = vsel %vm458_vm10, %v4387_v19, %v7463_v24  ;;  %v1372_v35 = vsel %vm458_vm10, %v1371_v36, %v8369_v59  ;;  %v8370_v58 = vld [vmem:[#allocation145_spill] sm:$0xff]  ;;  %v1379_v24 = vsel %vm458_vm10, %v1378_v57, %v8372_v62  ;;  %v8374_v27 = vld [vmem:[#allocation75_spill] sm:$0xff]  ;;  %v8377_v19 = vld [vmem:[#allocation124_spill] sm:$0xff] }
 0x534   :  { %v3476_v60 = vsel %vm460_vm11, %v3475_v63, %v3461_v6  ;;  %v1149_v63 = vsel %vm458_vm10, %v1148_v53, %v8365_v30  ;;  %v8367_v6 = vld [vmem:[#allocation142_spill] sm:$0xff]  ;;  %v1597_v32 = vsel %vm448_vm5, %v8374_v27, %v8373_v43  ;;  %v8375_v22 = vld [vmem:[#allocation147_spill] sm:$0xff]  ;;  %v8378_v30 = vld [vmem:[#allocation76_spill] sm:$0xff] }
 0x535   :  { %v4461_v33 = vsel %vm4445_vm12, %v3476_v60, %v4440_v31  ;;  %v1840_v31 = vsel %vm456_vm9, %v1839_v11, %v8366_v54  ;;  %v1847_v21 = vsel %vm456_vm9, %v1846_v0, %v8367_v6  ;;  %v8368_v60 = vld [vmem:[#allocation110_spill] sm:$0xff]  ;;  %v7650_v0 = vsel %vm460_vm11, %v1372_v35, %v8371_v50  ;;  %v8376_v11 = vld [vmem:[#allocation11_spill] sm:$0xff]  ;;  %v8379_v54 = vld [vmem:[#allocation136_spill] sm:$0xff] }
 0x536   :  { %v7641_v16 = vsel %vm460_vm11, %v1149_v63, %v8368_v60  ;;  %v1848_v53 = vsel %vm458_vm10, %v1847_v21, %v8370_v58  ;;  %v2074_v36 = vsel %vm448_vm5, %v8376_v11, %v8375_v22  ;;  %v1604_v63 = vsel %vm448_vm5, %v8378_v30, %v8377_v19  ;;  %v8380_v21 = vld [vmem:[#allocation8_spill] sm:$0xff]  ;;  %v8382_v60 = vld [vmem:[#allocation127_spill] sm:$0xff]  ;;  %v8385_v27 = vld [vmem:[#allocation146_spill] sm:$0xff] }
 0x537   :  { %v3429_v1 = vpop.permute.xlu1 %3428  ;;  %v4353_v8 = vpop.permute.xlu0 %4352  ;;  %v1841_v6 = vsel %vm458_vm10, %v1840_v31, %v8379_v54  ;;  %v1605_v59 = vsel %vm450_vm6, %v1604_v63, %v8382_v60  ;;  %v8383_v35 = vld [vmem:[#allocation139_spill] sm:$0xff]  ;;  %v8389_v19 = vld [vmem:[#allocation161_spill] sm:$0xff]  ;;  %v8394_v60 = vld [vmem:[#allocation118_spill] sm:$0xff] }
 0x538   :  { %v4389_v7 = vsel %vm460_vm11, %v4388_v13, %v4353_v8  ;;  %v8381_v13 = vld [vmem:[#allocation160_spill] sm:$0xff]  ;;  %v4157_v8 = vsel %vm456_vm9, %v7344_v55, %v7395_v2  ;;  %v7676_v58 = vsel %vm460_vm11, %v1841_v6, %v8383_v35  ;;  %v2075_v55 = vsel %vm450_vm6, %v2074_v36, %v8385_v27  ;;  %v8388_v11 = vld [vmem:[#allocation27_spill] sm:$0xff]  ;;  %v8393_v36 = vld [vmem:[#allocation9_spill] sm:$0xff] }
 0x539   :  { %4685 = vmatpush1.msk.msra.mxu1 %vm4445_vm12, %v4389_v7  ;;  %v2304_v57 = vsel %vm448_vm5, %v8381_v13, %v8380_v21  ;;  %v8384_v7 = vld [vmem:[#allocation144_spill] sm:$0xff]  ;;  %v4158_v31 = vsel %vm458_vm10, %v4157_v8, %v7443_v41  ;;  %v2311_v30 = vsel %vm448_vm5, %v8389_v19, %v8388_v11  ;;  %v8391_v6 = vld [vmem:[#allocation155_spill] sm:$0xff]  ;;  %v7704_v35 = vsel %vm460_vm11, %v1379_v24, %v8394_v60 }
 0x53a   :  { %4574 = vmatprep.subr.mxu1 %v4461_v33  ;;  %v7680_v50 = vsel %vm460_vm11, %v1848_v53, %v8384_v7  ;;  %v8386_v2 = vld [vmem:[#allocation152_spill] sm:$0xff]  ;;  %v8387_v33 = vld [vmem:[#allocation93_spill] sm:$0xff]  ;;  %v2312_v8 = vsel %vm450_vm6, %v2311_v30, %v8393_v36  ;;  %v8395_v7 = vld [vmem:[#allocation94_spill] sm:$0xff]  ;;  %v4413_v24 = vrot.slane %v7676_v58, 4 }
 0x53b   :  { %v4123_v62 = vpop.permute.xlu1 %4122  ;;  %v2528_v43 = vpop.permute.xlu0 %2527  ;;  %v2081_v22 = vsel %vm448_vm5, %v8387_v33, %v8386_v2  ;;  %v8390_v53 = vld [vmem:[#allocation149_spill] sm:$0xff]  ;;  %v8392_v21 = vld [vmem:[#allocation168_spill] sm:$0xff]  ;;  %v4414_v30 = vrot.slane %v7680_v50, 4  ;;  %v2776_v50 = vsel %vm458_vm10, %v7357_v56, %v7406_v38 }
 0x53c   :  { %v4159_v63 = vsel %vm460_vm11, %v4158_v31, %v4123_v62  ;;  %v2076_v54 = vsel %vm452_vm7, %v2075_v55, %v8390_v53  ;;  %v2082_v41 = vsel %vm450_vm6, %v2081_v22, %v8391_v6  ;;  %v2305_v13 = vsel %vm450_vm6, %v2304_v57, %v8392_v21  ;;  %v8396_v62 = vld [vmem:[#allocation126_spill] sm:$0xff]  ;;  %v8398_v57 = vld [vmem:[#allocation121_spill] sm:$0xff] }
 0x53d   :  { %4682 = vmatpush1.msk.msra.mxu0 %vm4445_vm12, %v4159_v63  ;;  %v1598_v31 = vsel %vm450_vm6, %v1597_v32, %v8395_v7  ;;  %v1606_v27 = vsel %vm452_vm7, %v1605_v59, %v8396_v62  ;;  %v8397_v55 = vld [vmem:[#allocation22_spill] sm:$0xff]  ;;  %v8399_v22 = vld [vmem:[#allocation129_spill] sm:$0xff]  ;;  %v3929_v32 = vsel %vm460_vm11, %v7393_v37, %v7425_v45  ;;  %v2777_v56 = vsel %vm460_vm11, %v2776_v50, %v7493_v34 }
 0x53e   :  { %v2306_v2 = vsel %vm452_vm7, %v2305_v13, %v8397_v55  ;;  %4503 = vmatprep.subr.mxu0 %v7587_v46  ;;  %v7715_v33 = vsel %vm452_vm7, %v1598_v31, %v8398_v57  ;;  %v7719_v11 = vsel %vm454_vm8, %v1606_v27, %v8399_v22  ;;  %v8400_v46 = vld [vmem:[#allocation148_spill] sm:$0xff]  ;;  %v8401_v53 = vld [vmem:[#allocation154_spill] sm:$0xff]  ;;  %v8402_v21 = vld [vmem:[#allocation21_spill] sm:$0xff]  ;;  %v4439_v62 = vrot.slane %v3929_v32, 4 }
 0x53f   :  { %v7725_v59 = vpop.permute.xlu1 %2495  ;;  %v2964_v19 = vpop.permute.xlu0 %2963  ;;  %v2077_v63 = vsel %vm454_vm8, %v2076_v54, %v8400_v46  ;;  %v2083_v6 = vsel %vm452_vm7, %v2082_v41, %v8401_v53  ;;  %v2313_v13 = vsel %vm452_vm7, %v2312_v8, %v8402_v21  ;;  %v8403_v36 = vld [vmem:[#allocation157_spill] sm:$0xff]  ;;  %v8405_v45 = vld [vmem:[#allocation26_spill] sm:$0xff]  ;;  %v2768_v54 = vsel %vm456_vm9, %v7361_v9, %v7411_v4  ;;  %v8409_v57 = vld [vmem:[#allocation32_spill] sm:$0xff] }
 0x540   :  { %v2084_v60 = vsel %vm454_vm8, %v2083_v6, %v8403_v36  ;;  %v8404_v7 = vld [vmem:[#allocation17_spill] sm:$0xff]  ;;  %v2314_v31 = vsel %vm454_vm8, %v2313_v13, %v8405_v45  ;;  %v3006_v41 = vsel %vm458_vm10, %v7365_v3, %v7413_v28  ;;  %v3467_v8 = vsel %vm456_vm9, %v7382_v47, %v7423_v10  ;;  %v8406_v3 = vld [vmem:[#allocation18_spill] sm:$0xff] }
 0x541   :  { %v2307_v37 = vsel %vm454_vm8, %v2306_v2, %v8404_v7  ;;  %v3699_v27 = vsel %vm460_vm11, %v7390_v17, %v7431_v23  ;;  %v2769_v38 = vsel %vm458_vm10, %v2768_v54, %v7523_v40  ;;  %v3468_v9 = vsel %vm458_vm10, %v3467_v8, %v3429_v1  ;;  %v8407_v23 = vld [vmem:[#allocation156_spill] sm:$0xff]  ;;  %v8408_v2 = vld [vmem:[#allocation31_spill] sm:$0xff] }
 0x542   :  { %v2315_v28 = vsel %vm456_vm9, %v2314_v31, %v8406_v3  ;;  %v3007_v47 = vsel %vm460_vm11, %v3006_v41, %v7525_v42  ;;  %v2085_v34 = vsel %vm456_vm9, %v2084_v60, %v8407_v23  ;;  %v2308_v40 = vsel %vm456_vm9, %v2307_v37, %v8408_v2  ;;  %v8410_v37 = vld [vmem:[#allocation151_spill] sm:$0xff]  ;;  %v8420_v2 = vld [vmem:[#allocation128_spill] sm:$0xff] }
 0x543   :  { %v2734_v4 = vpop.permute.xlu1 %2733  ;;  %v3433_v55 = vpop.permute.xlu0 %3432  ;;  %v2316_v1 = vsel %vm458_vm10, %v2315_v28, %v8409_v57  ;;  %v3233_v32 = vsel %vm456_vm9, %v7376_v49, %v7419_v14  ;;  %v4437_v42 = vrot.slane %v3699_v27, 4  ;;  %v2545_v46 = vsel %vm456_vm9, %v7400_v26, %v7465_v25  ;;  %v8411_v49 = vld [vmem:[#allocation159_spill] sm:$0xff]  ;;  %v8412_v25 = vld [vmem:[#allocation20_spill] sm:$0xff] }
 0x544   :  { %v2770_v10 = vsel %vm460_vm11, %v2769_v38, %v2734_v4  ;;  %v3469_v17 = vsel %vm460_vm11, %v3468_v9, %v3433_v55  ;;  %v4426_v53 = vrot.slane %v2777_v56, 4  ;;  %v4428_v6 = vrot.slane %v3007_v47, 4  ;;  %v8413_v54 = vld [vmem:[#allocation23_spill] sm:$0xff]  ;;  %v8415_v38 = vld [vmem:[#allocation150_spill] sm:$0xff]  ;;  %v8417_v47 = vld [vmem:[#allocation120_spill] sm:$0xff] }
 0x545   :  { %v4460_v22 = vsel %vm4445_vm12, %v3469_v17, %v4439_v62  ;;  %v3234_v21 = vsel %vm458_vm10, %v3233_v32, %v7604_v52  ;;  %v2546_v13 = vsel %vm458_vm10, %v2545_v46, %v2528_v43  ;;  %v4425_v36 = vrot.slane %v2770_v10, 4  ;;  %v8416_v4 = vld [vmem:[#allocation158_spill] sm:$0xff]  ;;  %v8421_v57 = vld [vmem:[#allocation131_spill] sm:$0xff] }
 0x546   :  { %4575 = vmatpush1.msra.mxu1 %v4460_v22  ;;  %v2078_v45 = vsel %vm456_vm9, %v2077_v63, %v8410_v37  ;;  %v2086_v14 = vsel %vm458_vm10, %v2085_v34, %v8411_v49  ;;  %v2309_v50 = vsel %vm458_vm10, %v2308_v40, %v8412_v25  ;;  %v2317_v41 = vsel %vm460_vm11, %v2316_v1, %v8413_v54  ;;  %v8414_v63 = vld [vmem:[#allocation25_spill] sm:$0xff]  ;;  %v8419_v34 = vld [vmem:[#allocation123_spill] sm:$0xff]  ;;  %v8428_v37 = vld [vmem:[#allocation68_spill] sm:$0xff] }
 0x547   :  { %v3199_v60 = vpop.permute.xlu1 %3198  ;;  %v2532_v7 = vpop.permute.xlu0 %2531  ;;  %v4401_v8 = vrot.slane %v7541_v61, 4  ;;  %v2310_v62 = vsel %vm460_vm11, %v2309_v50, %v8414_v63  ;;  %v2998_v27 = vsel %vm456_vm9, %v7369_v20, %v7415_v29  ;;  %v4455_v56 = vsel %vm4445_vm12, %v2317_v41, %v4426_v53  ;;  %v8418_v29 = vld [vmem:[#allocation153_spill] sm:$0xff]  ;;  %v8423_v53 = vld [vmem:[#allocation122_spill] sm:$0xff] }
 0x548   :  { %v3235_v31 = vsel %vm460_vm11, %v3234_v21, %v3199_v60  ;;  %v2547_v26 = vsel %vm460_vm11, %v2546_v13, %v2532_v7  ;;  %v2079_v9 = vsel %vm458_vm10, %v2078_v45, %v8415_v38  ;;  %v2087_v55 = vsel %vm460_vm11, %v2086_v14, %v8416_v4  ;;  %v8425_v13 = vld [vmem:[#allocation51_spill] sm:$0xff]  ;;  %v8427_v60 = vld [vmem:[#allocation52_spill] sm:$0xff] }
 0x549   :  { %v4458_v52 = vsel %vm4445_vm12, %v3235_v31, %v4437_v42  ;;  %v4457_v43 = vsel %vm4445_vm12, %v2547_v26, %v4428_v6  ;;  %v2999_v61 = vsel %vm458_vm10, %v2998_v27, %v7570_v51  ;;  %v4454_v28 = vsel %vm4445_vm12, %v2310_v62, %v4425_v36  ;;  %v8429_v14 = vld [vmem:[#allocation67_spill] sm:$0xff] }
 0x54a   :  { %4504 = vmatpush1.msra.mxu0 %v4458_v52  ;;  %4576 = vmatprep.subr.mxu1 %v4457_v43  ;;  %v1600_v20 = vsel %vm454_vm8, %v7715_v33, %v8417_v47  ;;  %v2080_v10 = vsel %vm460_vm11, %v2079_v9, %v8418_v29  ;;  %v3000_v17 = vsel %vm460_vm11, %v2999_v61, %v2964_v19  ;;  %v4404_v32 = vrot.slane %v7641_v16, 4  ;;  %v8426_v16 = vld [vmem:[#allocation125_spill] sm:$0xff] }
 0x54b   :  { %v2500_v3 = vpop.permute.xlu1 %2499  ;;  %4505 = vmatprep.subr.mxu0 %v4455_v56  ;;  %v4451_v23 = vsel %vm4445_vm12, %v7704_v35, %v4414_v30  ;;  %v1601_v51 = vsel %vm456_vm9, %v1600_v20, %v8419_v34  ;;  %v1608_v40 = vsel %vm456_vm9, %v7719_v11, %v8420_v2  ;;  %v2537_v33 = vsel %vm454_vm8, %v7409_v39, %v7491_v12  ;;  %v4462_v11 = vld [vmem:[%s7872_s1] sm:$0xff]  ;;  %s4772_s1 = smov [#allocation5]  }
 0x54c   :  { %4506 = vmatpush1.msra.mxu0 %v4454_v28  ;;  %v4450_v19 = vsel %vm4445_vm12, %v7650_v0, %v4413_v24  ;;  %v1609_v35 = vsel %vm458_vm10, %v1608_v40, %v8421_v57  ;;  %v4416_v30 = vrot.slane %v2087_v55, 4  ;;  %v2538_v1 = vsel %vm456_vm9, %v2537_v33, %v7725_v59  ;;  %v8422_v24 = vld [vmem:[#allocation65_spill] sm:$0xff]  ;;  %s4669_s4 = sshll.u32 %s4772_s1, 4  ;;  %s4670_s4 = int_to_ptr.vmem [resolvable:$true] %s4669_s4 }
 0x54d   :  { %4507 = vmatprep.subr.mxu0 %v4451_v23  ;;  %v4415_v39 = vrot.slane %v2080_v10, 4  ;;  %v4427_v12 = vrot.slane %v3000_v17, 4  ;;  %v2539_v58 = vsel %vm458_vm10, %v2538_v1, %v2500_v3  ;;  %v4446_v0 = vsel %vm4445_vm12, %v7517_v15, %v4401_v8  ;;  %s4731_s5 = scalar_lea.vmem %s4670_s4, 512  ;;  %p4736_p6 = scmp.lt.s32.totalorder %s4670_s4, %s4670_s4 }
 0x54e   :  { %4508 = vmatpush1.msra.mxu0 %v4450_v19  ;;  %v665_v59 = vsel %vm456_vm9, %v7531_v48, %v8422_v24  ;;  %v4403_v46 = vrot.slane %v7622_v18, 4  ;;  %v1602_v6 = vsel %vm458_vm10, %v1601_v51, %v8423_v53  ;;  %v673_v48 = vsel %vm458_vm10, %v7535_v44, %v8425_v13  ;;  %p4732_p5 = scmp.ne.s32.totalorder %s4670_s4, %s4731_s5  ;;  %p4737_p7 = scmp.lt.s32.totalorder %s4731_s5, %s4731_s5 }
 0x54f   :  { %v2504_v22 = vpop.permute.xlu1 %2503  ;;  %4509 = vmatprep.subr.mxu0 %v7558_v5  ;;  %v8424_v5 = vld [vmem:[#allocation130_spill] sm:$0xff]  ;;  %v1603_v36 = vsel %vm460_vm11, %v1602_v6, %v8426_v16  ;;  %v666_v7 = vsel %vm458_vm10, %v665_v59, %v8427_v60  ;;  %v674_v45 = vsel %vm460_vm11, %v673_v48, %v8428_v37 }
 0x550   :  { %v2540_v42 = vsel %vm460_vm11, %v2539_v58, %v2504_v22  ;;  %4510 = vmatpush1.msra.mxu0 %v4446_v0  ;;  %v1610_v15 = vsel %vm460_vm11, %v1609_v35, %v8424_v5  ;;  %v4452_v49 = vsel %vm4445_vm12, %v1603_v36, %v4415_v39  ;;  %v667_v31 = vsel %vm460_vm11, %v666_v7, %v8429_v14  ;;  %p4738_p8 = por %p4737_p7, %p4736_p6 }
 0x551   :  { %v4456_v21 = vsel %vm4445_vm12, %v2540_v42, %v4427_v12  ;;  %4683 = vmatmul.mubr.msk.f32.vlgmr.msra.gmra.mxu0 %vm4463_vm13, %v4462_v11  ;;  %v4453_v18 = vsel %vm4445_vm12, %v1610_v15, %v4416_v30  ;;  %v4449_v44 = vsel %vm4445_vm12, %v674_v45, %v4404_v32  ;;  %v4448_v26 = vsel %vm4445_vm12, %v667_v31, %v4403_v46 }
 0x552   :  { %4577 = vmatpush1.msra.mxu1 %v4456_v21  ;;  %p4739_p9 = pnand %p4738_p8, %p4732_p5 }
 0x553   :  { %4578 = vmatprep.subr.mxu1 %v4453_v18 }
 0x554   :  { %4579 = vmatpush1.msra.mxu1 %v4452_v49  ;;  %v4629_v50 = vpop.permute.xlu0 %4628 }
 0x555   :  { %4580 = vmatprep.subr.mxu1 %v4449_v44 }
 0x556   :  { %4581 = vmatpush1.msra.mxu1 %v4448_v26 }
 0x557   :  { %4686 = vmatmul.mubr.msk.f32.vlgmr.msra.gmra.mxu1 %vm4463_vm13, %v4462_v11 }
 0x611   :  { %v4545_v25 = vpop.f32.mrf.mxu0 }
 0x612   :  { %v4621_v52 = vmul.f32 0.16666667, %v4545_v25 }
 0x613   :  { %v4547_v43 = vpop.f32.mrf.mxu0 }
 0x614   :  { %v4622_v54 = vmul.f32 0.16666667, %v4547_v43  ;;  %v4631_v41 = vadd.f32 %v4629_v50, %v4621_v52 }
 0x616   :  { %v4632_v8 = vadd.f32 %v4629_v50, %v4622_v54  ;;  %vm4635_vm14 = vcmp.ge.f32.partialorder %v4631_v41, 0.0  ;;  %v4639_v63 = vmul.f32 0.2, %v4631_v41 }
 0x617   :  { %v4616_v62 = vpop.f32.mrf.mxu1 }
 0x618   :  { %v4623_v27 = vmul.f32 0.16666667, %v4616_v62  ;;  %vm4636_vm15 = vcmp.ge.f32.partialorder %v4632_v8, 0.0  ;;  %v4640_v56 = vmul.f32 0.2, %v4632_v8  ;;  %v4643_v38 = vsel %vm4635_vm14, %v4631_v41, %v4639_v63 }
 0x619   :  { %v4647_v9 = vmul.f32 1.4142135, %v4643_v38  ;;  %v4618_v4 = vpop.f32.mrf.mxu1 }
 0x61a   :  { %v4633_v55 = vadd.f32 %v4629_v50, %v4623_v27  ;;  %v4644_v61 = vsel %vm4636_vm15, %v4632_v8, %v4640_v56  ;;  %v4624_v3 = vmul.f32 0.16666667, %v4618_v4 }
 0x61b   :  { %v4648_v28 = vmul.f32 1.4142135, %v4644_v61  ;;  %v4687_v47 = vclamps-f32 %v4647_v9, 256.0 }
 0x61c   :  { %vm4637_vm0 = vcmp.ge.f32.partialorder %v4633_v55, 0.0  ;;  %v4641_v20 = vmul.f32 0.2, %v4633_v55  ;;  %v4634_v29 = vadd.f32 %v4629_v50, %v4624_v3 }
 0x61d   :  { %v4688_v10 = vclamps-f32 %v4648_v28, 256.0  ;;  %4659 = vst [vmem:[#allocation5] sm:$0xff] %v4687_v47 }
 0x61e   :  { %v4645_v17 = vsel %vm4637_vm0, %v4633_v55, %v4641_v20  ;;  %vm4638_vm1 = vcmp.ge.f32.partialorder %v4634_v29, 0.0  ;;  %v4642_v23 = vmul.f32 0.2, %v4634_v29 }
 0x61f   :  { %v4649_v34 = vmul.f32 1.4142135, %v4645_v17  ;;  %4660 = vst [vmem:[#allocation5 + $0x8] sm:$0xff] %v4688_v10 }
 0x620   :  { %v4646_v51 = vsel %vm4638_vm1, %v4634_v29, %v4642_v23 }
 0x621   :  { %v4689_v2 = vclamps-f32 %v4649_v34, 256.0  ;;  %v4650_v40 = vmul.f32 1.4142135, %v4646_v51 }
 0x623   :  { %4662 = vst [vmem:[#allocation5 + $0x10] sm:$0xff] %v4689_v2  ;;  %v4690_v33 = vclamps-f32 %v4650_v40, 256.0 }
 0x625   :  { %4663 = vst [vmem:[#allocation5 + $0x18] sm:$0xff] %v4690_v33 }
 0x626   :  { %4742 = shalt.err (!%p4739_p9)
}
 0x627   :  { %s4773_s6 = smov 256  }
 0x628   :  { %4675 = dma.vmem_to_hbm [thread:$0]  %s4670_s4, 512, %s7874_s3, [#allocation4], %s4773_s6, %s4773_s6, %s4767_s24  }
 0x629   :  { %4753 = dma.done.wait [#allocation4], 512  }
 0x62a   :  { %4754 = vsyncadd [#allocation4], 4294966784 }
 0x62b   :  { %4679 = vsyncpa [#allocation3], 1 }
 0x62c   :  { %4680 = vsyncpa [#allocation4], 1 }

</bundles_post_ra>
